<compile_context>
chip_gen: v5e
topology: v5e:2x2
jax: 0.10.0
libtpu: 0.0.40
codegen_flags: <defaults>
</compile_context>

<pallas_src>
import functools

import jax
import jax.numpy as jnp
from jax import lax
from jax.experimental import pallas as pl
from jax.experimental.pallas import tpu as pltpu

EPS = 1e-5     # PyTorch BatchNorm2d default eps
LANE = 128


def _round_up(x, m):
    return ((x + m - 1) // m) * m


def _vmem_limit_bytes():
    """Generation-aware scoped-VMEM limit (leave headroom on v7x's 64 MiB)."""
    try:
        cap = getattr(pltpu.get_tpu_info(), "vmem_capacity_bytes", None)
        if cap:
            return int(min(cap * 3 // 4, 100 * 1024 * 1024))
    except Exception:
        pass
    return 48 * 1024 * 1024


# ----------------------------- Pallas kernel ------------------------------- #

def _bn_fold(y, g, b):
    """Train-mode BatchNorm over axis 0, two-pass mean/var, all f32."""
    inv_m = 1.0 / y.shape[0]
    mu = jnp.sum(y, axis=0, keepdims=True) * inv_m
    yc = y - mu
    var = jnp.sum(yc * yc, axis=0, keepdims=True) * inv_m
    s = g * lax.rsqrt(var + EPS)
    return yc * s + b


def _block_kernel(*refs, N, Ho, Wo, cin, cout, stride, proj, k1_pad, k2_pad):
    """Fused BasicBlock forward on VMEM-resident tensors (raw channel dims)."""
    if proj:
        (xph_ref, w1_ref, g1_ref, b1_ref, w2_ref, g2_ref, b2_ref,
         ws_ref, gs_ref, bs_ref,
         o_ref, slab1_ref, slab2_ref, h1p_ref) = refs
    else:
        (xph_ref, w1_ref, g1_ref, b1_ref, w2_ref, g2_ref, b2_ref,
         o_ref, slab1_ref, slab2_ref, h1p_ref) = refs

    M = N * Ho * Wo
    bf16 = jnp.bfloat16
    f32 = jnp.float32

    # ---- conv1: in-kernel im2col folded into K -> ONE bf16 MXU matmul ------
    if 9 * cin < k1_pad:                              # zero only the K padding
        slab1_ref[:, 9 * cin:] = jnp.zeros((M, k1_pad - 9 * cin), bf16)
    center = None
    for dh in range(3):
        p, ah = dh % stride, dh // stride
        for dw in range(3):
            q, aw = dw % stride, dw // stride
            ph = p * stride + q
            tap = xph_ref[ph * N:(ph + 1) * N, ah:ah + Ho, aw:aw + Wo, :]
            tap = tap.reshape(M, cin)                 # bf16, no cast
            k0 = (dh * 3 + dw) * cin
            slab1_ref[:, k0:k0 + cin] = tap
            if dh == 1 and dw == 1:
                center = tap                          # == strided input
    k1 = slab1_ref[...]
    y1 = jnp.dot(k1, w1_ref[...], preferred_element_type=f32)

    # ---- shortcut (reuses the conv1 K-slab / centre tap) --------------------
    if proj:
        ysc = jnp.dot(k1, ws_ref[...], preferred_element_type=f32)
        sc = _bn_fold(ysc, gs_ref[...], bs_ref[...])
    else:
        sc = center.astype(f32)                       # identity shortcut

    # ---- bn1 + relu -> bf16 halo scratch (halo-only zeroing) ----------------
    h1 = jnp.maximum(_bn_fold(y1, g1_ref[...], b1_ref[...]), 0.0)
    Wp = h1p_ref.shape[2]
    zrow = jnp.zeros((N, 1, Wp, cout), bf16)
    zcol = jnp.zeros((N, Ho + 2, 1, cout), bf16)
    h1p_ref[:, 0:1, :, :] = zrow
    h1p_ref[:, Ho + 1:Ho + 2, :, :] = zrow
    h1p_ref[:, :, 0:1, :] = zcol
    h1p_ref[:, :, Wo + 1:Wo + 2, :] = zcol
    h1p_ref[:, 1:Ho + 1, 1:Wo + 1, :] = (
        h1.reshape(N, Ho, Wo, cout).astype(bf16))

    # ---- conv2 (3x3, stride 1): second K-slab, one matmul -------------------
    if 9 * cout < k2_pad:
        slab2_ref[:, 9 * cout:] = jnp.zeros((M, k2_pad - 9 * cout), bf16)
    for dh in range(3):
        for dw in range(3):
            tap = h1p_ref[:, dh:dh + Ho, dw:dw + Wo, :].reshape(M, cout)
            k0 = (dh * 3 + dw) * cout
            slab2_ref[:, k0:k0 + cout] = tap
    y2 = jnp.dot(slab2_ref[...], w2_ref[...], preferred_element_type=f32)
    y2 = _bn_fold(y2, g2_ref[...], b2_ref[...])

    o_ref[...] = jnp.maximum(y2 + sc, 0.0)


# ------------------------------- JAX glue ---------------------------------- #

def _phase_split(xp, stride):
    """Space-to-depth: xph[(p*s+q)*N + n, i, j, c] == xp[n, s*i+p, s*j+q, c].

    Lets every 3x3 tap of a stride-s conv be a contiguous shifted window of a
    VMEM-resident tensor.  Identity for stride 1.
    """
    N, Hp, Wp, C = xp.shape
    s = stride
    Hq = -(-Hp // s)
    Wq = -(-Wp // s)
    xp = jnp.pad(xp, ((0, 0), (0, Hq * s - Hp), (0, Wq * s - Wp), (0, 0)))
    xr = xp.reshape(N, Hq, s, Wq, s, C).transpose(2, 4, 0, 1, 3, 5)
    return xr.reshape(s * s * N, Hq, Wq, C)


@functools.partial(jax.jit, static_argnums=(2,))
def basic_block_forward(x_nchw, params, stride):
    """Pallas implementation of BasicBlock.forward.  x_nchw: (N, Cin, H, W)."""
    x = jnp.transpose(x_nchw, (0, 2, 3, 1)).astype(jnp.bfloat16)   # NHWC, bf16
    N, H, W, cin = x.shape
    cout = params["w1"].shape[-1]
    Ho = (H - 1) // stride + 1
    Wo = (W - 1) // stride + 1
    proj = (stride != 1) or (cin != cout)
    M = N * Ho * Wo
    k1_pad = _round_up(9 * cin, LANE)
    k2_pad = _round_up(9 * cout, LANE)
    Wp2 = _round_up(Wo + 2, 8)                        # sublane-aligned scratch

    # spatial pad 1 + phase split; channels stay at their raw count (no 128 pad)
    xp = jnp.pad(x, ((0, 0), (1, 1), (1, 1), (0, 0)))
    xph = _phase_split(xp, stride)

    # weights: HWIO -> (9*C, cout), K rows zero-padded to the slab width, bf16
    w1 = params["w1"].reshape(9 * cin, cout)
    w1 = jnp.pad(w1, ((0, k1_pad - 9 * cin), (0, 0))).astype(jnp.bfloat16)
    w2 = params["w2"].reshape(9 * cout, cout)
    w2 = jnp.pad(w2, ((0, k2_pad - 9 * cout), (0, 0))).astype(jnp.bfloat16)

    g1 = params["g1"][None, :]; b1 = params["b1"][None, :]
    g2 = params["g2"][None, :]; b2 = params["b2"][None, :]

    args = [xph, w1, g1, b1, w2, g2, b2]
    if proj:
        # 1x1 projection weight embedded at the centre-tap rows of the conv1 slab
        ws_full = jnp.zeros((k1_pad, cout), jnp.float32)
        ws_full = ws_full.at[4 * cin:5 * cin, :].set(params["ws"])
        args += [ws_full.astype(jnp.bfloat16),
                 params["gs"][None, :], params["bs"][None, :]]

    kernel = functools.partial(
        _block_kernel, N=N, Ho=Ho, Wo=Wo, cin=cin, cout=cout,
        stride=stride, proj=proj, k1_pad=k1_pad, k2_pad=k2_pad)

    out2d = pl.pallas_call(
        kernel,
        out_shape=jax.ShapeDtypeStruct((M, cout), jnp.float32),
        in_specs=[pl.BlockSpec(memory_space=pltpu.MemorySpace.VMEM)] * len(args),
        out_specs=pl.BlockSpec(memory_space=pltpu.MemorySpace.VMEM),
        scratch_shapes=[
            pltpu.VMEM((M, k1_pad), jnp.bfloat16),            # conv1 K-slab
            pltpu.VMEM((M, k2_pad), jnp.bfloat16),            # conv2 K-slab
            pltpu.VMEM((N, Ho + 2, Wp2, cout), jnp.bfloat16), # h1 + 1px halo
        ],
        compiler_params=pltpu.CompilerParams(
            vmem_limit_bytes=_vmem_limit_bytes()),
    )(*args)

    out = out2d.reshape(N, Ho, Wo, cout)
    return jnp.transpose(out, (0, 3, 1, 2)).astype(jnp.float32)   # back to NCHW


# --------------------------- pure-JAX reference ----------------------------- #

def _bn_train_ref(y_nhwc, g, b):
    mu = jnp.mean(y_nhwc, axis=(0, 1, 2), keepdims=True)
    var = jnp.mean((y_nhwc - mu) ** 2, axis=(0, 1, 2), keepdims=True)
    return (y_nhwc - mu) * lax.rsqrt(var + EPS) * g + b


def reference_forward(x_nchw, params, stride):
    x = jnp.transpose(x_nchw, (0, 2, 3, 1)).astype(jnp.float32)
    cin = x.shape[-1]
    cout = params["w1"].shape[-1]
    dn = ("NHWC", "HWIO", "NHWC")

    o = lax.conv_general_dilated(x, params["w1"], (stride, stride),
                                 ((1, 1), (1, 1)), dimension_numbers=dn)
    o = jnp.maximum(_bn_train_ref(o, params["g1"], params["b1"]), 0.0)
    o = lax.conv_general_dilated(o, params["w2"], (1, 1),
                                 ((1, 1), (1, 1)), dimension_numbers=dn)
    o = _bn_train_ref(o, params["g2"], params["b2"])
    if stride != 1 or cin != cout:
        sc = lax.conv_general_dilated(
            x, params["ws"].reshape(1, 1, cin, cout), (stride, stride),
            ((0, 0), (0, 0)), dimension_numbers=dn)
        sc = _bn_train_ref(sc, params["gs"], params["bs"])
    else:
        sc = x
    o = jnp.maximum(o + sc, 0.0)
    return jnp.transpose(o, (0, 3, 1, 2))


# ------------------------------ param init ---------------------------------- #

def init_params(key, cin, cout, stride):
    ks = jax.random.split(key, 9)
    p = {
        "w1": 0.1 * jax.random.normal(ks[0], (3, 3, cin, cout), jnp.float32),
        "g1": 1.0 + 0.1 * jax.random.normal(ks[1], (cout,), jnp.float32),
        "b1": 0.1 * jax.random.normal(ks[2], (cout,), jnp.float32),
        "w2": 0.1 * jax.random.normal(ks[3], (3, 3, cout, cout), jnp.float32),
        "g2": 1.0 + 0.1 * jax.random.normal(ks[4], (cout,), jnp.float32),
        "b2": 0.1 * jax.random.normal(ks[5], (cout,), jnp.float32),
    }
    if stride != 1 or cin != cout:
        p["ws"] = 0.1 * jax.random.normal(ks[6], (cin, cout), jnp.float32)
        p["gs"] = 1.0 + 0.1 * jax.random.normal(ks[7], (cout,), jnp.float32)
        p["bs"] = 0.1 * jax.random.normal(ks[8], (cout,), jnp.float32)
    return p


# --------------------------------- main -------------------------------------- #

if __name__ == "__main__":
    key = jax.random.PRNGKey(0)
    kx, kp1, kp2 = jax.random.split(key, 3)

    # Tolerance reflects bf16 MXU operands / bf16 activation storage vs the
    # f32 reference (intentional precision trade-off).
    TOL = 5e-2

    # Case 1: downsampling block (stride=2, 4 -> 8 channels, projection shortcut)
    x = jax.random.normal(kx, (2, 4, 16, 16), jnp.float32)   # NCHW
    params_a = init_params(kp1, cin=4, cout=8, stride=2)
    out_a = jax.block_until_ready(basic_block_forward(x, params_a, 2))
    ref_a = reference_forward(x, params_a, 2)
    assert out_a.shape == (2, 8, 8, 8), out_a.shape
    assert jnp.allclose(out_a, ref_a, atol=TOL, rtol=TOL), (
        float(jnp.max(jnp.abs(out_a - ref_a))))

    # Case 2: identity-shortcut block (stride=1, 4 -> 4 channels)
    params_b = init_params(kp2, cin=4, cout=4, stride=1)
    out_b = jax.block_until_ready(basic_block_forward(x, params_b, 1))
    ref_b = reference_forward(x, params_b, 1)
    assert out_b.shape == (2, 4, 16, 16), out_b.shape
    assert jnp.allclose(out_b, ref_b, atol=TOL, rtol=TOL), (
        float(jnp.max(jnp.abs(out_b - ref_b))))

    print("KERNEL_OK")
</pallas_src>

<mosaic_0001>
module attributes {stable_mosaic.version = 11 : i64} {
  func.func @_block_kernel(%arg0: memref<8x9x9x4xbf16, #tpu.memory_space<vmem>>, %arg1: memref<128x8xbf16, #tpu.memory_space<vmem>>, %arg2: memref<1x8xf32, #tpu.memory_space<vmem>>, %arg3: memref<1x8xf32, #tpu.memory_space<vmem>>, %arg4: memref<128x8xbf16, #tpu.memory_space<vmem>>, %arg5: memref<1x8xf32, #tpu.memory_space<vmem>>, %arg6: memref<1x8xf32, #tpu.memory_space<vmem>>, %arg7: memref<128x8xbf16, #tpu.memory_space<vmem>>, %arg8: memref<1x8xf32, #tpu.memory_space<vmem>>, %arg9: memref<1x8xf32, #tpu.memory_space<vmem>>, %arg10: memref<128x8xf32, #tpu.memory_space<vmem>>, %arg11: memref<128x128xbf16, #tpu.memory_space<vmem>>, %arg12: memref<128x128xbf16, #tpu.memory_space<vmem>>, %arg13: memref<2x10x16x8xbf16, #tpu.memory_space<vmem>>) attributes {dimension_semantics = [], scalar_prefetch = 0 : i64, scratch_operands = 3 : i64, tpu.core_type = #tpu.core_type<tc>} {
    %cst = arith.constant 0.000000e+00 : bf16
    %0 = vector.broadcast %cst : bf16 to vector<128x92xbf16>
    %c0 = arith.constant 0 : index
    %c36 = arith.constant 36 : index
    %1 = vector.load %arg11[%c0, %c36] : memref<128x128xbf16, #tpu.memory_space<vmem>>, vector<128x92xbf16>
    tpu.vector_store %arg11[%c0, %c36], %0 {strides = array<i32>} : memref<128x128xbf16, #tpu.memory_space<vmem>>, vector<128x92xbf16>,
    %c0_0 = arith.constant 0 : index
    %c0_1 = arith.constant 0 : index
    %c0_2 = arith.constant 0 : index
    %c0_3 = arith.constant 0 : index
    %2 = vector.load %arg0[%c0_0, %c0_1, %c0_2, %c0_3] : memref<8x9x9x4xbf16, #tpu.memory_space<vmem>>, vector<2x8x8x4xbf16>
    %3 = vector.shape_cast %2 : vector<2x8x8x4xbf16> to vector<128x4xbf16>
    %c0_4 = arith.constant 0 : index
    %c0_5 = arith.constant 0 : index
    %4 = vector.load %arg11[%c0_4, %c0_5] : memref<128x128xbf16, #tpu.memory_space<vmem>>, vector<128x4xbf16>
    tpu.vector_store %arg11[%c0_4, %c0_5], %3 {strides = array<i32>} : memref<128x128xbf16, #tpu.memory_space<vmem>>, vector<128x4xbf16>,
    %c2 = arith.constant 2 : index
    %c0_6 = arith.constant 0 : index
    %c0_7 = arith.constant 0 : index
    %c0_8 = arith.constant 0 : index
    %5 = vector.load %arg0[%c2, %c0_6, %c0_7, %c0_8] : memref<8x9x9x4xbf16, #tpu.memory_space<vmem>>, vector<2x8x8x4xbf16>
    %6 = vector.shape_cast %5 : vector<2x8x8x4xbf16> to vector<128x4xbf16>
    %c0_9 = arith.constant 0 : index
    %c4 = arith.constant 4 : index
    %7 = vector.load %arg11[%c0_9, %c4] : memref<128x128xbf16, #tpu.memory_space<vmem>>, vector<128x4xbf16>
    tpu.vector_store %arg11[%c0_9, %c4], %6 {strides = array<i32>} : memref<128x128xbf16, #tpu.memory_space<vmem>>, vector<128x4xbf16>,
    %c0_10 = arith.constant 0 : index
    %c0_11 = arith.constant 0 : index
    %c1 = arith.constant 1 : index
    %c0_12 = arith.constant 0 : index
    %8 = vector.load %arg0[%c0_10, %c0_11, %c1, %c0_12] : memref<8x9x9x4xbf16, #tpu.memory_space<vmem>>, vector<2x8x8x4xbf16>
    %9 = vector.shape_cast %8 : vector<2x8x8x4xbf16> to vector<128x4xbf16>
    %c0_13 = arith.constant 0 : index
    %c8 = arith.constant 8 : index
    %10 = vector.load %arg11[%c0_13, %c8] : memref<128x128xbf16, #tpu.memory_space<vmem>>, vector<128x4xbf16>
    tpu.vector_store %arg11[%c0_13, %c8], %9 {strides = array<i32>} : memref<128x128xbf16, #tpu.memory_space<vmem>>, vector<128x4xbf16>,
    %c4_14 = arith.constant 4 : index
    %c0_15 = arith.constant 0 : index
    %c0_16 = arith.constant 0 : index
    %c0_17 = arith.constant 0 : index
    %11 = vector.load %arg0[%c4_14, %c0_15, %c0_16, %c0_17] : memref<8x9x9x4xbf16, #tpu.memory_space<vmem>>, vector<2x8x8x4xbf16>
    %12 = vector.shape_cast %11 : vector<2x8x8x4xbf16> to vector<128x4xbf16>
    %c0_18 = arith.constant 0 : index
    %c12 = arith.constant 12 : index
    %13 = vector.load %arg11[%c0_18, %c12] : memref<128x128xbf16, #tpu.memory_space<vmem>>, vector<128x4xbf16>
    tpu.vector_store %arg11[%c0_18, %c12], %12 {strides = array<i32>} : memref<128x128xbf16, #tpu.memory_space<vmem>>, vector<128x4xbf16>,
    %c6 = arith.constant 6 : index
    %c0_19 = arith.constant 0 : index
    %c0_20 = arith.constant 0 : index
    %c0_21 = arith.constant 0 : index
    %14 = vector.load %arg0[%c6, %c0_19, %c0_20, %c0_21] : memref<8x9x9x4xbf16, #tpu.memory_space<vmem>>, vector<2x8x8x4xbf16>
    %15 = vector.shape_cast %14 : vector<2x8x8x4xbf16> to vector<128x4xbf16>
    %c0_22 = arith.constant 0 : index
    %c16 = arith.constant 16 : index
    %16 = vector.load %arg11[%c0_22, %c16] : memref<128x128xbf16, #tpu.memory_space<vmem>>, vector<128x4xbf16>
    tpu.vector_store %arg11[%c0_22, %c16], %15 {strides = array<i32>} : memref<128x128xbf16, #tpu.memory_space<vmem>>, vector<128x4xbf16>,
    %c4_23 = arith.constant 4 : index
    %c0_24 = arith.constant 0 : index
    %c1_25 = arith.constant 1 : index
    %c0_26 = arith.constant 0 : index
    %17 = vector.load %arg0[%c4_23, %c0_24, %c1_25, %c0_26] : memref<8x9x9x4xbf16, #tpu.memory_space<vmem>>, vector<2x8x8x4xbf16>
    %18 = vector.shape_cast %17 : vector<2x8x8x4xbf16> to vector<128x4xbf16>
    %c0_27 = arith.constant 0 : index
    %c20 = arith.constant 20 : index
    %19 = vector.load %arg11[%c0_27, %c20] : memref<128x128xbf16, #tpu.memory_space<vmem>>, vector<128x4xbf16>
    tpu.vector_store %arg11[%c0_27, %c20], %18 {strides = array<i32>} : memref<128x128xbf16, #tpu.memory_space<vmem>>, vector<128x4xbf16>,
    %c0_28 = arith.constant 0 : index
    %c1_29 = arith.constant 1 : index
    %c0_30 = arith.constant 0 : index
    %c0_31 = arith.constant 0 : index
    %20 = vector.load %arg0[%c0_28, %c1_29, %c0_30, %c0_31] : memref<8x9x9x4xbf16, #tpu.memory_space<vmem>>, vector<2x8x8x4xbf16>
    %21 = vector.shape_cast %20 : vector<2x8x8x4xbf16> to vector<128x4xbf16>
    %c0_32 = arith.constant 0 : index
    %c24 = arith.constant 24 : index
    %22 = vector.load %arg11[%c0_32, %c24] : memref<128x128xbf16, #tpu.memory_space<vmem>>, vector<128x4xbf16>
    tpu.vector_store %arg11[%c0_32, %c24], %21 {strides = array<i32>} : memref<128x128xbf16, #tpu.memory_space<vmem>>, vector<128x4xbf16>,
    %c2_33 = arith.constant 2 : index
    %c1_34 = arith.constant 1 : index
    %c0_35 = arith.constant 0 : index
    %c0_36 = arith.constant 0 : index
    %23 = vector.load %arg0[%c2_33, %c1_34, %c0_35, %c0_36] : memref<8x9x9x4xbf16, #tpu.memory_space<vmem>>, vector<2x8x8x4xbf16>
    %24 = vector.shape_cast %23 : vector<2x8x8x4xbf16> to vector<128x4xbf16>
    %c0_37 = arith.constant 0 : index
    %c28 = arith.constant 28 : index
    %25 = vector.load %arg11[%c0_37, %c28] : memref<128x128xbf16, #tpu.memory_space<vmem>>, vector<128x4xbf16>
    tpu.vector_store %arg11[%c0_37, %c28], %24 {strides = array<i32>} : memref<128x128xbf16, #tpu.memory_space<vmem>>, vector<128x4xbf16>,
    %c0_38 = arith.constant 0 : index
    %c1_39 = arith.constant 1 : index
    %c1_40 = arith.constant 1 : index
    %c0_41 = arith.constant 0 : index
    %26 = vector.load %arg0[%c0_38, %c1_39, %c1_40, %c0_41] : memref<8x9x9x4xbf16, #tpu.memory_space<vmem>>, vector<2x8x8x4xbf16>
    %27 = vector.shape_cast %26 : vector<2x8x8x4xbf16> to vector<128x4xbf16>
    %c0_42 = arith.constant 0 : index
    %c32 = arith.constant 32 : index
    %28 = vector.load %arg11[%c0_42, %c32] : memref<128x128xbf16, #tpu.memory_space<vmem>>, vector<128x4xbf16>
    tpu.vector_store %arg11[%c0_42, %c32], %27 {strides = array<i32>} : memref<128x128xbf16, #tpu.memory_space<vmem>>, vector<128x4xbf16>,
    %c0_43 = arith.constant 0 : index
    %c0_44 = arith.constant 0 : index
    %29 = vector.load %arg11[%c0_43, %c0_44] : memref<128x128xbf16, #tpu.memory_space<vmem>>, vector<128x128xbf16>
    %c0_45 = arith.constant 0 : index
    %c0_46 = arith.constant 0 : index
    %30 = vector.load %arg1[%c0_45, %c0_46] : memref<128x8xbf16, #tpu.memory_space<vmem>>, vector<128x8xbf16>
    %cst_47 = arith.constant dense<0.000000e+00> : vector<128x8xf32>
    %31 = tpu.matmul %29, %30, %cst_47 {dimension_numbers = #tpu.dot_dimension_numbers<[1], [0], [0], [1], [0, 0, 1, 1], [], []>} : vector<128x128xbf16>, vector<128x8xbf16>, vector<128x8xf32> -> vector<128x8xf32>
    %c0_48 = arith.constant 0 : index
    %c0_49 = arith.constant 0 : index
    %32 = vector.load %arg7[%c0_48, %c0_49] : memref<128x8xbf16, #tpu.memory_space<vmem>>, vector<128x8xbf16>
    %cst_50 = arith.constant dense<0.000000e+00> : vector<128x8xf32>
    %33 = tpu.matmul %29, %32, %cst_50 {dimension_numbers = #tpu.dot_dimension_numbers<[1], [0], [0], [1], [0, 0, 1, 1], [], []>} : vector<128x128xbf16>, vector<128x8xbf16>, vector<128x8xf32> -> vector<128x8xf32>
    %c0_51 = arith.constant 0 : index
    %c0_52 = arith.constant 0 : index
    %34 = vector.load %arg8[%c0_51, %c0_52] : memref<1x8xf32, #tpu.memory_space<vmem>>, vector<1x8xf32>
    %c0_53 = arith.constant 0 : index
    %c0_54 = arith.constant 0 : index
    %35 = vector.load %arg9[%c0_53, %c0_54] : memref<1x8xf32, #tpu.memory_space<vmem>>, vector<1x8xf32>
    %cst_55 = arith.constant dense<0.000000e+00> : vector<8xf32>
    %36 = vector.multi_reduction <add>, %33, %cst_55 [0] : vector<128x8xf32> to vector<8xf32>
    %37 = vector.shape_cast %36 : vector<8xf32> to vector<1x8xf32>
    %cst_56 = arith.constant 7.812500e-03 : f32
    %38 = vector.broadcast %cst_56 : f32 to vector<1x8xf32>
    %39 = arith.mulf %37, %38 : vector<1x8xf32>
    %40 = vector.broadcast %39 : vector<1x8xf32> to vector<128x8xf32>
    %41 = arith.subf %33, %40 : vector<128x8xf32>
    %42 = arith.mulf %41, %41 : vector<128x8xf32>
    %cst_57 = arith.constant dense<0.000000e+00> : vector<8xf32>
    %43 = vector.multi_reduction <add>, %42, %cst_57 [0] : vector<128x8xf32> to vector<8xf32>
    %44 = vector.shape_cast %43 : vector<8xf32> to vector<1x8xf32>
    %cst_58 = arith.constant 7.812500e-03 : f32
    %45 = vector.broadcast %cst_58 : f32 to vector<1x8xf32>
    %46 = arith.mulf %44, %45 : vector<1x8xf32>
    %cst_59 = arith.constant 9.99999974E-6 : f32
    %47 = vector.broadcast %cst_59 : f32 to vector<1x8xf32>
    %48 = arith.addf %46, %47 : vector<1x8xf32>
    %49 = math.rsqrt %48 : vector<1x8xf32>
    %50 = arith.mulf %34, %49 : vector<1x8xf32>
    %51 = vector.broadcast %50 : vector<1x8xf32> to vector<128x8xf32>
    %52 = arith.mulf %41, %51 : vector<128x8xf32>
    %53 = vector.broadcast %35 : vector<1x8xf32> to vector<128x8xf32>
    %54 = arith.addf %52, %53 : vector<128x8xf32>
    %c0_60 = arith.constant 0 : index
    %c0_61 = arith.constant 0 : index
    %55 = vector.load %arg2[%c0_60, %c0_61] : memref<1x8xf32, #tpu.memory_space<vmem>>, vector<1x8xf32>
    %c0_62 = arith.constant 0 : index
    %c0_63 = arith.constant 0 : index
    %56 = vector.load %arg3[%c0_62, %c0_63] : memref<1x8xf32, #tpu.memory_space<vmem>>, vector<1x8xf32>
    %cst_64 = arith.constant dense<0.000000e+00> : vector<8xf32>
    %57 = vector.multi_reduction <add>, %31, %cst_64 [0] : vector<128x8xf32> to vector<8xf32>
    %58 = vector.shape_cast %57 : vector<8xf32> to vector<1x8xf32>
    %cst_65 = arith.constant 7.812500e-03 : f32
    %59 = vector.broadcast %cst_65 : f32 to vector<1x8xf32>
    %60 = arith.mulf %58, %59 : vector<1x8xf32>
    %61 = vector.broadcast %60 : vector<1x8xf32> to vector<128x8xf32>
    %62 = arith.subf %31, %61 : vector<128x8xf32>
    %63 = arith.mulf %62, %62 : vector<128x8xf32>
    %cst_66 = arith.constant dense<0.000000e+00> : vector<8xf32>
    %64 = vector.multi_reduction <add>, %63, %cst_66 [0] : vector<128x8xf32> to vector<8xf32>
    %65 = vector.shape_cast %64 : vector<8xf32> to vector<1x8xf32>
    %cst_67 = arith.constant 7.812500e-03 : f32
    %66 = vector.broadcast %cst_67 : f32 to vector<1x8xf32>
    %67 = arith.mulf %65, %66 : vector<1x8xf32>
    %cst_68 = arith.constant 9.99999974E-6 : f32
    %68 = vector.broadcast %cst_68 : f32 to vector<1x8xf32>
    %69 = arith.addf %67, %68 : vector<1x8xf32>
    %70 = math.rsqrt %69 : vector<1x8xf32>
    %71 = arith.mulf %55, %70 : vector<1x8xf32>
    %72 = vector.broadcast %71 : vector<1x8xf32> to vector<128x8xf32>
    %73 = arith.mulf %62, %72 : vector<128x8xf32>
    %74 = vector.broadcast %56 : vector<1x8xf32> to vector<128x8xf32>
    %75 = arith.addf %73, %74 : vector<128x8xf32>
    %cst_69 = arith.constant 0.000000e+00 : f32
    %76 = vector.broadcast %cst_69 : f32 to vector<128x8xf32>
    %77 = arith.maximumf %75, %76 : vector<128x8xf32>
    %cst_70 = arith.constant 0.000000e+00 : bf16
    %78 = vector.broadcast %cst_70 : bf16 to vector<2x1x16x8xbf16>
    %cst_71 = arith.constant 0.000000e+00 : bf16
    %79 = vector.broadcast %cst_71 : bf16 to vector<2x10x1x8xbf16>
    %c0_72 = arith.constant 0 : index
    %c0_73 = arith.constant 0 : index
    %c0_74 = arith.constant 0 : index
    %c0_75 = arith.constant 0 : index
    %80 = vector.load %arg13[%c0_72, %c0_73, %c0_74, %c0_75] : memref<2x10x16x8xbf16, #tpu.memory_space<vmem>>, vector<2x1x16x8xbf16>
    tpu.vector_store %arg13[%c0_72, %c0_73, %c0_74, %c0_75], %78 {strides = array<i32>} : memref<2x10x16x8xbf16, #tpu.memory_space<vmem>>, vector<2x1x16x8xbf16>,
    %c0_76 = arith.constant 0 : index
    %c9 = arith.constant 9 : index
    %c0_77 = arith.constant 0 : index
    %c0_78 = arith.constant 0 : index
    %81 = vector.load %arg13[%c0_76, %c9, %c0_77, %c0_78] : memref<2x10x16x8xbf16, #tpu.memory_space<vmem>>, vector<2x1x16x8xbf16>
    tpu.vector_store %arg13[%c0_76, %c9, %c0_77, %c0_78], %78 {strides = array<i32>} : memref<2x10x16x8xbf16, #tpu.memory_space<vmem>>, vector<2x1x16x8xbf16>,
    %c0_79 = arith.constant 0 : index
    %c0_80 = arith.constant 0 : index
    %c0_81 = arith.constant 0 : index
    %c0_82 = arith.constant 0 : index
    %82 = vector.load %arg13[%c0_79, %c0_80, %c0_81, %c0_82] : memref<2x10x16x8xbf16, #tpu.memory_space<vmem>>, vector<2x10x1x8xbf16>
    tpu.vector_store %arg13[%c0_79, %c0_80, %c0_81, %c0_82], %79 {strides = array<i32>} : memref<2x10x16x8xbf16, #tpu.memory_space<vmem>>, vector<2x10x1x8xbf16>,
    %c0_83 = arith.constant 0 : index
    %c0_84 = arith.constant 0 : index
    %c9_85 = arith.constant 9 : index
    %c0_86 = arith.constant 0 : index
    %83 = vector.load %arg13[%c0_83, %c0_84, %c9_85, %c0_86] : memref<2x10x16x8xbf16, #tpu.memory_space<vmem>>, vector<2x10x1x8xbf16>
    tpu.vector_store %arg13[%c0_83, %c0_84, %c9_85, %c0_86], %79 {strides = array<i32>} : memref<2x10x16x8xbf16, #tpu.memory_space<vmem>>, vector<2x10x1x8xbf16>,
    %84 = vector.shape_cast %77 : vector<128x8xf32> to vector<2x8x8x8xf32>
    %85 = arith.truncf %84 : vector<2x8x8x8xf32> to vector<2x8x8x8xbf16>
    %c0_87 = arith.constant 0 : index
    %c1_88 = arith.constant 1 : index
    %c1_89 = arith.constant 1 : index
    %c0_90 = arith.constant 0 : index
    %86 = vector.load %arg13[%c0_87, %c1_88, %c1_89, %c0_90] : memref<2x10x16x8xbf16, #tpu.memory_space<vmem>>, vector<2x8x8x8xbf16>
    tpu.vector_store %arg13[%c0_87, %c1_88, %c1_89, %c0_90], %85 {strides = array<i32>} : memref<2x10x16x8xbf16, #tpu.memory_space<vmem>>, vector<2x8x8x8xbf16>,
    %cst_91 = arith.constant 0.000000e+00 : bf16
    %87 = vector.broadcast %cst_91 : bf16 to vector<128x56xbf16>
    %c0_92 = arith.constant 0 : index
    %c72 = arith.constant 72 : index
    %88 = vector.load %arg12[%c0_92, %c72] : memref<128x128xbf16, #tpu.memory_space<vmem>>, vector<128x56xbf16>
    tpu.vector_store %arg12[%c0_92, %c72], %87 {strides = array<i32>} : memref<128x128xbf16, #tpu.memory_space<vmem>>, vector<128x56xbf16>,
    %c0_93 = arith.constant 0 : index
    %c0_94 = arith.constant 0 : index
    %c0_95 = arith.constant 0 : index
    %c0_96 = arith.constant 0 : index
    %89 = vector.load %arg13[%c0_93, %c0_94, %c0_95, %c0_96] : memref<2x10x16x8xbf16, #tpu.memory_space<vmem>>, vector<2x8x8x8xbf16>
    %90 = vector.shape_cast %89 : vector<2x8x8x8xbf16> to vector<128x8xbf16>
    %c0_97 = arith.constant 0 : index
    %c0_98 = arith.constant 0 : index
    %91 = vector.load %arg12[%c0_97, %c0_98] : memref<128x128xbf16, #tpu.memory_space<vmem>>, vector<128x8xbf16>
    tpu.vector_store %arg12[%c0_97, %c0_98], %90 {strides = array<i32>} : memref<128x128xbf16, #tpu.memory_space<vmem>>, vector<128x8xbf16>,
    %c0_99 = arith.constant 0 : index
    %c0_100 = arith.constant 0 : index
    %c1_101 = arith.constant 1 : index
    %c0_102 = arith.constant 0 : index
    %92 = vector.load %arg13[%c0_99, %c0_100, %c1_101, %c0_102] : memref<2x10x16x8xbf16, #tpu.memory_space<vmem>>, vector<2x8x8x8xbf16>
    %93 = vector.shape_cast %92 : vector<2x8x8x8xbf16> to vector<128x8xbf16>
    %c0_103 = arith.constant 0 : index
    %c8_104 = arith.constant 8 : index
    %94 = vector.load %arg12[%c0_103, %c8_104] : memref<128x128xbf16, #tpu.memory_space<vmem>>, vector<128x8xbf16>
    tpu.vector_store %arg12[%c0_103, %c8_104], %93 {strides = array<i32>} : memref<128x128xbf16, #tpu.memory_space<vmem>>, vector<128x8xbf16>,
    %c0_105 = arith.constant 0 : index
    %c0_106 = arith.constant 0 : index
    %c2_107 = arith.constant 2 : index
    %c0_108 = arith.constant 0 : index
    %95 = vector.load %arg13[%c0_105, %c0_106, %c2_107, %c0_108] : memref<2x10x16x8xbf16, #tpu.memory_space<vmem>>, vector<2x8x8x8xbf16>
    %96 = vector.shape_cast %95 : vector<2x8x8x8xbf16> to vector<128x8xbf16>
    %c0_109 = arith.constant 0 : index
    %c16_110 = arith.constant 16 : index
    %97 = vector.load %arg12[%c0_109, %c16_110] : memref<128x128xbf16, #tpu.memory_space<vmem>>, vector<128x8xbf16>
    tpu.vector_store %arg12[%c0_109, %c16_110], %96 {strides = array<i32>} : memref<128x128xbf16, #tpu.memory_space<vmem>>, vector<128x8xbf16>,
    %c0_111 = arith.constant 0 : index
    %c1_112 = arith.constant 1 : index
    %c0_113 = arith.constant 0 : index
    %c0_114 = arith.constant 0 : index
    %98 = vector.load %arg13[%c0_111, %c1_112, %c0_113, %c0_114] : memref<2x10x16x8xbf16, #tpu.memory_space<vmem>>, vector<2x8x8x8xbf16>
    %99 = vector.shape_cast %98 : vector<2x8x8x8xbf16> to vector<128x8xbf16>
    %c0_115 = arith.constant 0 : index
    %c24_116 = arith.constant 24 : index
    %100 = vector.load %arg12[%c0_115, %c24_116] : memref<128x128xbf16, #tpu.memory_space<vmem>>, vector<128x8xbf16>
    tpu.vector_store %arg12[%c0_115, %c24_116], %99 {strides = array<i32>} : memref<128x128xbf16, #tpu.memory_space<vmem>>, vector<128x8xbf16>,
    %c0_117 = arith.constant 0 : index
    %c1_118 = arith.constant 1 : index
    %c1_119 = arith.constant 1 : index
    %c0_120 = arith.constant 0 : index
    %101 = vector.load %arg13[%c0_117, %c1_118, %c1_119, %c0_120] : memref<2x10x16x8xbf16, #tpu.memory_space<vmem>>, vector<2x8x8x8xbf16>
    %102 = vector.shape_cast %101 : vector<2x8x8x8xbf16> to vector<128x8xbf16>
    %c0_121 = arith.constant 0 : index
    %c32_122 = arith.constant 32 : index
    %103 = vector.load %arg12[%c0_121, %c32_122] : memref<128x128xbf16, #tpu.memory_space<vmem>>, vector<128x8xbf16>
    tpu.vector_store %arg12[%c0_121, %c32_122], %102 {strides = array<i32>} : memref<128x128xbf16, #tpu.memory_space<vmem>>, vector<128x8xbf16>,
    %c0_123 = arith.constant 0 : index
    %c1_124 = arith.constant 1 : index
    %c2_125 = arith.constant 2 : index
    %c0_126 = arith.constant 0 : index
    %104 = vector.load %arg13[%c0_123, %c1_124, %c2_125, %c0_126] : memref<2x10x16x8xbf16, #tpu.memory_space<vmem>>, vector<2x8x8x8xbf16>
    %105 = vector.shape_cast %104 : vector<2x8x8x8xbf16> to vector<128x8xbf16>
    %c0_127 = arith.constant 0 : index
    %c40 = arith.constant 40 : index
    %106 = vector.load %arg12[%c0_127, %c40] : memref<128x128xbf16, #tpu.memory_space<vmem>>, vector<128x8xbf16>
    tpu.vector_store %arg12[%c0_127, %c40], %105 {strides = array<i32>} : memref<128x128xbf16, #tpu.memory_space<vmem>>, vector<128x8xbf16>,
    %c0_128 = arith.constant 0 : index
    %c2_129 = arith.constant 2 : index
    %c0_130 = arith.constant 0 : index
    %c0_131 = arith.constant 0 : index
    %107 = vector.load %arg13[%c0_128, %c2_129, %c0_130, %c0_131] : memref<2x10x16x8xbf16, #tpu.memory_space<vmem>>, vector<2x8x8x8xbf16>
    %108 = vector.shape_cast %107 : vector<2x8x8x8xbf16> to vector<128x8xbf16>
    %c0_132 = arith.constant 0 : index
    %c48 = arith.constant 48 : index
    %109 = vector.load %arg12[%c0_132, %c48] : memref<128x128xbf16, #tpu.memory_space<vmem>>, vector<128x8xbf16>
    tpu.vector_store %arg12[%c0_132, %c48], %108 {strides = array<i32>} : memref<128x128xbf16, #tpu.memory_space<vmem>>, vector<128x8xbf16>,
    %c0_133 = arith.constant 0 : index
    %c2_134 = arith.constant 2 : index
    %c1_135 = arith.constant 1 : index
    %c0_136 = arith.constant 0 : index
    %110 = vector.load %arg13[%c0_133, %c2_134, %c1_135, %c0_136] : memref<2x10x16x8xbf16, #tpu.memory_space<vmem>>, vector<2x8x8x8xbf16>
    %111 = vector.shape_cast %110 : vector<2x8x8x8xbf16> to vector<128x8xbf16>
    %c0_137 = arith.constant 0 : index
    %c56 = arith.constant 56 : index
    %112 = vector.load %arg12[%c0_137, %c56] : memref<128x128xbf16, #tpu.memory_space<vmem>>, vector<128x8xbf16>
    tpu.vector_store %arg12[%c0_137, %c56], %111 {strides = array<i32>} : memref<128x128xbf16, #tpu.memory_space<vmem>>, vector<128x8xbf16>,
    %c0_138 = arith.constant 0 : index
    %c2_139 = arith.constant 2 : index
    %c2_140 = arith.constant 2 : index
    %c0_141 = arith.constant 0 : index
    %113 = vector.load %arg13[%c0_138, %c2_139, %c2_140, %c0_141] : memref<2x10x16x8xbf16, #tpu.memory_space<vmem>>, vector<2x8x8x8xbf16>
    %114 = vector.shape_cast %113 : vector<2x8x8x8xbf16> to vector<128x8xbf16>
    %c0_142 = arith.constant 0 : index
    %c64 = arith.constant 64 : index
    %115 = vector.load %arg12[%c0_142, %c64] : memref<128x128xbf16, #tpu.memory_space<vmem>>, vector<128x8xbf16>
    tpu.vector_store %arg12[%c0_142, %c64], %114 {strides = array<i32>} : memref<128x128xbf16, #tpu.memory_space<vmem>>, vector<128x8xbf16>,
    %c0_143 = arith.constant 0 : index
    %c0_144 = arith.constant 0 : index
    %116 = vector.load %arg12[%c0_143, %c0_144] : memref<128x128xbf16, #tpu.memory_space<vmem>>, vector<128x128xbf16>
    %c0_145 = arith.constant 0 : index
    %c0_146 = arith.constant 0 : index
    %117 = vector.load %arg4[%c0_145, %c0_146] : memref<128x8xbf16, #tpu.memory_space<vmem>>, vector<128x8xbf16>
    %cst_147 = arith.constant dense<0.000000e+00> : vector<128x8xf32>
    %118 = tpu.matmul %116, %117, %cst_147 {dimension_numbers = #tpu.dot_dimension_numbers<[1], [0], [0], [1], [0, 0, 1, 1], [], []>} : vector<128x128xbf16>, vector<128x8xbf16>, vector<128x8xf32> -> vector<128x8xf32>
    %c0_148 = arith.constant 0 : index
    %c0_149 = arith.constant 0 : index
    %119 = vector.load %arg5[%c0_148, %c0_149] : memref<1x8xf32, #tpu.memory_space<vmem>>, vector<1x8xf32>
    %c0_150 = arith.constant 0 : index
    %c0_151 = arith.constant 0 : index
    %120 = vector.load %arg6[%c0_150, %c0_151] : memref<1x8xf32, #tpu.memory_space<vmem>>, vector<1x8xf32>
    %cst_152 = arith.constant dense<0.000000e+00> : vector<8xf32>
    %121 = vector.multi_reduction <add>, %118, %cst_152 [0] : vector<128x8xf32> to vector<8xf32>
    %122 = vector.shape_cast %121 : vector<8xf32> to vector<1x8xf32>
    %cst_153 = arith.constant 7.812500e-03 : f32
    %123 = vector.broadcast %cst_153 : f32 to vector<1x8xf32>
    %124 = arith.mulf %122, %123 : vector<1x8xf32>
    %125 = vector.broadcast %124 : vector<1x8xf32> to vector<128x8xf32>
    %126 = arith.subf %118, %125 : vector<128x8xf32>
    %127 = arith.mulf %126, %126 : vector<128x8xf32>
    %cst_154 = arith.constant dense<0.000000e+00> : vector<8xf32>
    %128 = vector.multi_reduction <add>, %127, %cst_154 [0] : vector<128x8xf32> to vector<8xf32>
    %129 = vector.shape_cast %128 : vector<8xf32> to vector<1x8xf32>
    %cst_155 = arith.constant 7.812500e-03 : f32
    %130 = vector.broadcast %cst_155 : f32 to vector<1x8xf32>
    %131 = arith.mulf %129, %130 : vector<1x8xf32>
    %cst_156 = arith.constant 9.99999974E-6 : f32
    %132 = vector.broadcast %cst_156 : f32 to vector<1x8xf32>
    %133 = arith.addf %131, %132 : vector<1x8xf32>
    %134 = math.rsqrt %133 : vector<1x8xf32>
    %135 = arith.mulf %119, %134 : vector<1x8xf32>
    %136 = vector.broadcast %135 : vector<1x8xf32> to vector<128x8xf32>
    %137 = arith.mulf %126, %136 : vector<128x8xf32>
    %138 = vector.broadcast %120 : vector<1x8xf32> to vector<128x8xf32>
    %139 = arith.addf %137, %138 : vector<128x8xf32>
    %140 = arith.addf %139, %54 : vector<128x8xf32>
    %cst_157 = arith.constant 0.000000e+00 : f32
    %141 = vector.broadcast %cst_157 : f32 to vector<128x8xf32>
    %142 = arith.maximumf %140, %141 : vector<128x8xf32>
    %c0_158 = arith.constant 0 : index
    %c0_159 = arith.constant 0 : index
    %143 = vector.load %arg10[%c0_158, %c0_159] : memref<128x8xf32, #tpu.memory_space<vmem>>, vector<128x8xf32>
    tpu.vector_store %arg10[%c0_158, %c0_159], %142 {strides = array<i32>} : memref<128x8xf32, #tpu.memory_space<vmem>>, vector<128x8xf32>,
    return
  }
}

</mosaic_0001>

<bundles_post_ra>
// kernel: basic_block_forward.1
= control target key start
LH: loop header
LB: loop body
LE: loop exit
PB: predicated region body
PF: predicated region fallthrough
CT: control target
= control target key end

     0   :  { %s5195_s17 = smov 4   ;;  %vm216_vm0 = vsmask.f32 3328  ;;  %vm217_vm1 = vsmask.f32 7440  ;;  %s5196_s30 = smov 12   ;;  %s8022_s0 = inlined_call_operand.vmem [shape: bf16[8,9,9,4], index: 0, kind: input, shape index: {}]   ;;  %s8023_s1 = inlined_call_operand.vmem [shape: bf16[128,8], index: 1, kind: input, shape index: {}]   ;;  %s8024_s7 = inlined_call_operand.vmem [shape: bf16[128,8], index: 7, kind: input, shape index: {}]   ;;  %s8025_s3 = inlined_call_operand.vmem [shape: f32[1,8], index: 3, kind: input, shape index: {}]   ;;  %s8026_s9 = inlined_call_operand.vmem [shape: f32[1,8], index: 9, kind: input, shape index: {}]   ;;  %s8027_s2 = inlined_call_operand.vmem [shape: f32[1,8], index: 2, kind: input, shape index: {}]   ;;  %s8028_s8 = inlined_call_operand.vmem [shape: f32[1,8], index: 8, kind: input, shape index: {}]   ;;  %s8029_s4 = inlined_call_operand.vmem [shape: bf16[128,8], index: 4, kind: input, shape index: {}]   ;;  %s8030_s6 = inlined_call_operand.vmem [shape: f32[1,8], index: 6, kind: input, shape index: {}]   ;;  %s8031_s5 = inlined_call_operand.vmem [shape: f32[1,8], index: 5, kind: input, shape index: {}]   ;;  %s8032_s10 = inlined_call_operand.vmem [shape: f32[128,8], index: 10, kind: output, shape index: {}]  }
   0x1   :  { %v4757_v0 = vld [vmem:[%s8022_s0 + $0x90] sm:$0xf]  ;;  %v184_v1 = vld [vmem:[%s8022_s0] sm:$0xf]  ;;  %v185_v2 = vld [vmem:[%s8022_s0 + $0x4] sm:$0x1] }
   0x2   :  { %119 = vrot.lane.b32.xlu0 %v4757_v0, %s5195_s17  ;;  %v220_v3 = vshrl.u32 %v184_v1, 16  ;;  %v223_v4 = vshll.u32 %v184_v1, 16  ;;  %v229_v5 = vshll.u32 %v185_v2, 16  ;;  %v186_v6 = vld [vmem:[%s8022_s0 + $0x8] sm:$0xf]  ;;  %vm5286_vm2 = vmor %vm216_vm0, %vm217_vm1  ;;  %s5197_s11 = smov 8  }
   0x3   :  { %v234_v9 = vshrl.u32 %v186_v6, 16  ;;  %v237_v10 = vshll.u32 %v186_v6, 16  ;;  %v4807_v11 = vld [vmem:[%s8022_s0 + $0x128] sm:$0xf]  ;;  %v187_v12 = vld [vmem:[%s8022_s0 + $0xc] sm:$0x1] }
   0x4   :  { %v222_v7 = vrot.slane %v220_v3, 4  ;;  %v225_v8 = vrot.slane %v223_v4, 5  ;;  %v4758_v13 = vld [vmem:[%s8022_s0 + $0x98] sm:$0xf]  ;;  %v231_v15 = vrot.slane %v229_v5, 5  ;;  %v751_v19 = vshrl.u32 %v4807_v11, 16 }
   0x5   :  { %v236_v16 = vrot.slane %v234_v9, 4  ;;  %v239_v17 = vrot.slane %v237_v10, 5  ;;  %v754_v20 = vshll.u32 %v4807_v11, 16  ;;  %v4773_v21 = vld [vmem:[%s8022_s0 + $0x120] sm:$0xf]  ;;  %v243_v24 = vshll.u32 %v187_v12, 16 }
   0x6   :  { %v226_v14 = vor.u32 %v225_v8, %v222_v7  ;;  %541 = vrot.lane.b32.xlu2 %v4773_v21, %s5196_s30  ;;  %v4808_v26 = vld [vmem:[%s8022_s0 + $0x12c] sm:$0x1]  ;;  %v753_v27 = vrot.slane %v751_v19, 4  ;;  %v4805_v29 = vld [vmem:[%s8022_s0 + $0x120] sm:$0xf]  ;;  %s5198_s23 = smov 16  }
   0x7   :  { %v240_v23 = vor.u32 %v239_v17, %v236_v16  ;;  %v756_v28 = vrot.slane %v754_v20, 5  ;;  %v245_v31 = vrot.slane %v243_v24, 5  ;;  %v4806_v32 = vld [vmem:[%s8022_s0 + $0x124] sm:$0x1]  ;;  %v737_v33 = vshrl.u32 %v4805_v29, 16  ;;  %s5199_s28 = smov 20  }
   0x8   :  { %v227_v22 = vrot.slane %v226_v14, 4  ;;  %v4774_v34 = vld [vmem:[%s8022_s0 + $0x128] sm:$0xf]  ;;  %v740_v35 = vshll.u32 %v4805_v29, 16  ;;  %v746_v36 = vshll.u32 %v4806_v32, 16  ;;  %v760_v40 = vshll.u32 %v4808_v26, 16 }
   0x9   :  { %v241_v30 = vrot.slane %v240_v23, 4  ;;  %v739_v37 = vrot.slane %v737_v33, 4  ;;  %v4789_v38 = vld [vmem:[%s8022_s0 + $0x1b0] sm:$0xf]  ;;  %v757_v39 = vor.u32 %v756_v28, %v753_v27  ;;  %v4790_v53 = vld [vmem:[%s8022_s0 + $0x1b8] sm:$0xf] }
   0xa   :  { %121 = vrot.lane.b32.xlu0 %v4758_v13, %s5195_s17  ;;  %v232_v25 = vsel %vm5286_vm2, %v227_v22, %v231_v15  ;;  %v742_v41 = vrot.slane %v740_v35, 5  ;;  %v748_v44 = vrot.slane %v746_v36, 5  ;;  %v762_v46 = vrot.slane %v760_v40, 5  ;;  %v4871_v48 = vld [vmem:[%s8022_s0 + $0x10] sm:$0xf]  ;;  %s5200_s27 = smov 24  }
   0xb   :  { %443 = vrot.lane.b32.xlu1 %v232_v25, %s5197_s11  ;;  %v246_v42 = vsel %vm5286_vm2, %v241_v30, %v245_v31  ;;  %v758_v45 = vrot.slane %v757_v39, 4  ;;  %v1268_v51 = vshrl.u32 %v4871_v48, 16  ;;  %v1271_v52 = vshll.u32 %v4871_v48, 16  ;;  %v4869_v54 = vld [vmem:[%s8022_s0 + $0x8] sm:$0xf]  ;;  %s5201_s29 = smov 28  }
   0xc   :  { %v743_v43 = vor.u32 %v742_v41, %v739_v37  ;;  %v1254_v55 = vshrl.u32 %v4869_v54, 16  ;;  %v1257_v56 = vshll.u32 %v4869_v54, 16  ;;  %v4870_v59 = vld [vmem:[%s8022_s0 + $0xc] sm:$0x1]  ;;  %v4872_v62 = vld [vmem:[%s8022_s0 + $0x14] sm:$0x1] }
   0xd   :  { %v763_v50 = vsel %vm5286_vm2, %v758_v45, %v762_v46  ;;  %v1270_v57 = vrot.slane %v1268_v51, 4  ;;  %v1273_v58 = vrot.slane %v1271_v52, 5  ;;  %v188_v63 = vld [vmem:[%s8022_s0 + $0x10] sm:$0xf]  ;;  %v1263_v2 = vshll.u32 %v4870_v59, 16  ;;  %s5202_s19 = smov 32  }
   0xe   :  { %543 = vrot.lane.b32.xlu2 %v4774_v34, %s5196_s30  ;;  %v744_v47 = vrot.slane %v743_v43, 4  ;;  %v1256_v60 = vrot.slane %v1254_v55, 4  ;;  %v1259_v61 = vrot.slane %v1257_v56, 5  ;;  %v4838_v0 = vld [vmem:[%s8022_s0 + $0x10] sm:$0xf]  ;;  %v1277_v5 = vshll.u32 %v4872_v62, 16 }
   0xf   :  { %v4853_v3 = vld [vmem:[%s8022_s0 + $0x98] sm:$0xf]  ;;  %v1274_v4 = vor.u32 %v1273_v58, %v1270_v57  ;;  %v248_v6 = vshrl.u32 %v188_v63, 16  ;;  %v251_v7 = vshll.u32 %v188_v63, 16  ;;  %v4837_v8 = vld [vmem:[%s8022_s0 + $0x8] sm:$0xf] }
  0x10   :  { %v749_v49 = vsel %vm5286_vm2, %v744_v47, %v748_v44  ;;  %v1260_v1 = vor.u32 %v1259_v61, %v1256_v60  ;;  %v1265_v10 = vrot.slane %v1263_v2, 5  ;;  %v1279_v12 = vrot.slane %v1277_v5, 5  ;;  %v189_v15 = vld [vmem:[%s8022_s0 + $0x14] sm:$0x1]  ;;  %v190_v16 = vld [vmem:[%s8022_s0 + $0x18] sm:$0xf] }
  0x11   :  { %v1275_v11 = vrot.slane %v1274_v4, 4  ;;  %v250_v13 = vrot.slane %v248_v6, 4  ;;  %v253_v14 = vrot.slane %v251_v7, 5  ;;  %v257_v21 = vshll.u32 %v189_v15, 16  ;;  %v4854_v22 = vld [vmem:[%s8022_s0 + $0xa0] sm:$0xf] }
  0x12   :  { %639 = vrot.lane.b32.xlu0 %v4789_v38, %s5198_s23  ;;  %v1261_v9 = vrot.slane %v1260_v1, 4  ;;  %v262_v23 = vshrl.u32 %v190_v16, 16  ;;  %v265_v24 = vshll.u32 %v190_v16, 16  ;;  %v4809_v29 = vld [vmem:[%s8022_s0 + $0x130] sm:$0xf]  ;;  %vm36_vm3 = vcmask 1043744  }
  0x13   :  { %445 = vrot.lane.b32.xlu1 %v246_v42, %s5197_s11  ;;  %v1280_v19 = vsel %vm5286_vm2, %v1275_v11, %v1279_v12  ;;  %v254_v20 = vor.u32 %v253_v14, %v250_v13  ;;  %v259_v26 = vrot.slane %v257_v21, 5  ;;  %v191_v30 = vld [vmem:[%s8022_s0 + $0x1c] sm:$0x1]  ;;  %v4760_v31 = vld [vmem:[%s8022_s0 + $0xa8] sm:$0xf]  ;;  %v765_v33 = vshrl.u32 %v4809_v29, 16 }
  0x14   :  { %v1266_v17 = vsel %vm5286_vm2, %v1261_v9, %v1265_v10  ;;  %v264_v27 = vrot.slane %v262_v23, 4  ;;  %v267_v28 = vrot.slane %v265_v24, 5  ;;  %v768_v34 = vshll.u32 %v4809_v29, 16  ;;  %v4759_v35 = vld [vmem:[%s8022_s0 + $0xa0] sm:$0xf]  ;;  %s5205_s20 = smov 40  }
  0x15   :  { %v255_v25 = vrot.slane %v254_v20, 4  ;;  %v271_v37 = vshll.u32 %v191_v30, 16  ;;  %v767_v38 = vrot.slane %v765_v33, 4  ;;  %v4810_v42 = vld [vmem:[%s8022_s0 + $0x134] sm:$0x1]  ;;  %vm69_vm4 = vcmask 27648  }
  0x16   :  { %960 = vrot.lane.b32.xlu2 %v749_v49, %s5199_s28  ;;  %v268_v36 = vor.u32 %v267_v28, %v264_v27  ;;  %v770_v39 = vrot.slane %v768_v34, 5  ;;  %v4811_v43 = vld [vmem:[%s8022_s0 + $0x138] sm:$0xf]  ;;  %v4775_v44 = vld [vmem:[%s8022_s0 + $0x130] sm:$0xf]  ;;  %v774_v47 = vshll.u32 %v4810_v42, 16 }
  0x17   :  { %v260_v32 = vsel %vm5286_vm2, %v255_v25, %v259_v26  ;;  %v273_v41 = vrot.slane %v271_v37, 5  ;;  %v4776_v45 = vld [vmem:[%s8022_s0 + $0x138] sm:$0xf]  ;;  %v779_v49 = vshrl.u32 %v4811_v43, 16  ;;  %v4812_v56 = vld [vmem:[%s8022_s0 + $0x13c] sm:$0x1] }
  0x18   :  { %v269_v40 = vrot.slane %v268_v36, 4  ;;  %v771_v46 = vor.u32 %v770_v39, %v767_v38  ;;  %v776_v52 = vrot.slane %v774_v47, 5  ;;  %v4873_v55 = vld [vmem:[%s8022_s0 + $0x18] sm:$0xf]  ;;  %v4792_v57 = vld [vmem:[%s8022_s0 + $0x1c8] sm:$0xf] }
  0x19   :  { %v1282_v59 = vshrl.u32 %v4873_v55, 16  ;;  %v1285_v60 = vshll.u32 %v4873_v55, 16  ;;  %v4791_v61 = vld [vmem:[%s8022_s0 + $0x1c0] sm:$0xf]  ;;  %v788_v63 = vshll.u32 %v4812_v56, 16  ;;  %v8033_v36 = vmov 0  }
  0x1a   :  { %962 = vrot.lane.b32.xlu0 %v763_v50, %s5199_s28  ;;  %v274_v48 = vsel %vm5286_vm2, %v269_v40, %v273_v41  ;;  %v782_v50 = vshll.u32 %v4811_v43, 16  ;;  %v772_v51 = vrot.slane %v771_v46, 4  ;;  %v4875_v2 = vld [vmem:[%s8022_s0 + $0x20] sm:$0xf]  ;;  %v4874_v5 = vld [vmem:[%s8022_s0 + $0x1c] sm:$0x1] }
  0x1b   :  { %641 = vrot.lane.b32.xlu1 %v4790_v53, %s5198_s23  ;;  %v781_v53 = vrot.slane %v779_v49, 4  ;;  %v1287_v1 = vrot.slane %v1285_v60, 5  ;;  %v790_v4 = vrot.slane %v788_v63, 5  ;;  %v4839_v6 = vld [vmem:[%s8022_s0 + $0x18] sm:$0xf]  ;;  %v1296_v7 = vshrl.u32 %v4875_v2, 16 }
  0x1c   :  { %v784_v54 = vrot.slane %v782_v50, 5  ;;  %v777_v58 = vsel %vm5286_vm2, %v772_v51, %v776_v52  ;;  %v4840_v9 = vld [vmem:[%s8022_s0 + $0x20] sm:$0xf]  ;;  %v1291_v11 = vshll.u32 %v4874_v5, 16  ;;  %v4856_v20 = vld [vmem:[%s8022_s0 + $0xb0] sm:$0xf] }
  0x1d   :  { %v1298_v13 = vrot.slane %v1296_v7, 4  ;;  %v4855_v26 = vld [vmem:[%s8022_s0 + $0xa8] sm:$0xf]  ;;  %v193_v33 = vld [vmem:[%s8022_s0 + $0x24] sm:$0x1]  ;;  %vm167_vm5 = vcmask 60448  }
  0x1e   :  { %1060 = vrot.lane.b32.xlu2 %v4838_v0, %s5200_s27  ;;  %v785_v62 = vor.u32 %v784_v54, %v781_v53  ;;  %v1284_v0 = vrot.slane %v1282_v59, 4  ;;  %v1293_v16 = vrot.slane %v1291_v11, 5  ;;  %v194_v27 = vld [vmem:[%s8022_s0 + $0x28] sm:$0xf]  ;;  %37 = vst.msk [vmem:[#allocation2] sm:$0xf] %vm36_vm3, %v8033_v36 }
  0x1f   :  { %v290_v28 = vshrl.u32 %v194_v27, 16  ;;  %v293_v29 = vshll.u32 %v194_v27, 16  ;;  %v53_v37 = vld [vmem:[%s8022_s0] sm:$0xf]  ;;  %v195_v38 = vld [vmem:[%s8022_s0 + $0x2c] sm:$0x1] }
  0x20   :  { %v1288_v10 = vor.u32 %v1287_v1, %v1284_v0  ;;  %70 = vst.msk [vmem:[#allocation2] sm:$0xf] %vm69_vm4, %v53_v37  ;;  %v299_v41 = vshll.u32 %v195_v38, 16  ;;  %v4762_v42 = vld [vmem:[%s8022_s0 + $0xb8] sm:$0xf]  ;;  %v285_v46 = vshll.u32 %v193_v33, 16 }
  0x21   :  { %v292_v39 = vrot.slane %v290_v28, 4  ;;  %v295_v40 = vrot.slane %v293_v29, 5  ;;  %38 = vst.msk [vmem:[#allocation2 + $0x4] sm:$0xf] %vm36_vm3, %v8033_v36  ;;  %v4813_v51 = vld [vmem:[%s8022_s0 + $0x140] sm:$0xf] }
  0x22   :  { %1156 = vrot.lane.b32.xlu0 %v4853_v3, %s5201_s29  ;;  %v786_v3 = vrot.slane %v785_v62, 4  ;;  %v1289_v15 = vrot.slane %v1288_v10, 4  ;;  %39 = vst.msk [vmem:[#allocation2 + $0x8] sm:$0xf] %vm36_vm3, %v8033_v36  ;;  %v287_v50 = vrot.slane %v285_v46, 5  ;;  %v793_v54 = vshrl.u32 %v4813_v51, 16 }
  0x23   :  { %1058 = vrot.lane.b32.xlu1 %v4837_v8, %s5200_s27  ;;  %v1299_v8 = vshll.u32 %v4875_v2, 16  ;;  %v296_v43 = vor.u32 %v295_v40, %v292_v39  ;;  %40 = vst.msk [vmem:[#allocation2 + $0xc] sm:$0xf] %vm36_vm3, %v8033_v36  ;;  %v4777_v53 = vld [vmem:[%s8022_s0 + $0x140] sm:$0xf]  ;;  %v796_v56 = vshll.u32 %v4813_v51, 16 }
  0x24   :  { %v791_v12 = vsel %vm5286_vm2, %v786_v3, %v790_v4  ;;  %v1294_v24 = vsel %vm5286_vm2, %v1289_v15, %v1293_v16  ;;  %41 = vst.msk [vmem:[#allocation2 + $0x10] sm:$0xf] %vm36_vm3, %v8033_v36  ;;  %v4814_v62 = vld [vmem:[%s8022_s0 + $0x144] sm:$0x1]  ;;  %v795_v63 = vrot.slane %v793_v54, 4  ;;  %v5586_v27 = vld [vmem:[%s8024_s7 + $0x28] sm:$0xff] }
  0x25   :  { %v1301_v14 = vrot.slane %v1299_v8, 5  ;;  %v297_v47 = vrot.slane %v296_v43, 4  ;;  %42 = vst.msk [vmem:[#allocation2 + $0x14] sm:$0xf] %vm36_vm3, %v8033_v36  ;;  %v798_v1 = vrot.slane %v796_v56, 5  ;;  %v5124_v8 = vld [vmem:[%s8023_s1 + $0x38] sm:$0xff] }
  0x26   :  { %1477 = vrot.lane.b32.xlu2 %v1266_v17, %s5202_s19  ;;  %v4876_v17 = vld [vmem:[%s8022_s0 + $0x24] sm:$0x1]  ;;  %43 = vst.msk [vmem:[#allocation2 + $0x18] sm:$0xf] %vm36_vm3, %v8033_v36  ;;  %v4816_v2 = vld [vmem:[%s8022_s0 + $0x14c] sm:$0x1]  ;;  %1670 = vmatpush.bf16.msra.mxu0 %v5124_v8 }
  0x27   :  { %v1302_v21 = vor.u32 %v1301_v14, %v1298_v13  ;;  %44 = vst.msk [vmem:[#allocation2 + $0x1c] sm:$0xf] %vm36_vm3, %v8033_v36  ;;  %v4793_v4 = vld [vmem:[%s8022_s0 + $0x1d0] sm:$0xf]  ;;  %v816_v5 = vshll.u32 %v4816_v2, 16  ;;  %v799_v11 = vor.u32 %v798_v1, %v795_v63  ;;  %5149 = vmatpush.bf16.msra.mxu3 %v5124_v8  ;;  %v5605_v37 = vld [vmem:[%s8024_s7 + $0x20] sm:$0xff] }
  0x28   :  { %45 = vst.msk [vmem:[#allocation2 + $0x20] sm:$0xf] %vm36_vm3, %v8033_v36  ;;  %v4794_v7 = vld [vmem:[%s8022_s0 + $0x1d8] sm:$0xf]  ;;  %v4778_v10 = vld [vmem:[%s8022_s0 + $0x148] sm:$0xf] }
  0x29   :  { %v1303_v30 = vrot.slane %v1302_v21, 4  ;;  %46 = vst.msk [vmem:[#allocation2 + $0x24] sm:$0xf] %vm36_vm3, %v8033_v36  ;;  %v818_v14 = vrot.slane %v816_v5, 5  ;;  %v4877_v16 = vld [vmem:[%s8022_s0 + $0x28] sm:$0xf] }
  0x2a   :  { %1479 = vrot.lane.b32.xlu0 %v1280_v19, %s5202_s19  ;;  %v192_v19 = vld [vmem:[%s8022_s0 + $0x20] sm:$0xf]  ;;  %47 = vst.msk [vmem:[#allocation2 + $0x28] sm:$0xf] %vm36_vm3, %v8033_v36  ;;  %v4879_v29 = vld [vmem:[%s8022_s0 + $0x30] sm:$0xf] }
  0x2b   :  { %1158 = vrot.lane.b32.xlu1 %v4854_v22, %s5201_s29  ;;  %v1305_v22 = vshll.u32 %v4876_v17, 16  ;;  %v276_v23 = vshrl.u32 %v192_v19, 16  ;;  %v279_v25 = vshll.u32 %v192_v19, 16  ;;  %48 = vst.msk [vmem:[#allocation2 + $0x2c] sm:$0xf] %vm36_vm3, %v8033_v36  ;;  %v5123_v17 = vld [vmem:[%s8023_s1 + $0x30] sm:$0xff] }
  0x2c   :  { %49 = vst.msk [vmem:[#allocation2 + $0x30] sm:$0xf] %vm36_vm3, %v8033_v36  ;;  %v5572_v19 = vld [vmem:[%s8024_s7 + $0x30] sm:$0xff]  ;;  %1671 = vmatpush.bf16.msra.mxu0 %v5123_v17  ;;  %5150 = vmatpush.bf16.msra.mxu3 %v5123_v17  ;;  %vm491_vm6 = vcmask 93248   ;;  %vm589_vm7 = vcmask 126048   ;;  %vm687_vm8 = vcmask 158848  }
  0x2d   :  { %v281_v34 = vrot.slane %v279_v25, 5  ;;  %50 = vst.msk [vmem:[#allocation2 + $0x34] sm:$0xf] %vm36_vm3, %v8033_v36  ;;  %v4841_v25 = vld [vmem:[%s8022_s0 + $0x28] sm:$0xf]  ;;  %v5119_v1 = vld [vmem:[%s8023_s1 + $0x10] sm:$0xff] }
  0x2e   :  { %125 = vrot.lane.b32.xlu2 %v4760_v31, %s5195_s17  ;;  %v1307_v31 = vrot.slane %v1305_v22, 5  ;;  %51 = vst.msk [vmem:[#allocation2 + $0x38] sm:$0xf] %vm36_vm3, %v8033_v36  ;;  %v4880_v43 = vld [vmem:[%s8022_s0 + $0x34] sm:$0x1]  ;;  %vm1008_vm9 = vcmask 191648  }
  0x2f   :  { %52 = vst.msk [vmem:[#allocation2 + $0x3c] sm:$0xf] %vm36_vm3, %v8033_v36  ;;  %v1333_v46 = vshll.u32 %v4880_v43, 16  ;;  %v5650_v2 = vld [vmem:[%s8024_s7 + $0x10] sm:$0xff]  ;;  %vm1106_vm10 = vcmask 224448   ;;  %vm1204_vm11 = vcmask 257248  }
  0x30   :  { %v197_v8 = vld [vmem:[%s8022_s0 + $0x34] sm:$0x1]  ;;  %vm1525_vm12 = vcmask 290048   ;;  %vm1834_vm13 = vcmask 64512   ;;  %vm2169_vm14 = vcmask 60416   ;;  %vm2179_vm15 = vcmask 57344  }
  0x31   :  { %2170 = vst.msk [vmem:[#allocation4] sm:$0xf] %vm2169_vm14, %v8033_v36  ;;  %vm2180_vm0 = vsmask.f32 256  ;;  %vm2242_vm3 = vsmask.f32 7938 }
  0x32   :  { %447 = vrot.lane.b32.xlu0 %v260_v32, %s5197_s11  ;;  %v278_v32 = vrot.slane %v276_v23, 4  ;;  %v1310_v23 = vshrl.u32 %v4877_v16, 16  ;;  %2171 = vst.msk [vmem:[#allocation4 + $0x4] sm:$0xf] %vm2169_vm14, %v8033_v36  ;;  %vm6708_vm1 = vmand %vm2179_vm15, %vm2180_vm0  ;;  %s5206_s21 = smov 64   ;;  %s5207_s22 = smov 56  }
  0x33   :  { %123 = vrot.lane.b32.xlu1 %v4759_v35, %s5195_s17  ;;  %v4761_v35 = vld [vmem:[%s8022_s0 + $0xb0] sm:$0xf]  ;;  %2172 = vst.msk [vmem:[#allocation4 + $0x50] sm:$0xf] %vm2169_vm14, %v8033_v36 }
  0x34   :  { %2173 = vst.msk [vmem:[#allocation4 + $0x54] sm:$0xf] %vm2169_vm14, %v8033_v36 }
  0x35   :  { %2175 = vst.msk [vmem:[#allocation4 + $0x48] sm:$0xf] %vm2169_vm14, %v8033_v36 }
  0x36   :  { %545 = vrot.lane.b32.xlu2 %v4775_v44, %s5196_s30  ;;  %v1308_v44 = vsel %vm5286_vm2, %v1303_v30, %v1307_v31  ;;  %v1324_v30 = vshrl.u32 %v4879_v29, 16  ;;  %v1327_v31 = vshll.u32 %v4879_v29, 16  ;;  %v5117_v29 = vld [vmem:[%s8023_s1] sm:$0xff]  ;;  %2176 = vst.msk [vmem:[#allocation4 + $0x4c] sm:$0xf] %vm2169_vm14, %v8033_v36 }
  0x37   :  { %2177 = vst.msk [vmem:[#allocation4 + $0x98] sm:$0xf] %vm2169_vm14, %v8033_v36 }
  0x38   :  { %v1326_v38 = vrot.slane %v1324_v30, 4  ;;  %v1329_v39 = vrot.slane %v1327_v31, 5  ;;  %v5693_v30 = vld [vmem:[%s8024_s7] sm:$0xff]  ;;  %2178 = vst.msk [vmem:[#allocation4 + $0x9c] sm:$0xf] %vm2169_vm14, %v8033_v36 }
  0x3a   :  { %547 = vrot.lane.b32.xlu0 %v4776_v45, %s5196_s30  ;;  %v282_v45 = vor.u32 %v281_v34, %v278_v32  ;;  %v1312_v32 = vrot.slane %v1310_v23, 4 }
  0x3b   :  { %449 = vrot.lane.b32.xlu1 %v274_v48, %s5197_s11  ;;  %v301_v48 = vrot.slane %v299_v41, 5  ;;  %v4878_v41 = vld [vmem:[%s8022_s0 + $0x2c] sm:$0x1] }
  0x3c   :  { %v283_v49 = vrot.slane %v282_v45, 4  ;;  %v1330_v45 = vor.u32 %v1329_v39, %v1326_v38  ;;  %v1319_v54 = vshll.u32 %v4878_v41, 16  ;;  %v55_v38 = vld [vmem:[%s8022_s0 + $0x10] sm:$0xf] }
  0x3d   :  { %v302_v52 = vsel %vm5286_vm2, %v297_v47, %v301_v48  ;;  %v5120_v48 = vld [vmem:[%s8023_s1 + $0x18] sm:$0xff]  ;;  %72 = vst.msk [vmem:[#allocation2 + $0x8] sm:$0xf] %vm69_vm4, %v55_v38 }
  0x3e   :  { %645 = vrot.lane.b32.xlu2 %v4792_v57, %s5198_s23  ;;  %v288_v55 = vsel %vm5286_vm2, %v283_v49, %v287_v50  ;;  %v4815_v57 = vld [vmem:[%s8022_s0 + $0x148] sm:$0xf]  ;;  %v5627_v49 = vld [vmem:[%s8024_s7 + $0x18] sm:$0xff]  ;;  %v4858_v50 = vld [vmem:[%s8022_s0 + $0xc0] sm:$0xf]  ;;  %v1331_v56 = vrot.slane %v1330_v45, 4 }
  0x3f   :  { %v810_v59 = vshll.u32 %v4815_v57, 16 }
  0x41   :  { %v812_v3 = vrot.slane %v810_v59, 5 }
  0x42   :  { %964 = vrot.lane.b32.xlu0 %v777_v58, %s5199_s28  ;;  %v807_v58 = vshrl.u32 %v4815_v57, 16  ;;  %v1335_v57 = vrot.slane %v1333_v46, 5 }
  0x43   :  { %643 = vrot.lane.b32.xlu1 %v4791_v61, %s5198_s23  ;;  %v54_v61 = vld [vmem:[%s8022_s0 + $0x8] sm:$0xf] }
  0x44   :  { %v809_v0 = vrot.slane %v807_v58, 4  ;;  %71 = vst.msk [vmem:[#allocation2 + $0x4] sm:$0xf] %vm69_vm4, %v54_v61 }
  0x46   :  { %1062 = vrot.lane.b32.xlu2 %v4839_v6, %s5200_s27  ;;  %v813_v6 = vor.u32 %v812_v3, %v809_v0 }
  0x48   :  { %v814_v13 = vrot.slane %v813_v6, 4  ;;  %v1321_v6 = vrot.slane %v1319_v54, 5 }
  0x4a   :  { %1064 = vrot.lane.b32.xlu0 %v4840_v9, %s5200_s27  ;;  %v5552_v9 = vld [vmem:[%s8024_s7 + $0x38] sm:$0xff]  ;;  %v819_v22 = vsel %vm5286_vm2, %v814_v13, %v818_v14  ;;  %v313_v13 = vshll.u32 %v197_v8, 16  ;;  %v4763_v14 = vld [vmem:[%s8022_s0 + $0xc0] sm:$0xf] }
  0x4b   :  { %966 = vrot.lane.b32.xlu1 %v791_v12, %s5199_s28  ;;  %v802_v12 = vshll.u32 %v4814_v62, 16  ;;  %1783 = vmatpush.bf16.msra.mxu1 %v5552_v9  ;;  %v4881_v8 = vld [vmem:[%s8022_s0 + $0x38] sm:$0xf] }
  0x4c   :  { %v315_v23 = vrot.slane %v313_v13, 5 }
  0x4d   :  { %v804_v21 = vrot.slane %v802_v12, 5 }
  0x4e   :  { %1162 = vrot.lane.b32.xlu2 %v4856_v20, %s5201_s29  ;;  %v800_v20 = vrot.slane %v799_v11, 4  ;;  %v1336_v11 = vsel %vm5286_vm2, %v1331_v56, %v1335_v57 }
  0x4f   :  { %1784 = vmatpush.bf16.msra.mxu1 %v5572_v19 }
  0x50   :  { %v805_v28 = vsel %vm5286_vm2, %v800_v20, %v804_v21  ;;  %v5118_v20 = vld [vmem:[%s8023_s1 + $0x8] sm:$0xff] }
  0x51   :  { %v5674_v21 = vld [vmem:[%s8024_s7 + $0x8] sm:$0xff] }
  0x52   :  { %1481 = vrot.lane.b32.xlu0 %v1294_v24, %s5202_s19  ;;  %v1313_v24 = vshll.u32 %v4877_v16, 16 }
  0x53   :  { %1160 = vrot.lane.b32.xlu1 %v4855_v26, %s5201_s29  ;;  %v5122_v26 = vld [vmem:[%s8023_s1 + $0x28] sm:$0xff]  ;;  %1785 = vmatpush.bf16.msra.mxu1 %v5586_v27 }
  0x54   :  { %1672 = vmatpush.bf16.msra.mxu0 %v5122_v26  ;;  %v1315_v33 = vrot.slane %v1313_v24, 5  ;;  %5151 = vmatpush.bf16.msra.mxu3 %v5122_v26 }
  0x56   :  { %127 = vrot.lane.b32.xlu2 %v4761_v35, %s5195_s17  ;;  %v5121_v35 = vld [vmem:[%s8023_s1 + $0x20] sm:$0xff]  ;;  %v1316_v47 = vor.u32 %v1315_v33, %v1312_v32  ;;  %v4819_v32 = vld [vmem:[%s8022_s0 + $0x158] sm:$0xf] }
  0x57   :  { %1786 = vmatpush.bf16.msra.mxu1 %v5605_v37  ;;  %v838_v41 = vshll.u32 %v4819_v32, 16 }
  0x58   :  { %1673 = vmatpush.bf16.msra.mxu0 %v5121_v35  ;;  %5152 = vmatpush.bf16.msra.mxu3 %v5121_v35  ;;  %v1317_v61 = vrot.slane %v1316_v47, 4 }
  0x59   :  { %v840_v46 = vrot.slane %v838_v41, 5 }
  0x5a   :  { %129 = vrot.lane.b32.xlu0 %v4762_v42, %s5195_s17  ;;  %v198_v42 = vld [vmem:[%s8022_s0 + $0x38] sm:$0xf] }
  0x5b   :  { %1483 = vrot.lane.b32.xlu1 %v1308_v44, %s5202_s19  ;;  %v4857_v44 = vld [vmem:[%s8022_s0 + $0xb8] sm:$0xf]  ;;  %v318_v51 = vshrl.u32 %v198_v42, 16  ;;  %1787 = vmatpush.bf16.msra.mxu1 %v5627_v49 }
  0x5c   :  { %1674 = vmatpush.bf16.msra.mxu0 %v5120_v48  ;;  %5153 = vmatpush.bf16.msra.mxu3 %v5120_v48 }
  0x5d   :  { %v320_v63 = vrot.slane %v318_v51, 4  ;;  %v4818_v51 = vld [vmem:[%s8022_s0 + $0x154] sm:$0x1] }
  0x5e   :  { %453 = vrot.lane.b32.xlu2 %v302_v52, %s5197_s11  ;;  %v321_v52 = vshll.u32 %v198_v42, 16  ;;  %v4764_v42 = vld [vmem:[%s8022_s0 + $0xc8] sm:$0xf] }
  0x5f   :  { %1788 = vmatpush.bf16.msra.mxu1 %v5650_v2 }
  0x60   :  { %v5523_v60 = vpop.permute.xlu2 %541  ;;  %v323_v0 = vrot.slane %v321_v52, 5  ;;  %1675 = vmatpush.bf16.msra.mxu0 %v5119_v1  ;;  %5154 = vmatpush.bf16.msra.mxu3 %v5119_v1 }
  0x62   :  { %549 = vrot.lane.b32.xlu0 %v4777_v53, %s5196_s30  ;;  %v4842_v53 = vld [vmem:[%s8022_s0 + $0x30] sm:$0xf]  ;;  %v324_v16 = vor.u32 %v323_v0, %v320_v63 }
  0x63   :  { %451 = vrot.lane.b32.xlu1 %v288_v55, %s5197_s11  ;;  %v196_v55 = vld [vmem:[%s8022_s0 + $0x30] sm:$0xf]  ;;  %1789 = vmatpush.bf16.msra.mxu1 %v5674_v21 }
  0x64   :  { %v304_v58 = vshrl.u32 %v196_v55, 16  ;;  %v307_v59 = vshll.u32 %v196_v55, 16  ;;  %1676 = vmatpush.bf16.msra.mxu0 %v5118_v20  ;;  %5155 = vmatpush.bf16.msra.mxu3 %v5118_v20  ;;  %v830_v55 = vshll.u32 %v4818_v51, 16  ;;  %v4860_v51 = vld [vmem:[%s8022_s0 + $0xd0] sm:$0xf] }
  0x66   :  { %647 = vrot.lane.b32.xlu2 %v4793_v4, %s5198_s23  ;;  %v306_v3 = vrot.slane %v304_v58, 4  ;;  %v309_v4 = vrot.slane %v307_v59, 5  ;;  %v4779_v58 = vld [vmem:[%s8022_s0 + $0x150] sm:$0xf] }
  0x67   :  { %1790 = vmatpush.bf16.msra.mxu1 %v5693_v30 }
  0x68   :  { %v5560_v15 = vpop.permute.xlu2 %543  ;;  %v310_v12 = vor.u32 %v309_v4, %v306_v3  ;;  %1677 = vmatpush.bf16.msra.mxu0 %v5117_v29  ;;  %5156 = vmatpush.bf16.msra.mxu3 %v5117_v29  ;;  %v4859_v29 = vld [vmem:[%s8022_s0 + $0xc8] sm:$0xf] }
  0x6a   :  { %649 = vrot.lane.b32.xlu0 %v4794_v7, %s5198_s23  ;;  %v199_v7 = vld [vmem:[%s8022_s0 + $0x3c] sm:$0x1] }
  0x6b   :  { %551 = vrot.lane.b32.xlu1 %v4778_v10, %s5196_s30  ;;  %v327_v17 = vshll.u32 %v199_v7, 16 }
  0x6c   :  { %5157 = vmatpush.bf16.msrb.mxu3 %v5552_v9 }
  0x6d   :  { %v329_v26 = vrot.slane %v327_v17, 5 }
  0x6e   :  { %970 = vrot.lane.b32.xlu2 %v819_v22, %s5199_s28  ;;  %v1322_v22 = vsel %vm5286_vm2, %v1317_v61, %v1321_v6  ;;  %v832_v61 = vrot.slane %v830_v55, 5 }
  0x70   :  { %v5596_v34 = vpop.permute.xlu2 %960  ;;  %5158 = vmatpush.bf16.msrb.mxu3 %v5572_v19  ;;  %v4795_v19 = vld [vmem:[%s8022_s0 + $0x1e0] sm:$0xf] }
  0x72   :  { %1066 = vrot.lane.b32.xlu0 %v4841_v25, %s5200_s27  ;;  %v325_v25 = vrot.slane %v324_v16, 4 }
  0x73   :  { %968 = vrot.lane.b32.xlu1 %v805_v28, %s5199_s28  ;;  %v56_v28 = vld [vmem:[%s8022_s0 + $0x18] sm:$0xf] }
  0x74   :  { %v120_v40 = vpop.permute.xlu0 %119  ;;  %73 = vst.msk [vmem:[#allocation2 + $0xc] sm:$0xf] %vm69_vm4, %v56_v28  ;;  %v330_v39 = vsel %vm5286_vm2, %v325_v25, %v329_v26  ;;  %5159 = vmatpush.bf16.msrb.mxu3 %v5586_v27  ;;  %v4883_v27 = vld [vmem:[%s8022_s0 + $0x40] sm:$0xf] }
  0x75   :  { %168 = vst.msk [vmem:[#allocation2] sm:$0xf] %vm167_vm5, %v120_v40  ;;  %v835_v40 = vshrl.u32 %v4819_v32, 16  ;;  %v1355_v6 = vshll.u32 %v4883_v27, 16 }
  0x76   :  { %1164 = vrot.lane.b32.xlu2 %v4857_v44, %s5201_s29 }
  0x77   :  { %v837_v45 = vrot.slane %v835_v40, 4  ;;  %v1357_v13 = vrot.slane %v1355_v6, 5 }
  0x78   :  { %v5641_v62 = vpop.permute.xlu2 %1060  ;;  %5160 = vmatpush.bf16.msrb.mxu3 %v5605_v37  ;;  %v4796_v37 = vld [vmem:[%s8022_s0 + $0x1e8] sm:$0xf] }
  0x79   :  { %v841_v56 = vor.u32 %v840_v46, %v837_v45 }
  0x7a   :  { %1166 = vrot.lane.b32.xlu0 %v4858_v50, %s5201_s29  ;;  %v4820_v50 = vld [vmem:[%s8022_s0 + $0x15c] sm:$0x1] }
  0x7b   :  { %1068 = vrot.lane.b32.xlu1 %v4842_v53, %s5200_s27  ;;  %v4780_v53 = vld [vmem:[%s8022_s0 + $0x158] sm:$0xf]  ;;  %v844_v57 = vshll.u32 %v4820_v50, 16  ;;  %v842_v0 = vrot.slane %v841_v56, 4  ;;  %v57_v56 = vld [vmem:[%s8022_s0 + $0x20] sm:$0xf] }
  0x7c   :  { %v122_v5 = vpop.permute.xlu0 %121  ;;  %5161 = vmatpush.bf16.msrb.mxu3 %v5627_v49  ;;  %74 = vst.msk [vmem:[#allocation2 + $0x10] sm:$0xf] %vm69_vm4, %v57_v56 }
  0x7d   :  { %169 = vst.msk [vmem:[#allocation2 + $0x4] sm:$0xf] %vm167_vm5, %v122_v5  ;;  %v444_v10 = vpop.permute.xlu1 %443  ;;  %v846_v1 = vrot.slane %v844_v57, 5  ;;  %v1352_v5 = vshrl.u32 %v4883_v27, 16 }
  0x7e   :  { %492 = vst.msk [vmem:[#allocation2] sm:$0xf] %vm491_vm6, %v444_v10  ;;  %1487 = vrot.lane.b32.xlu2 %v1336_v11, %s5202_s19  ;;  %v1338_v10 = vshrl.u32 %v4881_v8, 16  ;;  %v1341_v11 = vshll.u32 %v4881_v8, 16 }
  0x7f   :  { %590 = vst.msk [vmem:[#allocation2] sm:$0xf] %vm589_vm7, %v5523_v60  ;;  %v311_v60 = vrot.slane %v310_v12, 4  ;;  %v847_v7 = vsel %vm5286_vm2, %v842_v0, %v846_v1  ;;  %v1354_v12 = vrot.slane %v1352_v5, 4  ;;  %v4766_v0 = vld [vmem:[%s8022_s0 + $0xe0] sm:$0xf] }
  0x80   :  { %v5681_v24 = vpop.permute.xlu2 %1477  ;;  %v1340_v16 = vrot.slane %v1338_v10, 4  ;;  %v1343_v17 = vrot.slane %v1341_v11, 5  ;;  %5162 = vmatpush.bf16.msrb.mxu3 %v5650_v2 }
  0x81   :  { %v316_v35 = vsel %vm5286_vm2, %v311_v60, %v315_v23  ;;  %v4882_v60 = vld [vmem:[%s8022_s0 + $0x3c] sm:$0x1]  ;;  %v1358_v25 = vor.u32 %v1357_v13, %v1354_v12  ;;  %v209_v12 = vld [vmem:[%s8022_s0 + $0x6c] sm:$0x1] }
  0x82   :  { %131 = vrot.lane.b32.xlu0 %v4763_v14, %s5195_s17  ;;  %v4884_v14 = vld [vmem:[%s8022_s0 + $0x44] sm:$0x1]  ;;  %v1344_v28 = vor.u32 %v1343_v17, %v1340_v16  ;;  %v1347_v2 = vshll.u32 %v4882_v60, 16  ;;  %v4770_v16 = vld [vmem:[%s8022_s0 + $0x100] sm:$0xf] }
  0x83   :  { %1485 = vrot.lane.b32.xlu1 %v1322_v22, %s5202_s19  ;;  %v200_v22 = vld [vmem:[%s8022_s0 + $0x48] sm:$0xf]  ;;  %v1361_v26 = vshll.u32 %v4884_v14, 16  ;;  %v4769_v14 = vld [vmem:[%s8022_s0 + $0xf8] sm:$0xf] }
  0x84   :  { %v640_v31 = vpop.permute.xlu0 %639  ;;  %v335_v32 = vshll.u32 %v200_v22, 16  ;;  %5163 = vmatpush.bf16.msrb.mxu3 %v5674_v21  ;;  %v1345_v40 = vrot.slane %v1344_v28, 4  ;;  %v1349_v41 = vrot.slane %v1347_v2, 5 }
  0x85   :  { %688 = vst.msk [vmem:[#allocation2] sm:$0xf] %vm687_vm8, %v640_v31  ;;  %v446_v33 = vpop.permute.xlu1 %445  ;;  %v332_v31 = vshrl.u32 %v200_v22, 16  ;;  %v1363_v38 = vrot.slane %v1361_v26, 5 }
  0x86   :  { %493 = vst.msk [vmem:[#allocation2 + $0x4] sm:$0xf] %vm491_vm6, %v446_v33  ;;  %455 = vrot.lane.b32.xlu2 %v316_v35, %s5197_s11  ;;  %v4843_v33 = vld [vmem:[%s8022_s0 + $0x38] sm:$0xf]  ;;  %v1359_v35 = vrot.slane %v1358_v25, 4 }
  0x87   :  { %591 = vst.msk [vmem:[#allocation2 + $0x4] sm:$0xf] %vm589_vm7, %v5560_v15  ;;  %v4817_v15 = vld [vmem:[%s8022_s0 + $0x150] sm:$0xf] }
  0x88   :  { %1009 = vst.msk [vmem:[#allocation2] sm:$0xf] %vm1008_vm9, %v5596_v34  ;;  %v821_v43 = vshrl.u32 %v4817_v15, 16  ;;  %v824_v44 = vshll.u32 %v4817_v15, 16  ;;  %v126_v9 = vpop.permute.xlu2 %125  ;;  %v337_v15 = vrot.slane %v335_v32, 5  ;;  %5164 = vmatpush.bf16.msrb.mxu3 %v5693_v30  ;;  %v1364_v46 = vsel %vm5286_vm2, %v1359_v35, %v1363_v38 }
  0x89   :  { %171 = vst.msk [vmem:[#allocation2 + $0xc] sm:$0xf] %vm167_vm5, %v126_v9  ;;  %v4782_v35 = vld [vmem:[%s8022_s0 + $0x170] sm:$0xf] }
  0x8a   :  { %457 = vrot.lane.b32.xlu0 %v330_v39, %s5197_s11  ;;  %v823_v34 = vrot.slane %v821_v43, 4  ;;  %v826_v47 = vrot.slane %v824_v44, 5  ;;  %v201_v43 = vld [vmem:[%s8022_s0 + $0x4c] sm:$0x1]  ;;  %v202_v44 = vld [vmem:[%s8022_s0 + $0x50] sm:$0xf] }
  0x8b   :  { %133 = vrot.lane.b32.xlu1 %v4764_v42, %s5195_s17  ;;  %v334_v42 = vrot.slane %v332_v31, 4  ;;  %v349_v50 = vshll.u32 %v202_v44, 16  ;;  %v4821_v31 = vld [vmem:[%s8022_s0 + $0x168] sm:$0xf] }
  0x8c   :  { %v963_v48 = vpop.permute.xlu0 %962  ;;  %v827_v54 = vor.u32 %v826_v47, %v823_v34  ;;  %v1350_v34 = vsel %vm5286_vm2, %v1345_v40, %v1349_v41  ;;  %v341_v47 = vshll.u32 %v201_v43, 16  ;;  %v852_v40 = vshll.u32 %v4821_v31, 16  ;;  %v4781_v41 = vld [vmem:[%s8022_s0 + $0x168] sm:$0xf] }
  0x8d   :  { %v642_v52 = vpop.permute.xlu1 %641  ;;  %v338_v30 = vor.u32 %v337_v15, %v334_v42 }
  0x8e   :  { %689 = vst.msk [vmem:[#allocation2 + $0x4] sm:$0xf] %vm687_vm8, %v642_v52  ;;  %555 = vrot.lane.b32.xlu2 %v4780_v53, %s5196_s30  ;;  %v828_v59 = vrot.slane %v827_v54, 4  ;;  %v343_v54 = vrot.slane %v341_v47, 5  ;;  %v4823_v47 = vld [vmem:[%s8022_s0 + $0x170] sm:$0xf] }
  0x8f   :  { %1010 = vst.msk [vmem:[#allocation2 + $0x4] sm:$0xf] %vm1008_vm9, %v963_v48  ;;  %v346_v48 = vshrl.u32 %v202_v44, 16  ;;  %v339_v53 = vrot.slane %v338_v30, 4  ;;  %v854_v44 = vrot.slane %v852_v40, 5 }
  0x90   :  { %1108 = vst.msk [vmem:[#allocation2 + $0x4] sm:$0xf] %vm1106_vm10, %v5641_v62  ;;  %v5748_v63 = vpop.permute.xlu2 %545  ;;  %v833_v4 = vsel %vm5286_vm2, %v828_v59, %v832_v61  ;;  %v58_v59 = vld [vmem:[%s8022_s0 + $0x28] sm:$0xf] }
  0x91   :  { %v348_v55 = vrot.slane %v346_v48, 4  ;;  %75 = vst.msk [vmem:[#allocation2 + $0x14] sm:$0xf] %vm69_vm4, %v58_v59  ;;  %v344_v1 = vsel %vm5286_vm2, %v339_v53, %v343_v54  ;;  %v4797_v48 = vld [vmem:[%s8022_s0 + $0x1f8] sm:$0xf]  ;;  %v863_v54 = vshrl.u32 %v4823_v47, 16 }
  0x92   :  { %651 = vrot.lane.b32.xlu0 %v4795_v19, %s5198_s23  ;;  %v351_v19 = vrot.slane %v349_v50, 5  ;;  %v4798_v50 = vld [vmem:[%s8022_s0 + $0x200] sm:$0xf] }
  0x93   :  { %553 = vrot.lane.b32.xlu1 %v4779_v58, %s5196_s30  ;;  %v208_v58 = vld [vmem:[%s8022_s0 + $0x68] sm:$0xf]  ;;  %v865_v59 = vrot.slane %v863_v54, 4 }
  0x94   :  { %v1157_v3 = vpop.permute.xlu0 %1156  ;;  %v388_v27 = vshrl.u32 %v208_v58, 16  ;;  %v4862_v54 = vld [vmem:[%s8022_s0 + $0xe8] sm:$0xf] }
  0x95   :  { %v1059_v62 = vpop.permute.xlu1 %1058 }
  0x96   :  { %1107 = vst.msk [vmem:[#allocation2] sm:$0xf] %vm1106_vm10, %v1059_v62  ;;  %972 = vrot.lane.b32.xlu2 %v833_v4, %s5199_s28  ;;  %v4765_v62 = vld [vmem:[%s8022_s0 + $0xd8] sm:$0xf]  ;;  %v352_v4 = vor.u32 %v351_v19, %v348_v55  ;;  %v866_v55 = vshll.u32 %v4823_v47, 16 }
  0x97   :  { %1205 = vst.msk [vmem:[#allocation2] sm:$0xf] %vm1204_vm11, %v1157_v3  ;;  %v391_v3 = vshll.u32 %v208_v58, 16 }
  0x98   :  { %1526 = vst.msk [vmem:[#allocation2] sm:$0xf] %vm1525_vm12, %v5681_v24  ;;  %v5772_v49 = vpop.permute.xlu2 %645  ;;  %v4844_v24 = vld [vmem:[%s8022_s0 + $0x40] sm:$0xf]  ;;  %v353_v10 = vrot.slane %v352_v4, 4 }
  0x9a   :  { %974 = vrot.lane.b32.xlu0 %v847_v7, %s5199_s28  ;;  %v390_v7 = vrot.slane %v388_v27, 4  ;;  %v4786_v27 = vld [vmem:[%s8022_s0 + $0x190] sm:$0xf] }
  0x9b   :  { %653 = vrot.lane.b32.xlu1 %v4796_v37, %s5198_s23  ;;  %v393_v37 = vrot.slane %v391_v3, 5 }
  0x9c   :  { %v1480_v20 = vpop.permute.xlu0 %1479 }
  0x9d   :  { %v1159_v23 = vpop.permute.xlu1 %1158  ;;  %v394_v17 = vor.u32 %v393_v37, %v390_v7 }
  0x9e   :  { %1206 = vst.msk [vmem:[#allocation2 + $0x4] sm:$0xf] %vm1204_vm11, %v1159_v23  ;;  %1072 = vrot.lane.b32.xlu2 %v4844_v24, %s5200_s27 }
  0x9f   :  { %1527 = vst.msk [vmem:[#allocation2 + $0x4] sm:$0xf] %vm1525_vm12, %v1480_v20  ;;  %v397_v20 = vshll.u32 %v209_v12, 16  ;;  %v395_v25 = vrot.slane %v394_v17, 4 }
  0xa0   :  { %v5799_v39 = vpop.permute.xlu2 %1062 }
  0xa1   :  { %v399_v26 = vrot.slane %v397_v20, 5  ;;  %v4831_v20 = vld [vmem:[%s8022_s0 + $0x190] sm:$0xf] }
  0xa2   :  { %1168 = vrot.lane.b32.xlu0 %v4859_v29, %s5201_s29 }
  0xa3   :  { %1070 = vrot.lane.b32.xlu1 %v4843_v33, %s5200_s27  ;;  %v211_v33 = vld [vmem:[%s8022_s0 + $0x74] sm:$0x1]  ;;  %v400_v38 = vsel %vm5286_vm2, %v395_v25, %v399_v26  ;;  %v919_v26 = vshrl.u32 %v4831_v20, 16 }
  0xa4   :  { %v448_v21 = vpop.permute.xlu0 %447  ;;  %v411_v15 = vshll.u32 %v211_v33, 16 }
  0xa5   :  { %v124_v9 = vpop.permute.xlu1 %123  ;;  %v921_v33 = vrot.slane %v919_v26, 4  ;;  %v206_v26 = vld [vmem:[%s8022_s0 + $0x60] sm:$0xf] }
  0xa6   :  { %170 = vst.msk [vmem:[#allocation2 + $0x8] sm:$0xf] %vm167_vm5, %v124_v9  ;;  %v5109_v45 = vld [vmem:[#allocation2] sm:$0xff]  ;;  %1489 = vrot.lane.b32.xlu2 %v1350_v34, %s5202_s19  ;;  %v4822_v34 = vld [vmem:[%s8022_s0 + $0x16c] sm:$0x1] }
  0xa7   :  { %494 = vst.msk [vmem:[#allocation2 + $0x8] sm:$0xf] %vm491_vm6, %v448_v21  ;;  %1678 = vmatmul.bf16.vlgmr.msra.gmra.mxu0 %v5109_v45  ;;  %1791 = vmatmul.bf16.vlgmr.msra.gmra.mxu1 %v5109_v45 }
  0xa8   :  { %592 = vst.msk [vmem:[#allocation2 + $0x8] sm:$0xf] %vm589_vm7, %v5748_v63  ;;  %v5822_v52 = vpop.permute.xlu2 %1162  ;;  %v203_v63 = vld [vmem:[%s8022_s0 + $0x54] sm:$0x1] }
  0xa9   :  { %v355_v5 = vshll.u32 %v203_v63, 16  ;;  %v4829_v63 = vld [vmem:[%s8022_s0 + $0x188] sm:$0xf] }
  0xaa   :  { %1491 = vrot.lane.b32.xlu0 %v1364_v46, %s5202_s19  ;;  %v413_v46 = vrot.slane %v411_v15, 5  ;;  %v908_v4 = vshll.u32 %v4829_v63, 16 }
  0xab   :  { %1170 = vrot.lane.b32.xlu1 %v4860_v51, %s5201_s29  ;;  %v357_v11 = vrot.slane %v355_v5, 5  ;;  %v4785_v5 = vld [vmem:[%s8022_s0 + $0x188] sm:$0xf] }
  0xac   :  { %v548_v57 = vpop.permute.xlu0 %547 }
  0xad   :  { %v450_v61 = vpop.permute.xlu1 %449  ;;  %v358_v22 = vsel %vm5286_vm2, %v353_v10, %v357_v11  ;;  %v910_v10 = vrot.slane %v908_v4, 5 }
  0xae   :  { %495 = vst.msk [vmem:[#allocation2 + $0xc] sm:$0xf] %vm491_vm6, %v450_v61  ;;  %137 = vrot.lane.b32.xlu2 %v4766_v0, %s5195_s17  ;;  %v868_v61 = vrot.slane %v866_v55, 5  ;;  %v4861_v55 = vld [vmem:[%s8022_s0 + $0xe0] sm:$0xf] }
  0xaf   :  { %593 = vst.msk [vmem:[#allocation2 + $0xc] sm:$0xf] %vm589_vm7, %v548_v57 }
  0xb0   :  { %691 = vst.msk [vmem:[#allocation2 + $0xc] sm:$0xf] %vm687_vm8, %v5772_v49  ;;  %v128_v6 = vpop.permute.xlu2 %127  ;;  %v210_v49 = vld [vmem:[%s8022_s0 + $0x70] sm:$0xf] }
  0xb1   :  { %172 = vst.msk [vmem:[#allocation2 + $0x10] sm:$0xf] %vm167_vm5, %v128_v6  ;;  %v402_v60 = vshrl.u32 %v210_v49, 16  ;;  %v405_v23 = vshll.u32 %v210_v49, 16  ;;  %v869_v6 = vor.u32 %v868_v61, %v865_v59  ;;  %v4830_v49 = vld [vmem:[%s8022_s0 + $0x18c] sm:$0x1] }
  0xb2   :  { %459 = vrot.lane.b32.xlu0 %v344_v1, %s5197_s11  ;;  %v4824_v1 = vld [vmem:[%s8022_s0 + $0x174] sm:$0x1] }
  0xb3   :  { %135 = vrot.lane.b32.xlu1 %v4765_v62, %s5195_s17  ;;  %v404_v2 = vrot.slane %v402_v60, 4  ;;  %v407_v29 = vrot.slane %v405_v23, 5  ;;  %v905_v62 = vshrl.u32 %v4829_v63, 16  ;;  %v872_v7 = vshll.u32 %v4824_v1, 16  ;;  %v4802_v60 = vld [vmem:[%s8022_s0 + $0x220] sm:$0xf] }
  0xb4   :  { %v965_v8 = vpop.permute.xlu0 %964  ;;  %v870_v12 = vrot.slane %v869_v6, 4  ;;  %v4850_v6 = vld [vmem:[%s8022_s0 + $0x78] sm:$0xf] }
  0xb5   :  { %v644_v13 = vpop.permute.xlu1 %643  ;;  %v408_v42 = vor.u32 %v407_v29, %v404_v2 }
  0xb6   :  { %690 = vst.msk [vmem:[#allocation2 + $0x8] sm:$0xf] %vm687_vm8, %v644_v13  ;;  %143 = vrot.lane.b32.xlu2 %v4769_v14, %s5195_s17  ;;  %v874_v13 = vrot.slane %v872_v7, 5  ;;  %v59_v14 = vld [vmem:[%s8022_s0 + $0x30] sm:$0xf] }
  0xb7   :  { %1011 = vst.msk [vmem:[#allocation2 + $0x8] sm:$0xf] %vm1008_vm9, %v965_v8  ;;  %v409_v45 = vrot.slane %v408_v42, 4  ;;  %v907_v8 = vrot.slane %v905_v62, 4  ;;  %v4846_v42 = vld [vmem:[%s8022_s0 + $0x58] sm:$0xf] }
  0xb8   :  { %1109 = vst.msk [vmem:[#allocation2 + $0x8] sm:$0xf] %vm1106_vm10, %v5799_v39  ;;  %v454_v24 = vpop.permute.xlu2 %453  ;;  %v849_v39 = vshrl.u32 %v4821_v31, 16  ;;  %v875_v25 = vsel %vm5286_vm2, %v870_v12, %v874_v13  ;;  %v4888_v62 = vld [vmem:[%s8022_s0 + $0x5c] sm:$0x1] }
  0xb9   :  { %v414_v53 = vsel %vm5286_vm2, %v409_v45, %v413_v46  ;;  %76 = vst.msk [vmem:[#allocation2 + $0x18] sm:$0xf] %vm69_vm4, %v59_v14  ;;  %v911_v23 = vor.u32 %v910_v10, %v907_v8  ;;  %v1389_v10 = vshll.u32 %v4888_v62, 16  ;;  %v4895_v13 = vld [vmem:[%s8022_s0 + $0x78] sm:$0xf] }
  0xba   :  { %145 = vrot.lane.b32.xlu0 %v4770_v16, %s5195_s17  ;;  %v851_v43 = vrot.slane %v849_v39, 4  ;;  %v60_v39 = vld [vmem:[%s8022_s0 + $0x38] sm:$0xf]  ;;  %v1439_v14 = vshll.u32 %v4895_v13, 16 }
  0xbb   :  { %461 = vrot.lane.b32.xlu1 %v358_v22, %s5197_s11  ;;  %v4801_v22 = vld [vmem:[%s8022_s0 + $0x218] sm:$0xf]  ;;  %v912_v29 = vrot.slane %v911_v23, 4  ;;  %77 = vst.msk [vmem:[#allocation2 + $0x1c] sm:$0xf] %vm69_vm4, %v60_v39  ;;  %v377_v39 = vshll.u32 %v206_v26, 16 }
  0xbc   :  { %v1065_v28 = vpop.permute.xlu0 %1064  ;;  %v855_v51 = vor.u32 %v854_v44, %v851_v43  ;;  %v4845_v44 = vld [vmem:[%s8022_s0 + $0x50] sm:$0xf] }
  0xbd   :  { %v967_v32 = vpop.permute.xlu1 %966 }
  0xbe   :  { %1012 = vst.msk [vmem:[#allocation2 + $0xc] sm:$0xf] %vm1008_vm9, %v967_v32  ;;  %559 = vrot.lane.b32.xlu2 %v4782_v35, %s5196_s30  ;;  %v856_v56 = vrot.slane %v855_v51, 4  ;;  %v4886_v51 = vld [vmem:[%s8022_s0 + $0x54] sm:$0x1] }
  0xbf   :  { %1110 = vst.msk [vmem:[#allocation2 + $0xc] sm:$0xf] %vm1106_vm10, %v1065_v28  ;;  %v922_v28 = vshll.u32 %v4831_v20, 16  ;;  %v1391_v20 = vrot.slane %v1389_v10, 5 }
  0xc0   :  { %1208 = vst.msk [vmem:[#allocation2 + $0xc] sm:$0xf] %vm1204_vm11, %v5822_v52  ;;  %v5896_v21 = vpop.permute.xlu2 %647  ;;  %v858_v52 = vshll.u32 %v4822_v34, 16 }
  0xc1   :  { %v924_v35 = vrot.slane %v922_v28, 5  ;;  %v4896_v28 = vld [vmem:[%s8022_s0 + $0x7c] sm:$0x1] }
  0xc2   :  { %467 = vrot.lane.b32.xlu0 %v400_v38, %s5197_s11  ;;  %v860_v57 = vrot.slane %v858_v52, 5  ;;  %v4885_v38 = vld [vmem:[%s8022_s0 + $0x50] sm:$0xf]  ;;  %v4887_v52 = vld [vmem:[%s8022_s0 + $0x58] sm:$0xf] }
  0xc3   :  { %557 = vrot.lane.b32.xlu1 %v4781_v41, %s5196_s30  ;;  %v4832_v41 = vld [vmem:[%s8022_s0 + $0x194] sm:$0x1]  ;;  %v1369_v43 = vshll.u32 %v4885_v38, 16 }
  0xc4   :  { %v1482_v9 = vpop.permute.xlu0 %1481  ;;  %v861_v3 = vsel %vm5286_vm2, %v856_v56, %v860_v57  ;;  %v928_v45 = vshll.u32 %v4832_v41, 16  ;;  %v1375_v56 = vshll.u32 %v4886_v51, 16  ;;  %v1380_v57 = vshrl.u32 %v4887_v52, 16 }
  0xc5   :  { %v1161_v30 = vpop.permute.xlu1 %1160 }
  0xc6   :  { %1207 = vst.msk [vmem:[#allocation2 + $0x8] sm:$0xf] %vm1204_vm11, %v1161_v30  ;;  %655 = vrot.lane.b32.xlu2 %v4797_v48, %s5198_s23  ;;  %v1371_v30 = vrot.slane %v1369_v43, 5  ;;  %v1382_v1 = vrot.slane %v1380_v57, 4 }
  0xc7   :  { %1528 = vst.msk [vmem:[#allocation2 + $0x8] sm:$0xf] %vm1525_vm12, %v1482_v9  ;;  %v925_v9 = vor.u32 %v924_v35, %v921_v33  ;;  %v1445_v33 = vshll.u32 %v4896_v28, 16  ;;  %v4866_v35 = vld [vmem:[%s8022_s0 + $0x108] sm:$0xf] }
  0xc8   :  { %v5917_v19 = vpop.permute.xlu2 %970 }
  0xc9   :  { %v926_v48 = vrot.slane %v925_v9, 4 }
  0xca   :  { %657 = vrot.lane.b32.xlu0 %v4798_v50, %s5198_s23  ;;  %v930_v50 = vrot.slane %v928_v45, 5  ;;  %v1447_v45 = vrot.slane %v1445_v33, 5 }
  0xcb   :  { %469 = vrot.lane.b32.xlu1 %v414_v53, %s5197_s11 }
  0xcc   :  { %v130_v58 = vpop.permute.xlu0 %129  ;;  %v931_v59 = vsel %vm5286_vm2, %v926_v48, %v930_v50 }
  0xcd   :  { %173 = vst.msk [vmem:[#allocation2 + $0x14] sm:$0xf] %vm167_vm5, %v130_v58  ;;  %v1484_v0 = vpop.permute.xlu1 %1483  ;;  %v1383_v58 = vshll.u32 %v4887_v52, 16  ;;  %v207_v52 = vld [vmem:[%s8022_s0 + $0x64] sm:$0x1] }
  0xce   :  { %1529 = vst.msk [vmem:[#allocation2 + $0xc] sm:$0xf] %vm1525_vm12, %v1484_v0  ;;  %567 = vrot.lane.b32.xlu2 %v4786_v27, %s5196_s30  ;;  %v1377_v0 = vrot.slane %v1375_v56, 5 }
  0xcf   :  { %497 = vst.msk [vmem:[#allocation2 + $0x14] sm:$0xf] %vm491_vm6, %v454_v24  ;;  %v914_v24 = vshll.u32 %v4830_v49, 16  ;;  %v1385_v27 = vrot.slane %v1383_v58, 5  ;;  %v1436_v49 = vshrl.u32 %v4895_v13, 16 }
  0xd0   :  { %v5939_v37 = vpop.permute.xlu2 %1164  ;;  %v4767_v58 = vld [vmem:[%s8022_s0 + $0xe8] sm:$0xf]  ;;  %v4768_v13 = vld [vmem:[%s8022_s0 + $0xf0] sm:$0xf] }
  0xd1   :  { %v916_v31 = vrot.slane %v914_v24, 5  ;;  %v1386_v8 = vor.u32 %v1385_v27, %v1382_v1 }
  0xd2   :  { %976 = vrot.lane.b32.xlu0 %v861_v3, %s5199_s28 }
  0xd3   :  { %565 = vrot.lane.b32.xlu1 %v4785_v5, %s5196_s30  ;;  %v917_v15 = vsel %vm5286_vm2, %v912_v29, %v916_v31  ;;  %v4893_v5 = vld [vmem:[%s8022_s0 + $0x70] sm:$0xf]  ;;  %v4894_v29 = vld [vmem:[%s8022_s0 + $0x74] sm:$0x1]  ;;  %v4865_v31 = vld [vmem:[%s8022_s0 + $0x100] sm:$0xf] }
  0xd4   :  { %v550_v11 = vpop.permute.xlu0 %549  ;;  %v1425_v12 = vshll.u32 %v4893_v5, 16 }
  0xd5   :  { %v452_v16 = vpop.permute.xlu1 %451  ;;  %v5110_v17 = vld [vmem:[#allocation2 + $0x8] sm:$0xff] }
  0xd6   :  { %496 = vst.msk [vmem:[#allocation2 + $0x10] sm:$0xf] %vm491_vm6, %v452_v16  ;;  %1683 = vmatmul.bf16.gmra.mxu0 %v5110_v17  ;;  %1796 = vmatmul.bf16.gmra.mxu1 %v5110_v17  ;;  %v1387_v17 = vrot.slane %v1386_v8, 4 }
  0xd7   :  { %594 = vst.msk [vmem:[#allocation2 + $0x10] sm:$0xf] %vm589_vm7, %v550_v11  ;;  %663 = vrot.lane.b32.xlu2 %v4801_v22, %s5198_s23  ;;  %v1422_v11 = vshrl.u32 %v4893_v5, 16  ;;  %v1438_v22 = vrot.slane %v1436_v49, 4  ;;  %v62_v5 = vld [vmem:[%s8022_s0 + $0x50] sm:$0xf] }
  0xd8   :  { %692 = vst.msk [vmem:[#allocation2 + $0x10] sm:$0xf] %vm687_vm8, %v5896_v21  ;;  %v5966_v2 = vpop.permute.xlu2 %1487  ;;  %v1366_v21 = vshrl.u32 %v4885_v38, 16  ;;  %v374_v38 = vshrl.u32 %v206_v26, 16  ;;  %v212_v49 = vld [vmem:[%s8022_s0 + $0x78] sm:$0xf] }
  0xd9   :  { %v1424_v24 = vrot.slane %v1422_v11, 4  ;;  %79 = vst.msk [vmem:[#allocation2 + $0x24] sm:$0xf] %vm69_vm4, %v62_v5  ;;  %v4799_v5 = vld [vmem:[%s8022_s0 + $0x208] sm:$0xf] }
  0xda   :  { %665 = vrot.lane.b32.xlu0 %v4802_v60, %s5198_s23  ;;  %v1368_v34 = vrot.slane %v1366_v21, 4  ;;  %v1441_v60 = vrot.slane %v1439_v14, 5  ;;  %v416_v14 = vshrl.u32 %v212_v49, 16 }
  0xdb   :  { %978 = vrot.lane.b32.xlu1 %v875_v25, %s5199_s28  ;;  %v1427_v25 = vrot.slane %v1425_v12, 5 }
  0xdc   :  { %v650_v32 = vpop.permute.xlu0 %649 }
  0xdd   :  { %v552_v40 = vpop.permute.xlu1 %551  ;;  %v1428_v41 = vor.u32 %v1427_v25, %v1424_v24  ;;  %v215_v24 = vld [vmem:[%s8022_s0 + $0x84] sm:$0x1]  ;;  %v418_v25 = vrot.slane %v416_v14, 4 }
  0xde   :  { %595 = vst.msk [vmem:[#allocation2 + $0x14] sm:$0xf] %vm589_vm7, %v552_v40  ;;  %v1392_v40 = vsel %vm5286_vm2, %v1387_v17, %v1391_v20  ;;  %v419_v17 = vshll.u32 %v212_v49, 16 }
  0xdf   :  { %693 = vst.msk [vmem:[#allocation2 + $0x14] sm:$0xf] %vm687_vm8, %v650_v32  ;;  %1076 = vrot.lane.b32.xlu2 %v4846_v42, %s5200_s27  ;;  %v1442_v32 = vor.u32 %v1441_v60, %v1438_v22  ;;  %v1431_v42 = vshll.u32 %v4894_v29, 16  ;;  %v1429_v50 = vrot.slane %v1428_v41, 4  ;;  %v213_v29 = vld [vmem:[%s8022_s0 + $0x7c] sm:$0x1] }
  0xe0   :  { %1014 = vst.msk [vmem:[#allocation2 + $0x14] sm:$0xf] %vm1008_vm9, %v5917_v19  ;;  %v5993_v46 = vpop.permute.xlu2 %455  ;;  %v1372_v19 = vor.u32 %v1371_v30, %v1368_v34  ;;  %v379_v34 = vrot.slane %v377_v39, 5  ;;  %v421_v26 = vrot.slane %v419_v17, 5  ;;  %v425_v33 = vshll.u32 %v213_v29, 16 }
  0xe1   :  { %v1443_v9 = vrot.slane %v1442_v32, 4  ;;  %v1433_v51 = vrot.slane %v1431_v42, 5  ;;  %v439_v39 = vshll.u32 %v215_v24, 16 }
  0xe2   :  { %984 = vrot.lane.b32.xlu0 %v917_v15, %s5199_s28  ;;  %v1373_v63 = vrot.slane %v1372_v19, 4  ;;  %v204_v15 = vld [vmem:[%s8022_s0 + $0x58] sm:$0xf]  ;;  %v422_v32 = vor.u32 %v421_v26, %v418_v25  ;;  %v427_v42 = vrot.slane %v425_v33, 5  ;;  %v4834_v33 = vld [vmem:[%s8022_s0 + $0x19c] sm:$0x1] }
  0xe3   :  { %1074 = vrot.lane.b32.xlu1 %v4845_v44, %s5200_s27  ;;  %v360_v21 = vshrl.u32 %v204_v15, 16  ;;  %v363_v43 = vshll.u32 %v204_v15, 16  ;;  %v1448_v19 = vsel %vm5286_vm2, %v1443_v9, %v1447_v45  ;;  %v4827_v45 = vld [vmem:[%s8022_s0 + $0x180] sm:$0xf] }
  0xe4   :  { %v1067_v47 = vpop.permute.xlu0 %1066  ;;  %v1378_v7 = vsel %vm5286_vm2, %v1373_v63, %v1377_v0  ;;  %v383_v63 = vshll.u32 %v207_v52, 16  ;;  %v1434_v0 = vsel %vm5286_vm2, %v1429_v50, %v1433_v51  ;;  %v423_v41 = vrot.slane %v422_v32, 4  ;;  %v4825_v50 = vld [vmem:[%s8022_s0 + $0x178] sm:$0xf] }
  0xe5   :  { %v969_v53 = vpop.permute.xlu1 %968  ;;  %v362_v30 = vrot.slane %v360_v21, 4  ;;  %v441_v21 = vrot.slane %v439_v39, 5  ;;  %v877_v51 = vshrl.u32 %v4825_v50, 16  ;;  %v880_v52 = vshll.u32 %v4825_v50, 16 }
  0xe6   :  { %1013 = vst.msk [vmem:[#allocation2 + $0x10] sm:$0xf] %vm1008_vm9, %v969_v53  ;;  %v205_v53 = vld [vmem:[%s8022_s0 + $0x5c] sm:$0x1]  ;;  %v385_v62 = vrot.slane %v383_v63, 5  ;;  %v942_v39 = vshll.u32 %v4834_v33, 16 }
  0xe7   :  { %1111 = vst.msk [vmem:[#allocation2 + $0x10] sm:$0xf] %vm1106_vm10, %v1067_v47  ;;  %1172 = vrot.lane.b32.xlu2 %v4861_v55, %s5201_s29  ;;  %v365_v47 = vrot.slane %v363_v43, 5  ;;  %v369_v57 = vshll.u32 %v205_v53, 16  ;;  %v4826_v63 = vld [vmem:[%s8022_s0 + $0x17c] sm:$0x1] }
  0xe8   :  { %1209 = vst.msk [vmem:[#allocation2 + $0x10] sm:$0xf] %vm1204_vm11, %v5939_v37  ;;  %v6016_v61 = vpop.permute.xlu2 %555  ;;  %v4849_v37 = vld [vmem:[%s8022_s0 + $0x70] sm:$0xf] }
  0xe9   :  { %v366_v56 = vor.u32 %v365_v47, %v362_v30  ;;  %v371_v27 = vrot.slane %v369_v57, 5  ;;  %v891_v30 = vshrl.u32 %v4827_v45, 16  ;;  %v894_v47 = vshll.u32 %v4827_v45, 16 }
  0xea   :  { %1174 = vrot.lane.b32.xlu0 %v4862_v54, %s5201_s29  ;;  %v879_v57 = vrot.slane %v877_v51, 4 }
  0xeb   :  { %986 = vrot.lane.b32.xlu1 %v931_v59, %s5199_s28  ;;  %v367_v1 = vrot.slane %v366_v56, 4  ;;  %v893_v53 = vrot.slane %v891_v30, 4  ;;  %v4828_v56 = vld [vmem:[%s8022_s0 + $0x184] sm:$0x1] }
  0xec   :  { %v1167_v3 = vpop.permute.xlu0 %1166 }
  0xed   :  { %v1069_v4 = vpop.permute.xlu1 %1068  ;;  %v372_v8 = vsel %vm5286_vm2, %v367_v1, %v371_v27  ;;  %v886_v27 = vshll.u32 %v4826_v63, 16  ;;  %v4897_v63 = vld [vmem:[%s8022_s0 + $0x80] sm:$0xf] }
  0xee   :  { %1112 = vst.msk [vmem:[#allocation2 + $0x14] sm:$0xf] %vm1106_vm10, %v1069_v4 }
  0xef   :  { %1210 = vst.msk [vmem:[#allocation2 + $0x14] sm:$0xf] %vm1204_vm11, %v1167_v3  ;;  %1084 = vrot.lane.b32.xlu2 %v4850_v6, %s5200_s27 }
  0xf0   :  { %1531 = vst.msk [vmem:[#allocation2 + $0x14] sm:$0xf] %vm1525_vm12, %v5966_v2  ;;  %v6042_v16 = vpop.permute.xlu2 %972 }
  0xf2   :  { %1493 = vrot.lane.b32.xlu0 %v1378_v7, %s5202_s19  ;;  %v61_v7 = vld [vmem:[%s8022_s0 + $0x48] sm:$0xf] }
  0xf3   :  { %1082 = vrot.lane.b32.xlu1 %v4849_v37, %s5200_s27  ;;  %78 = vst.msk [vmem:[#allocation2 + $0x20] sm:$0xf] %vm69_vm4, %v61_v7 }
  0xf4   :  { %v132_v23 = vpop.permute.xlu0 %131 }
  0xf5   :  { %174 = vst.msk [vmem:[#allocation2 + $0x18] sm:$0xf] %vm167_vm5, %v132_v23  ;;  %v1486_v2 = vpop.permute.xlu1 %1485  ;;  %v65_v23 = vld [vmem:[%s8022_s0 + $0x68] sm:$0xf] }
  0xf6   :  { %1530 = vst.msk [vmem:[#allocation2 + $0x10] sm:$0xf] %vm1525_vm12, %v1486_v2  ;;  %v4772_v2 = vld [vmem:[%s8022_s0 + $0x110] sm:$0xf] }
  0xf7   :  { %498 = vst.msk [vmem:[#allocation2 + $0x18] sm:$0xf] %vm491_vm6, %v5993_v46  ;;  %1180 = vrot.lane.b32.xlu2 %v4865_v31, %s5201_s29  ;;  %v376_v46 = vrot.slane %v374_v38, 4  ;;  %v66_v31 = vld [vmem:[%s8022_s0 + $0x70] sm:$0xf] }
  0xf8   :  { %v6071_v44 = vpop.permute.xlu2 %1072  ;;  %82 = vst.msk [vmem:[#allocation2 + $0x30] sm:$0xf] %vm69_vm4, %v65_v23 }
  0xf9   :  { %v380_v59 = vor.u32 %v379_v34, %v376_v46  ;;  %83 = vst.msk [vmem:[#allocation2 + $0x34] sm:$0xf] %vm69_vm4, %v66_v31  ;;  %v428_v46 = vsel %vm5286_vm2, %v423_v41, %v427_v42 }
  0xfa   :  { %1182 = vrot.lane.b32.xlu0 %v4866_v35, %s5201_s29  ;;  %v4783_v35 = vld [vmem:[%s8022_s0 + $0x178] sm:$0xf] }
  0xfb   :  { %1495 = vrot.lane.b32.xlu1 %v1392_v40, %s5202_s19  ;;  %v381_v3 = vrot.slane %v380_v59, 4  ;;  %v4771_v40 = vld [vmem:[%s8022_s0 + $0x108] sm:$0xf] }
  0xfc   :  { %v458_v48 = vpop.permute.xlu0 %457 }
  0xfd   :  { %v134_v54 = vpop.permute.xlu1 %133  ;;  %v5111_v55 = vld [vmem:[#allocation2 + $0x10] sm:$0xff]  ;;  %v386_v10 = vsel %vm5286_vm2, %v381_v3, %v385_v62  ;;  %v4787_v3 = vld [vmem:[%s8022_s0 + $0x198] sm:$0xf] }
  0xfe   :  { %175 = vst.msk [vmem:[#allocation2 + $0x1c] sm:$0xf] %vm167_vm5, %v134_v54  ;;  %1688 = vmatmul.bf16.gmra.mxu0 %v5111_v55  ;;  %1801 = vmatmul.bf16.gmra.mxu1 %v5111_v55  ;;  %v896_v54 = vrot.slane %v894_v47, 5 }
  0xff   :  { %499 = vst.msk [vmem:[#allocation2 + $0x1c] sm:$0xf] %vm491_vm6, %v458_v48  ;;  %1503 = vrot.lane.b32.xlu2 %v1448_v19, %s5202_s19  ;;  %v4784_v48 = vld [vmem:[%s8022_s0 + $0x180] sm:$0xf] }
 0x100   :  { %597 = vst.msk [vmem:[#allocation2 + $0x1c] sm:$0xf] %vm589_vm7, %v6016_v61  ;;  %v6094_v4 = vpop.permute.xlu2 %1489  ;;  %v214_v61 = vld [vmem:[%s8022_s0 + $0x80] sm:$0xf]  ;;  %v897_v62 = vor.u32 %v896_v54, %v893_v53 }
 0x101   :  { %v430_v11 = vshrl.u32 %v214_v61, 16  ;;  %v433_v12 = vshll.u32 %v214_v61, 16  ;;  %v888_v61 = vrot.slane %v886_v27, 5  ;;  %v4889_v53 = vld [vmem:[%s8022_s0 + $0x60] sm:$0xf] }
 0x102   :  { %139 = vrot.lane.b32.xlu0 %v4767_v58, %s5195_s17  ;;  %v882_v58 = vrot.slane %v880_v52, 5  ;;  %v898_v7 = vrot.slane %v897_v62, 4  ;;  %v4848_v52 = vld [vmem:[%s8022_s0 + $0x68] sm:$0xf]  ;;  %v1394_v54 = vshrl.u32 %v4889_v53, 16 }
 0x103   :  { %1501 = vrot.lane.b32.xlu1 %v1434_v0, %s5202_s19  ;;  %v432_v20 = vrot.slane %v430_v11, 4  ;;  %v435_v22 = vrot.slane %v433_v12, 5  ;;  %v4800_v0 = vld [vmem:[%s8022_s0 + $0x210] sm:$0xf]  ;;  %v4835_v11 = vld [vmem:[%s8022_s0 + $0x1a0] sm:$0xf] }
 0x104   :  { %v652_v6 = vpop.permute.xlu0 %651  ;;  %v883_v1 = vor.u32 %v882_v58, %v879_v57  ;;  %v947_v17 = vshrl.u32 %v4835_v11, 16  ;;  %v4890_v62 = vld [vmem:[%s8022_s0 + $0x64] sm:$0x1] }
 0x105   :  { %v554_v37 = vpop.permute.xlu1 %553  ;;  %v436_v38 = vor.u32 %v435_v22, %v432_v20  ;;  %v950_v20 = vshll.u32 %v4835_v11, 16  ;;  %v4788_v22 = vld [vmem:[%s8022_s0 + $0x1a0] sm:$0xf] }
 0x106   :  { %596 = vst.msk [vmem:[#allocation2 + $0x18] sm:$0xf] %vm589_vm7, %v554_v37  ;;  %v949_v24 = vrot.slane %v947_v17, 4 }
 0x107   :  { %694 = vst.msk [vmem:[#allocation2 + $0x18] sm:$0xf] %vm687_vm8, %v652_v6  ;;  %463 = vrot.lane.b32.xlu2 %v372_v8, %s5197_s11  ;;  %v437_v15 = vrot.slane %v436_v38, 4  ;;  %v884_v6 = vrot.slane %v883_v1, 4  ;;  %v952_v25 = vrot.slane %v950_v20, 5 }
 0x108   :  { %1015 = vst.msk [vmem:[#allocation2 + $0x18] sm:$0xf] %vm1008_vm9, %v6042_v16  ;;  %v138_v60 = vpop.permute.xlu2 %137 }
 0x109   :  { %177 = vst.msk [vmem:[#allocation2 + $0x24] sm:$0xf] %vm167_vm5, %v138_v60  ;;  %v442_v34 = vsel %vm5286_vm2, %v437_v15, %v441_v21  ;;  %v889_v49 = vsel %vm5286_vm2, %v884_v6, %v888_v61  ;;  %v4833_v60 = vld [vmem:[%s8022_s0 + $0x198] sm:$0xf]  ;;  %v953_v41 = vor.u32 %v952_v25, %v949_v24  ;;  %v4803_v15 = vld [vmem:[%s8022_s0 + $0x228] sm:$0xf] }
 0x10a   :  { %465 = vrot.lane.b32.xlu0 %v386_v10, %s5197_s11  ;;  %v933_v23 = vshrl.u32 %v4833_v60, 16  ;;  %v1403_v6 = vshll.u32 %v4890_v62, 16 }
 0x10b   :  { %141 = vrot.lane.b32.xlu1 %v4768_v13, %s5195_s17 }
 0x10c   :  { %v975_v16 = vpop.permute.xlu0 %974  ;;  %v935_v29 = vrot.slane %v933_v23, 4 }
 0x10d   :  { %v654_v28 = vpop.permute.xlu1 %653 }
 0x10e   :  { %695 = vst.msk [vmem:[#allocation2 + $0x1c] sm:$0xf] %vm687_vm8, %v654_v28 }
 0x10f   :  { %1016 = vst.msk [vmem:[#allocation2 + $0x1c] sm:$0xf] %vm1008_vm9, %v975_v16  ;;  %149 = vrot.lane.b32.xlu2 %v4772_v2, %s5195_s17  ;;  %v936_v16 = vshll.u32 %v4833_v60, 16  ;;  %v4836_v2 = vld [vmem:[%s8022_s0 + $0x1a4] sm:$0x1] }
 0x110   :  { %1114 = vst.msk [vmem:[#allocation2 + $0x1c] sm:$0xf] %vm1106_vm10, %v6071_v44  ;;  %v144_v43 = vpop.permute.xlu2 %143  ;;  %v956_v42 = vshll.u32 %v4836_v2, 16  ;;  %v4898_v60 = vld [vmem:[%s8022_s0 + $0x84] sm:$0x1] }
 0x111   :  { %180 = vst.msk [vmem:[#allocation2 + $0x30] sm:$0xf] %vm167_vm5, %v144_v43  ;;  %v938_v31 = vrot.slane %v936_v16, 5  ;;  %v944_v43 = vrot.slane %v942_v39, 5  ;;  %v4899_v16 = vld [vmem:[%s8022_s0 + $0x88] sm:$0xf] }
 0x112   :  { %561 = vrot.lane.b32.xlu0 %v4783_v35, %s5196_s30  ;;  %v4804_v35 = vld [vmem:[%s8022_s0 + $0x230] sm:$0xf]  ;;  %v958_v45 = vrot.slane %v956_v42, 5  ;;  %v4852_v2 = vld [vmem:[%s8022_s0 + $0x88] sm:$0xf] }
 0x113   :  { %147 = vrot.lane.b32.xlu1 %v4771_v40, %s5195_s17  ;;  %v939_v38 = vor.u32 %v938_v31, %v935_v29  ;;  %v4847_v40 = vld [vmem:[%s8022_s0 + $0x60] sm:$0xf]  ;;  %v1464_v29 = vshrl.u32 %v4899_v16, 16  ;;  %v1467_v31 = vshll.u32 %v4899_v16, 16  ;;  %v4900_v42 = vld [vmem:[%s8022_s0 + $0x8c] sm:$0x1] }
 0x114   :  { %v1169_v9 = vpop.permute.xlu0 %1168 }
 0x115   :  { %v1071_v44 = vpop.permute.xlu1 %1070  ;;  %v940_v21 = vrot.slane %v939_v38, 4  ;;  %v1466_v39 = vrot.slane %v1464_v29, 4 }
 0x116   :  { %1113 = vst.msk [vmem:[#allocation2 + $0x18] sm:$0xf] %vm1106_vm10, %v1071_v44 }
 0x117   :  { %1211 = vst.msk [vmem:[#allocation2 + $0x18] sm:$0xf] %vm1204_vm11, %v1169_v9  ;;  %471 = vrot.lane.b32.xlu2 %v428_v46, %s5197_s11  ;;  %v954_v9 = vrot.slane %v953_v41, 4  ;;  %v945_v47 = vsel %vm5286_vm2, %v940_v21, %v944_v43  ;;  %v4867_v43 = vld [vmem:[%s8022_s0 + $0x110] sm:$0xf] }
 0x118   :  { %1532 = vst.msk [vmem:[#allocation2 + $0x18] sm:$0xf] %vm1525_vm12, %v6094_v4  ;;  %v560_v55 = vpop.permute.xlu2 %559  ;;  %v900_v4 = vshll.u32 %v4828_v56, 16 }
 0x11a   :  { %473 = vrot.lane.b32.xlu0 %v442_v34, %s5197_s11  ;;  %v902_v37 = vrot.slane %v900_v4, 5  ;;  %v4891_v34 = vld [vmem:[%s8022_s0 + $0x68] sm:$0xf]  ;;  %v4864_v4 = vld [vmem:[%s8022_s0 + $0xf8] sm:$0xf] }
 0x11b   :  { %563 = vrot.lane.b32.xlu1 %v4784_v48, %s5196_s30  ;;  %v959_v48 = vsel %vm5286_vm2, %v954_v9, %v958_v45  ;;  %v1408_v50 = vshrl.u32 %v4891_v34, 16  ;;  %v1411_v51 = vshll.u32 %v4891_v34, 16  ;;  %v1473_v45 = vshll.u32 %v4900_v42, 16 }
 0x11c   :  { %v1492_v19 = vpop.permute.xlu0 %1491  ;;  %v903_v14 = vsel %vm5286_vm2, %v898_v7, %v902_v37  ;;  %v1450_v37 = vshrl.u32 %v4897_v63, 16 }
 0x11d   :  { %v1171_v59 = vpop.permute.xlu1 %1170  ;;  %v1413_v56 = vrot.slane %v1411_v51, 5 }
 0x11e   :  { %1212 = vst.msk [vmem:[#allocation2 + $0x1c] sm:$0xf] %vm1204_vm11, %v1171_v59  ;;  %v4892_v59 = vld [vmem:[%s8022_s0 + $0x6c] sm:$0x1] }
 0x11f   :  { %1533 = vst.msk [vmem:[#allocation2 + $0x1c] sm:$0xf] %vm1525_vm12, %v1492_v19  ;;  %661 = vrot.lane.b32.xlu2 %v4800_v0, %s5198_s23  ;;  %v1410_v19 = vrot.slane %v1408_v50, 4  ;;  %v1396_v0 = vrot.slane %v1394_v54, 4  ;;  %v1417_v7 = vshll.u32 %v4892_v59, 16 }
 0x120   :  { %v656_v8 = vpop.permute.xlu2 %655  ;;  %v64_v54 = vld [vmem:[%s8022_s0 + $0x60] sm:$0xf] }
 0x121   :  { %v1414_v61 = vor.u32 %v1413_v56, %v1410_v19  ;;  %81 = vst.msk [vmem:[#allocation2 + $0x2c] sm:$0xf] %vm69_vm4, %v64_v54 }
 0x122   :  { %569 = vrot.lane.b32.xlu0 %v4787_v3, %s5196_s30  ;;  %v4851_v3 = vld [vmem:[%s8022_s0 + $0x80] sm:$0xf] }
 0x123   :  { %659 = vrot.lane.b32.xlu1 %v4799_v5, %s5198_s23 }
 0x124   :  { %v460_v10 = vpop.permute.xlu0 %459 }
 0x125   :  { %v136_v12 = vpop.permute.xlu1 %135 }
 0x126   :  { %176 = vst.msk [vmem:[#allocation2 + $0x20] sm:$0xf] %vm167_vm5, %v136_v12  ;;  %v5112_v13 = vld [vmem:[#allocation2 + $0x18] sm:$0xff]  ;;  %v1405_v12 = vrot.slane %v1403_v6, 5 }
 0x127   :  { %500 = vst.msk [vmem:[#allocation2 + $0x20] sm:$0xf] %vm491_vm6, %v460_v10  ;;  %1693 = vmatmul.bf16.gmra.mxu0 %v5112_v13  ;;  %1806 = vmatmul.bf16.gmra.mxu1 %v5112_v13  ;;  %v4863_v10 = vld [vmem:[%s8022_s0 + $0xf0] sm:$0xf]  ;;  %v1415_v13 = vrot.slane %v1414_v61, 4 }
 0x128   :  { %980 = vrot.lane.b32.xlu2 %v889_v49, %s5199_s28  ;;  %v568_v26 = vpop.permute.xlu2 %567  ;;  %v1419_v49 = vrot.slane %v1417_v7, 5 }
 0x12a   :  { %982 = vrot.lane.b32.xlu0 %v903_v14, %s5199_s28  ;;  %v1452_v14 = vrot.slane %v1450_v37, 4  ;;  %v1420_v25 = vsel %vm5286_vm2, %v1415_v13, %v1419_v49 }
 0x12b   :  { %571 = vrot.lane.b32.xlu1 %v4788_v22, %s5196_s30 }
 0x12c   :  { %v146_v28 = vpop.permute.xlu0 %145 }
 0x12d   :  { %181 = vst.msk [vmem:[#allocation2 + $0x34] sm:$0xf] %vm167_vm5, %v146_v28  ;;  %v462_v32 = vpop.permute.xlu1 %461  ;;  %v1459_v28 = vshll.u32 %v4898_v60, 16 }
 0x12e   :  { %501 = vst.msk [vmem:[#allocation2 + $0x24] sm:$0xf] %vm491_vm6, %v462_v32 }
 0x12f   :  { %599 = vst.msk [vmem:[#allocation2 + $0x24] sm:$0xf] %vm589_vm7, %v560_v55  ;;  %v1397_v55 = vshll.u32 %v4889_v53, 16  ;;  %v1461_v33 = vrot.slane %v1459_v28, 5 }
 0x130   :  { %669 = vrot.lane.b32.xlu2 %v4804_v35, %s5198_s23 }
 0x131   :  { %v664_v44 = vpop.permute.xlu2 %663  ;;  %v1399_v1 = vrot.slane %v1397_v55, 5  ;;  %v68_v55 = vld [vmem:[%s8022_s0 + $0x80] sm:$0xf] }
 0x132   :  { %1078 = vrot.lane.b32.xlu0 %v4847_v40, %s5200_s27  ;;  %v1469_v40 = vrot.slane %v1467_v31, 5  ;;  %85 = vst.msk [vmem:[#allocation2 + $0x3c] sm:$0xf] %vm69_vm4, %v68_v55 }
 0x133   :  { %667 = vrot.lane.b32.xlu1 %v4803_v15, %s5198_s23  ;;  %v1400_v5 = vor.u32 %v1399_v1, %v1396_v0  ;;  %v4868_v15 = vld [vmem:[%s8022_s0 + $0x118] sm:$0xf] }
 0x134   :  { %v468_v46 = vpop.permute.xlu0 %467  ;;  %v1470_v9 = vor.u32 %v1469_v40, %v1466_v39  ;;  %v6378_v40 = vpop.f32.mrf.mxu0 }
 0x135   :  { %504 = vst.msk [vmem:[#allocation2 + $0x30] sm:$0xf] %vm491_vm6, %v468_v46  ;;  %v558_v30 = vpop.permute.xlu1 %557  ;;  %v1401_v11 = vrot.slane %v1400_v5, 4 }
 0x136   :  { %598 = vst.msk [vmem:[#allocation2 + $0x20] sm:$0xf] %vm589_vm7, %v558_v30  ;;  %v1471_v34 = vrot.slane %v1470_v9, 4  ;;  %v1475_v30 = vrot.slane %v1473_v45, 5 }
 0x137   :  { %696 = vst.msk [vmem:[#allocation2 + $0x20] sm:$0xf] %vm687_vm8, %v656_v8  ;;  %v1453_v8 = vshll.u32 %v4897_v63, 16  ;;  %v1406_v24 = vsel %vm5286_vm2, %v1401_v11, %v1405_v12 }
 0x138   :  { %988 = vrot.lane.b32.xlu2 %v945_v47, %s5199_s28  ;;  %v1476_v50 = vsel %vm5286_vm2, %v1471_v34, %v1475_v30 }
 0x139   :  { %v1077_v57 = vpop.permute.xlu2 %1076  ;;  %v1455_v17 = vrot.slane %v1453_v8, 5 }
 0x13a   :  { %990 = vrot.lane.b32.xlu0 %v959_v48, %s5199_s28  ;;  %v63_v48 = vld [vmem:[%s8022_s0 + $0x58] sm:$0xf] }
 0x13b   :  { %1080 = vrot.lane.b32.xlu1 %v4848_v52, %s5200_s27  ;;  %80 = vst.msk [vmem:[#allocation2 + $0x28] sm:$0xf] %vm69_vm4, %v63_v48 }
 0x13c   :  { %v658_v58 = vpop.permute.xlu0 %657 }
 0x13d   :  { %697 = vst.msk [vmem:[#allocation2 + $0x24] sm:$0xf] %vm687_vm8, %v658_v58  ;;  %v470_v27 = vpop.permute.xlu1 %469  ;;  %v67_v58 = vld [vmem:[%s8022_s0 + $0x78] sm:$0xf] }
 0x13e   :  { %505 = vst.msk [vmem:[#allocation2 + $0x34] sm:$0xf] %vm491_vm6, %v470_v27 }
 0x13f   :  { %603 = vst.msk [vmem:[#allocation2 + $0x34] sm:$0xf] %vm589_vm7, %v568_v26  ;;  %v1456_v26 = vor.u32 %v1455_v17, %v1452_v14 }
 0x140   :  { %1178 = vrot.lane.b32.xlu2 %v4864_v4, %s5201_s29  ;;  %84 = vst.msk [vmem:[#allocation2 + $0x38] sm:$0xf] %vm69_vm4, %v67_v58  ;;  %vm6758_vm4 = vmand %vm2179_vm15, %vm2242_vm3 }
 0x141   :  { %v1173_v20 = vpop.permute.xlu2 %1172  ;;  %v1457_v32 = vrot.slane %v1456_v26, 4 }
 0x142   :  { %1086 = vrot.lane.b32.xlu0 %v4851_v3, %s5200_s27 }
 0x143   :  { %1176 = vrot.lane.b32.xlu1 %v4863_v10, %s5201_s29  ;;  %v1462_v21 = vsel %vm5286_vm2, %v1457_v32, %v1461_v33 }
 0x144   :  { %v977_v22 = vpop.permute.xlu0 %976 }
 0x145   :  { %1017 = vst.msk [vmem:[#allocation2 + $0x20] sm:$0xf] %vm1008_vm9, %v977_v22  ;;  %v566_v23 = vpop.permute.xlu1 %565 }
 0x146   :  { %602 = vst.msk [vmem:[#allocation2 + $0x30] sm:$0xf] %vm589_vm7, %v566_v23 }
 0x147   :  { %700 = vst.msk [vmem:[#allocation2 + $0x30] sm:$0xf] %vm687_vm8, %v664_v44 }
 0x148   :  { %1497 = vrot.lane.b32.xlu2 %v1406_v24, %s5202_s19 }
 0x149   :  { %v1085_v35 = vpop.permute.xlu2 %1084 }
 0x14a   :  { %1499 = vrot.lane.b32.xlu0 %v1420_v25, %s5202_s19 }
 0x14b   :  { %1088 = vrot.lane.b32.xlu1 %v4852_v2, %s5200_s27 }
 0x14c   :  { %v666_v38 = vpop.permute.xlu0 %665 }
 0x14d   :  { %701 = vst.msk [vmem:[#allocation2 + $0x34] sm:$0xf] %vm687_vm8, %v666_v38  ;;  %v979_v41 = vpop.permute.xlu1 %978 }
 0x14e   :  { %1018 = vst.msk [vmem:[#allocation2 + $0x24] sm:$0xf] %vm1008_vm9, %v979_v41  ;;  %v6380_v41 = vpop.f32.mrf.mxu0 }
 0x14f   :  { %1116 = vst.msk [vmem:[#allocation2 + $0x24] sm:$0xf] %vm1106_vm10, %v1077_v57 }
 0x150   :  { %1186 = vrot.lane.b32.xlu2 %v4868_v15, %s5201_s29 }
 0x151   :  { %v1181_v44 = vpop.permute.xlu2 %1180 }
 0x152   :  { %1505 = vrot.lane.b32.xlu0 %v1462_v21, %s5202_s19 }
 0x153   :  { %1184 = vrot.lane.b32.xlu1 %v4867_v43, %s5201_s29  ;;  %v6388_v43 = vpop.f32.mrf.mxu1 }
 0x154   :  { %v985_v46 = vpop.permute.xlu0 %984 }
 0x155   :  { %1021 = vst.msk [vmem:[#allocation2 + $0x30] sm:$0xf] %vm1008_vm9, %v985_v46  ;;  %v1075_v47 = vpop.permute.xlu1 %1074 }
 0x156   :  { %1115 = vst.msk [vmem:[#allocation2 + $0x20] sm:$0xf] %vm1106_vm10, %v1075_v47  ;;  %v6382_v42 = vpop.f32.mrf.mxu0 }
 0x157   :  { %1213 = vst.msk [vmem:[#allocation2 + $0x20] sm:$0xf] %vm1204_vm11, %v1173_v20 }
 0x159   :  { %v1504_v51 = vpop.permute.xlu2 %1503 }
 0x15b   :  { %1507 = vrot.lane.b32.xlu1 %v1476_v50, %s5202_s19  ;;  %v6392_v45 = vpop.f32.mrf.mxu1 }
 0x15c   :  { %v1175_v52 = vpop.permute.xlu0 %1174 }
 0x15d   :  { %1214 = vst.msk [vmem:[#allocation2 + $0x24] sm:$0xf] %vm1204_vm11, %v1175_v52  ;;  %v987_v53 = vpop.permute.xlu1 %986  ;;  %v1995_v52 = vsel %vm1834_vm13, %v6378_v40, 0.0 }
 0x15e   :  { %1022 = vst.msk [vmem:[#allocation2 + $0x34] sm:$0xf] %vm1008_vm9, %v987_v53  ;;  %v6384_v15 = vpop.f32.mrf.mxu0  ;;  %v1998_v53 = vsel %vm1834_vm13, %v6382_v42, 0.0 }
 0x15f   :  { %1120 = vst.msk [vmem:[#allocation2 + $0x34] sm:$0xf] %vm1106_vm10, %v1085_v35 }
 0x161   :  { %v464_v19 = vpop.permute.xlu2 %463 }
 0x163   :  { %v6396_v46 = vpop.f32.mrf.mxu1 }
 0x164   :  { %v1494_v56 = vpop.permute.xlu0 %1493 }
 0x165   :  { %1534 = vst.msk [vmem:[#allocation2 + $0x20] sm:$0xf] %vm1525_vm12, %v1494_v56  ;;  %v1083_v57 = vpop.permute.xlu1 %1082 }
 0x166   :  { %1119 = vst.msk [vmem:[#allocation2 + $0x30] sm:$0xf] %vm1106_vm10, %v1083_v57 }
 0x167   :  { %1217 = vst.msk [vmem:[#allocation2 + $0x30] sm:$0xf] %vm1204_vm11, %v1181_v44 }
 0x169   :  { %v150_v59 = vpop.permute.xlu2 %149 }
 0x16a   :  { %183 = vst.msk [vmem:[#allocation2 + $0x3c] sm:$0xf] %vm167_vm5, %v150_v59 }
 0x16b   :  { %v6400_v30 = vpop.f32.mrf.mxu1 }
 0x16c   :  { %v1183_v63 = vpop.permute.xlu0 %1182 }
 0x16d   :  { %1218 = vst.msk [vmem:[#allocation2 + $0x34] sm:$0xf] %vm1204_vm11, %v1183_v63  ;;  %v1496_v0 = vpop.permute.xlu1 %1495 }
 0x16e   :  { %1535 = vst.msk [vmem:[#allocation2 + $0x24] sm:$0xf] %vm1525_vm12, %v1496_v0 }
 0x16f   :  { %1539 = vst.msk [vmem:[#allocation2 + $0x34] sm:$0xf] %vm1525_vm12, %v1504_v51  ;;  %v1996_v51 = vsel %vm1834_vm13, %v6380_v41, 0.0 }
 0x170   :  { %v1997_v54 = vadd.f32 %v1996_v51, %v1995_v52 }
 0x171   :  { %v472_v62 = vpop.permute.xlu2 %471 }
 0x172   :  { %v1999_v56 = vadd.f32 %v1998_v53, %v1997_v54  ;;  %v1840_v53 = vsel %vm1834_vm13, %v6400_v30, 0.0 }
 0x174   :  { %v140_v1 = vpop.permute.xlu0 %139 }
 0x175   :  { %178 = vst.msk [vmem:[#allocation2 + $0x28] sm:$0xf] %vm167_vm5, %v140_v1  ;;  %v1502_v27 = vpop.permute.xlu1 %1501  ;;  %v5113_v3 = vld [vmem:[#allocation2 + $0x20] sm:$0xff] }
 0x176   :  { %1538 = vst.msk [vmem:[#allocation2 + $0x30] sm:$0xf] %vm1525_vm12, %v1502_v27  ;;  %1698 = vmatmul.bf16.gmra.mxu0 %v5113_v3  ;;  %1811 = vmatmul.bf16.gmra.mxu1 %v5113_v3 }
 0x177   :  { %502 = vst.msk [vmem:[#allocation2 + $0x28] sm:$0xf] %vm491_vm6, %v464_v19  ;;  %v2000_v19 = vsel %vm1834_vm13, %v6384_v15, 0.0 }
 0x178   :  { %v2001_v58 = vadd.f32 %v2000_v19, %v1999_v56 }
 0x179   :  { %v662_v61 = vpop.permute.xlu2 %661 }
 0x17b   :  { %v6386_v21 = vpop.f32.mrf.mxu0  ;;  %v6404_v48 = vpop.f32.mrf.mxu1 }
 0x17c   :  { %v466_v4 = vpop.permute.xlu0 %465  ;;  %v2002_v57 = vsel %vm1834_vm13, %v6386_v21, 0.0  ;;  %v1842_v56 = vsel %vm1834_vm13, %v6404_v48, 0.0 }
 0x17d   :  { %v142_v5 = vpop.permute.xlu1 %141  ;;  %v5115_v6 = vld [vmem:[#allocation2 + $0x30] sm:$0xff]  ;;  %v2003_v1 = vadd.f32 %v2002_v57, %v2001_v58 }
 0x17e   :  { %179 = vst.msk [vmem:[#allocation2 + $0x2c] sm:$0xf] %vm167_vm5, %v142_v5  ;;  %1708 = vmatmul.bf16.vlgmr.msra.gmra.mxu3 %v5115_v6 }
 0x17f   :  { %503 = vst.msk [vmem:[#allocation2 + $0x2c] sm:$0xf] %vm491_vm6, %v466_v4 }
 0x182   :  { %v981_v10 = vpop.permute.xlu2 %980 }
 0x183   :  { %v6390_v9 = vpop.f32.mrf.mxu0  ;;  %v6414_v55 = vpop.f32.mrf.mxu1 }
 0x184   :  { %v562_v7 = vpop.permute.xlu0 %561  ;;  %v2004_v0 = vsel %vm1834_vm13, %v6390_v9, 0.0 }
 0x185   :  { %600 = vst.msk [vmem:[#allocation2 + $0x28] sm:$0xf] %vm589_vm7, %v562_v7  ;;  %v148_v37 = vpop.permute.xlu1 %147  ;;  %v2005_v3 = vadd.f32 %v2004_v0, %v2003_v1  ;;  %v1844_v1 = vsel %vm1834_vm13, %v6414_v55, 0.0 }
 0x186   :  { %182 = vst.msk [vmem:[#allocation2 + $0x38] sm:$0xf] %vm167_vm5, %v148_v37 }
 0x187   :  { %506 = vst.msk [vmem:[#allocation2 + $0x38] sm:$0xf] %vm491_vm6, %v472_v62 }
 0x18a   :  { %v670_v49 = vpop.permute.xlu2 %669 }
 0x18c   :  { %v474_v8 = vpop.permute.xlu0 %473 }
 0x18d   :  { %507 = vst.msk [vmem:[#allocation2 + $0x3c] sm:$0xf] %vm491_vm6, %v474_v8  ;;  %v564_v11 = vpop.permute.xlu1 %563 }
 0x18e   :  { %601 = vst.msk [vmem:[#allocation2 + $0x2c] sm:$0xf] %vm589_vm7, %v564_v11 }
 0x18f   :  { %699 = vst.msk [vmem:[#allocation2 + $0x2c] sm:$0xf] %vm687_vm8, %v662_v61 }
 0x192   :  { %v989_v20 = vpop.permute.xlu2 %988 }
 0x194   :  { %v570_v12 = vpop.permute.xlu0 %569 }
 0x195   :  { %604 = vst.msk [vmem:[#allocation2 + $0x38] sm:$0xf] %vm589_vm7, %v570_v12  ;;  %v660_v13 = vpop.permute.xlu1 %659 }
 0x196   :  { %698 = vst.msk [vmem:[#allocation2 + $0x28] sm:$0xf] %vm687_vm8, %v660_v13 }
 0x197   :  { %1019 = vst.msk [vmem:[#allocation2 + $0x28] sm:$0xf] %vm1008_vm9, %v981_v10 }
 0x19a   :  { %v1179_v23 = vpop.permute.xlu2 %1178 }
 0x19c   :  { %v983_v14 = vpop.permute.xlu0 %982 }
 0x19d   :  { %1020 = vst.msk [vmem:[#allocation2 + $0x2c] sm:$0xf] %vm1008_vm9, %v983_v14  ;;  %v572_v17 = vpop.permute.xlu1 %571 }
 0x19e   :  { %605 = vst.msk [vmem:[#allocation2 + $0x3c] sm:$0xf] %vm589_vm7, %v572_v17 }
 0x19f   :  { %703 = vst.msk [vmem:[#allocation2 + $0x3c] sm:$0xf] %vm687_vm8, %v670_v49 }
 0x1a2   :  { %v1498_v26 = vpop.permute.xlu2 %1497 }
 0x1a4   :  { %v1079_v22 = vpop.permute.xlu0 %1078  ;;  %v6394_v44 = vpop.f32.mrf.mxu0 }
 0x1a5   :  { %1117 = vst.msk [vmem:[#allocation2 + $0x28] sm:$0xf] %vm1106_vm10, %v1079_v22  ;;  %v668_v60 = vpop.permute.xlu1 %667  ;;  %v2006_v27 = vsel %vm1834_vm13, %v6394_v44, 0.0  ;;  %v6428_v62 = vpop.f32.mrf.mxu1 }
 0x1a6   :  { %702 = vst.msk [vmem:[#allocation2 + $0x38] sm:$0xf] %vm687_vm8, %v668_v60  ;;  %v2007_v5 = vadd.f32 %v2006_v27, %v2005_v3  ;;  %vm6887_vm8 = vmand %vm2169_vm14, %vm2242_vm3  ;;  %vm2579_vm3 = vcmask 1044032  }
 0x1a7   :  { %1023 = vst.msk [vmem:[#allocation2 + $0x38] sm:$0xf] %vm1008_vm9, %v989_v20 }
 0x1aa   :  { %v1187_v29 = vpop.permute.xlu2 %1186 }
 0x1ac   :  { %v991_v16 = vpop.permute.xlu0 %990  ;;  %v6398_v34 = vpop.f32.mrf.mxu0 }
 0x1ad   :  { %1024 = vst.msk [vmem:[#allocation2 + $0x3c] sm:$0xf] %vm1008_vm9, %v991_v16  ;;  %v1081_v24 = vpop.permute.xlu1 %1080  ;;  %v2008_v4 = vsel %vm1834_vm13, %v6398_v34, 0.0  ;;  %v6444_v49 = vpop.f32.mrf.mxu1  ;;  %vm3013_vm9 = vcmask 1042432  }
 0x1ae   :  { %1118 = vst.msk [vmem:[#allocation2 + $0x2c] sm:$0xf] %vm1106_vm10, %v1081_v24  ;;  %v2009_v61 = vadd.f32 %v2008_v4, %v2007_v5  ;;  %v1846_v5 = vsel %vm1834_vm13, %v6428_v62, 0.0 }
 0x1af   :  { %1216 = vst.msk [vmem:[#allocation2 + $0x2c] sm:$0xf] %vm1204_vm11, %v1179_v23 }
 0x1b4   :  { %v1087_v25 = vpop.permute.xlu0 %1086 }
 0x1b5   :  { %1121 = vst.msk [vmem:[#allocation2 + $0x38] sm:$0xf] %vm1106_vm10, %v1087_v25  ;;  %v1177_v28 = vpop.permute.xlu1 %1176 }
 0x1b6   :  { %1215 = vst.msk [vmem:[#allocation2 + $0x28] sm:$0xf] %vm1204_vm11, %v1177_v28 }
 0x1b7   :  { %1536 = vst.msk [vmem:[#allocation2 + $0x28] sm:$0xf] %vm1525_vm12, %v1498_v26 }
 0x1bc   :  { %v1500_v2 = vpop.permute.xlu0 %1499 }
 0x1bd   :  { %1537 = vst.msk [vmem:[#allocation2 + $0x2c] sm:$0xf] %vm1525_vm12, %v1500_v2  ;;  %v1089_v31 = vpop.permute.xlu1 %1088 }
 0x1be   :  { %1122 = vst.msk [vmem:[#allocation2 + $0x3c] sm:$0xf] %vm1106_vm10, %v1089_v31  ;;  %vm3014_vm10 = vcmask 1046532  }
 0x1bf   :  { %1220 = vst.msk [vmem:[#allocation2 + $0x3c] sm:$0xf] %vm1204_vm11, %v1187_v29 }
 0x1c4   :  { %v5114_v32 = vld [vmem:[#allocation2 + $0x28] sm:$0xff]  ;;  %v1506_v33 = vpop.permute.xlu0 %1505 }
 0x1c5   :  { %v1185_v35 = vpop.permute.xlu1 %1184  ;;  %1703 = vmatmul.bf16.gmra.mxu0 %v5114_v32  ;;  %1816 = vmatmul.bf16.gmra.mxu1 %v5114_v32  ;;  %v1836_v32 = vsel %vm1834_vm13, %v6392_v45, 0.0 }
 0x1c6   :  { %1219 = vst.msk [vmem:[#allocation2 + $0x38] sm:$0xf] %vm1204_vm11, %v1185_v35  ;;  %vm7003_vm11 = vmor %vm3013_vm9, %vm3014_vm10  ;;  %vm3739_vm9 = vcmask 388416   ;;  %vm3837_vm10 = vcmask 454016  }
 0x1c7   :  { %1540 = vst.msk [vmem:[#allocation2 + $0x38] sm:$0xf] %vm1525_vm12, %v1506_v33 }
 0x1cd   :  { %v1508_v38 = vpop.permute.xlu1 %1507 }
 0x1ce   :  { %1541 = vst.msk [vmem:[#allocation2 + $0x3c] sm:$0xf] %vm1525_vm12, %v1508_v38  ;;  %v1835_v38 = vsel %vm1834_vm13, %v6388_v43, 0.0 }
 0x1cf   :  { %v1837_v52 = vadd.f32 %v1836_v32, %v1835_v38 }
 0x1d5   :  { %v5116_v39 = vld [vmem:[#allocation2 + $0x38] sm:$0xff] }
 0x1d6   :  { %1713 = vmatmul.bf16.gmra.mxu3 %v5116_v39 }
 0x1e6   :  { %1821 = vmatmul.bf16.vlgmr.msrb.gmra.mxu3 %v5115_v6 }
 0x1f3   :  { %v6402_v47 = vpop.f32.mrf.mxu0  ;;  %v6450_v23 = vpop.f32.mrf.mxu1 }
 0x1f4   :  { %v2010_v6 = vsel %vm1834_vm13, %v6402_v47, 0.0 }
 0x1f5   :  { %v2011_v37 = vadd.f32 %v2010_v6, %v2009_v61 }
 0x1f6   :  { %1826 = vmatmul.bf16.gmra.mxu3 %v5116_v39  ;;  %v1838_v39 = vsel %vm1834_vm13, %v6396_v46, 0.0 }
 0x1f7   :  { %v1839_v19 = vadd.f32 %v1838_v39, %v1837_v52 }
 0x1f9   :  { %v1841_v0 = vadd.f32 %v1840_v53, %v1839_v19 }
 0x1fb   :  { %v6406_v50 = vpop.f32.mrf.mxu0  ;;  %v6462_v33 = vpop.f32.mrf.mxu1  ;;  %v1843_v4 = vadd.f32 %v1842_v56, %v1841_v0 }
 0x1fc   :  { %v2012_v7 = vsel %vm1834_vm13, %v6406_v50, 0.0 }
 0x1fd   :  { %v2013_v12 = vadd.f32 %v2012_v7, %v2011_v37  ;;  %v1845_v61 = vadd.f32 %v1844_v1, %v1843_v4  ;;  %v1848_v7 = vsel %vm1834_vm13, %v6444_v49, 0.0 }
 0x201   :  { %v6420_v59 = vpop.f32.mrf.mxu3 }
 0x202   :  { %v2018_v22 = vsel %vm1834_vm13, %v6420_v59, 0.0 }
 0x209   :  { %v6436_v8 = vpop.f32.mrf.mxu3 }
 0x20a   :  { %v2020_v16 = vsel %vm1834_vm13, %v6436_v8, 0.0 }
 0x242   :  { %v6422_v63 = vpop.f32.mrf.mxu0  ;;  %v6476_v27 = vpop.f32.mrf.mxu1 }
 0x243   :  { %v2014_v11 = vsel %vm1834_vm13, %v6422_v63, 0.0 }
 0x244   :  { %v2015_v14 = vadd.f32 %v2014_v11, %v2013_v12  ;;  %v1847_v12 = vadd.f32 %v1846_v5, %v1845_v61 }
 0x24a   :  { %v6438_v10 = vpop.f32.mrf.mxu0 }
 0x24b   :  { %v2016_v13 = vsel %vm1834_vm13, %v6438_v10, 0.0 }
 0x24c   :  { %v2017_v17 = vadd.f32 %v2016_v13, %v2015_v14  ;;  %v1850_v13 = vsel %vm1834_vm13, %v6450_v23, 0.0 }
 0x24e   :  { %v2019_v60 = vadd.f32 %v2018_v22, %v2017_v17  ;;  %v1849_v22 = vadd.f32 %v1848_v7, %v1847_v12 }
 0x250   :  { %v2021_v25 = vadd.f32 %v2020_v16, %v2019_v60  ;;  %v1852_v60 = vsel %vm1834_vm13, %v6462_v33, 0.0 }
 0x259   :  { %v6446_v20 = vpop.f32.mrf.mxu3 }
 0x25a   :  { %v2022_v24 = vsel %vm1834_vm13, %v6446_v20, 0.0 }
 0x25b   :  { %v2023_v26 = vadd.f32 %v2022_v24, %v2021_v25  ;;  %v1851_v24 = vadd.f32 %v1850_v13, %v1849_v22  ;;  %v6510_v25 = vpop.f32.mrf.mxu1 }
 0x261   :  { %v6456_v28 = vpop.f32.mrf.mxu3 }
 0x262   :  { %v2024_v2 = vsel %vm1834_vm13, %v6456_v28, 0.0 }
 0x263   :  { %v2025_v29 = vadd.f32 %v2024_v2, %v2023_v26  ;;  %v1853_v2 = vadd.f32 %v1852_v60, %v1851_v24 }
 0x265   :  { %v2026_v31 = vrot.slane %v2025_v29, 4 }
 0x267   :  { %v2027_v35 = vadd.f32 %v2026_v31, %v2025_v29 }
 0x269   :  { %v2028_v51 = vrot.slane %v2027_v35, 2  ;;  %v6472_v58 = vpop.f32.mrf.mxu3 }
 0x26a   :  { %v1858_v19 = vsel %vm1834_vm13, %v6472_v58, 0.0 }
 0x26b   :  { %v2029_v54 = vadd.f32 %v2028_v51, %v2027_v35 }
 0x26d   :  { %v2030_v57 = vrot.slane %v2029_v54, 1 }
 0x26f   :  { %v2031_v3 = vadd.f32 %v2030_v57, %v2029_v54 }
 0x271   :  { %v6480_v6 = vmul.f32 0.0078125, %v2031_v3  ;;  %v6498_v17 = vpop.f32.mrf.mxu3 }
 0x272   :  { %v1860_v3 = vsel %vm1834_vm13, %v6498_v17, 0.0 }
 0x273   :  { %v6486_v37 = vsub.f32 %v6378_v40, %v6480_v6  ;;  %v6490_v11 = vsub.f32 %v6380_v41, %v6480_v6  ;;  %v6496_v14 = vsub.f32 %v6382_v42, %v6480_v6  ;;  %v6504_v40 = vsub.f32 %v6384_v15, %v6480_v6 }
 0x274   :  { %v6514_v42 = vsub.f32 %v6386_v21, %v6480_v6  ;;  %v1854_v15 = vsel %vm1834_vm13, %v6476_v27, 0.0  ;;  %v6522_v29 = vsub.f32 %v6390_v9, %v6480_v6  ;;  %v1856_v21 = vsel %vm1834_vm13, %v6510_v25, 0.0 }
 0x275   :  { %v2049_v41 = vmul.f32 %v6486_v37, %v6486_v37  ;;  %v2050_v16 = vmul.f32 %v6490_v11, %v6490_v11  ;;  %v2051_v26 = vmul.f32 %v6496_v14, %v6496_v14  ;;  %v2052_v31 = vmul.f32 %v6504_v40, %v6504_v40 }
 0x276   :  { %v1855_v39 = vadd.f32 %v1854_v15, %v1853_v2  ;;  %v6532_v51 = vsub.f32 %v6394_v44, %v6480_v6  ;;  %v2053_v9 = vmul.f32 %v6514_v42, %v6514_v42  ;;  %v6543_v57 = vsub.f32 %v6398_v34, %v6480_v6 }
 0x277   :  { %v2065_v32 = vsel %vm1834_vm13, %v2049_v41, 0.0  ;;  %v2066_v35 = vsel %vm1834_vm13, %v2050_v16, 0.0  ;;  %v2068_v52 = vsel %vm1834_vm13, %v2051_v26, 0.0  ;;  %v2054_v44 = vmul.f32 %v6522_v29, %v6522_v29 }
 0x278   :  { %v2067_v38 = vadd.f32 %v2066_v35, %v2065_v32  ;;  %v1857_v56 = vadd.f32 %v1856_v21, %v1855_v39  ;;  %v2070_v0 = vsel %vm1834_vm13, %v2052_v31, 0.0  ;;  %v6552_v4 = vsub.f32 %v6402_v47, %v6480_v6 }
 0x279   :  { %v6537_v53 = vpop.f32.mrf.mxu3  ;;  %v2055_v5 = vmul.f32 %v6532_v51, %v6532_v51  ;;  %v2072_v61 = vsel %vm1834_vm13, %v2053_v9, 0.0  ;;  %v6561_v13 = vsub.f32 %v6406_v50, %v6480_v6  ;;  %v2056_v22 = vmul.f32 %v6543_v57, %v6543_v57 }
 0x27a   :  { %v2069_v54 = vadd.f32 %v2068_v52, %v2067_v38  ;;  %v1859_v34 = vadd.f32 %v1858_v19, %v1857_v56  ;;  %v1862_v12 = vsel %vm1834_vm13, %v6537_v53, 0.0  ;;  %v2074_v47 = vsel %vm1834_vm13, %v2054_v44, 0.0 }
 0x27b   :  { %v6568_v16 = vsub.f32 %v6422_v63, %v6480_v6  ;;  %v2057_v24 = vmul.f32 %v6552_v4, %v6552_v4  ;;  %v2076_v26 = vsel %vm1834_vm13, %v2055_v5, 0.0  ;;  %v6579_v32 = vsub.f32 %v6438_v10, %v6480_v6 }
 0x27c   :  { %v2071_v1 = vadd.f32 %v2070_v0, %v2069_v54  ;;  %v1861_v60 = vadd.f32 %v1860_v3, %v1859_v34  ;;  %v2058_v63 = vmul.f32 %v6561_v13, %v6561_v13  ;;  %v2078_v35 = vsel %vm1834_vm13, %v2056_v22, 0.0 }
 0x27d   :  { %v6586_v39 = vsub.f32 %v6420_v59, %v6480_v6  ;;  %v2059_v9 = vmul.f32 %v6568_v16, %v6568_v16  ;;  %v2080_v52 = vsel %vm1834_vm13, %v2057_v24, 0.0  ;;  %v6593_v10 = vsub.f32 %v6436_v8, %v6480_v6 }
 0x27e   :  { %v2073_v7 = vadd.f32 %v2072_v61, %v2071_v1  ;;  %v1863_v2 = vadd.f32 %v1862_v12, %v1861_v60  ;;  %v2060_v56 = vmul.f32 %v6579_v32, %v6579_v32  ;;  %v2082_v44 = vsel %vm1834_vm13, %v2058_v63, 0.0 }
 0x27f   :  { %v6600_v59 = vsub.f32 %v6446_v20, %v6480_v6  ;;  %v2061_v3 = vmul.f32 %v6586_v39, %v6586_v39  ;;  %v2084_v5 = vsel %vm1834_vm13, %v2059_v9, 0.0  ;;  %v6607_v8 = vsub.f32 %v6456_v28, %v6480_v6 }
 0x280   :  { %v2075_v41 = vadd.f32 %v2074_v47, %v2073_v7  ;;  %v2062_v7 = vmul.f32 %v6593_v10, %v6593_v10  ;;  %v2086_v12 = vsel %vm1834_vm13, %v2060_v56, 0.0 }
 0x281   :  { %v6573_v15 = vpop.f32.mrf.mxu3  ;;  %v2063_v20 = vmul.f32 %v6600_v59, %v6600_v59  ;;  %v2088_v60 = vsel %vm1834_vm13, %v2061_v3, 0.0 }
 0x282   :  { %v2077_v50 = vadd.f32 %v2076_v26, %v2075_v41  ;;  %v1864_v31 = vsel %vm1834_vm13, %v6573_v15, 0.0  ;;  %v2064_v26 = vmul.f32 %v6607_v8, %v6607_v8  ;;  %v2090_v28 = vsel %vm1834_vm13, %v2062_v7, 0.0 }
 0x283   :  { %v1865_v21 = vadd.f32 %v1864_v31, %v1863_v2 }
 0x284   :  { %v2079_v38 = vadd.f32 %v2078_v35, %v2077_v50  ;;  %v2092_v50 = vsel %vm1834_vm13, %v2063_v20, 0.0  ;;  %v2094_v35 = vsel %vm1834_vm13, %v2064_v26, 0.0 }
 0x285   :  { %v1866_v54 = vrot.slane %v1865_v21, 4 }
 0x286   :  { %v2081_v19 = vadd.f32 %v2080_v52, %v2079_v38 }
 0x287   :  { %v1867_v0 = vadd.f32 %v1866_v54, %v1865_v21 }
 0x288   :  { %v2083_v1 = vadd.f32 %v2082_v44, %v2081_v19 }
 0x289   :  { %v1868_v61 = vrot.slane %v1867_v0, 2 }
 0x28a   :  { %v2085_v34 = vadd.f32 %v2084_v5, %v2083_v1 }
 0x28b   :  { %v1869_v22 = vadd.f32 %v1868_v61, %v1867_v0 }
 0x28c   :  { %v2087_v47 = vadd.f32 %v2086_v12, %v2085_v34 }
 0x28d   :  { %v1870_v41 = vrot.slane %v1869_v22, 1 }
 0x28e   :  { %v2089_v24 = vadd.f32 %v2088_v60, %v2087_v47 }
 0x28f   :  { %v1871_v6 = vadd.f32 %v1870_v41, %v1869_v22 }
 0x290   :  { %v2091_v2 = vadd.f32 %v2090_v28, %v2089_v24 }
 0x291   :  { %v6619_v31 = vmul.f32 0.0078125, %v1871_v6 }
 0x292   :  { %v2093_v63 = vadd.f32 %v2092_v50, %v2091_v2 }
 0x293   :  { %v6624_v38 = vsub.f32 %v6388_v43, %v6619_v31  ;;  %v6628_v9 = vsub.f32 %v6392_v45, %v6619_v31  ;;  %v6632_v54 = vsub.f32 %v6396_v46, %v6619_v31  ;;  %v6638_v56 = vsub.f32 %v6400_v30, %v6619_v31 }
 0x294   :  { %v2095_v21 = vadd.f32 %v2094_v35, %v2093_v63  ;;  %v6650_v44 = vsub.f32 %v6404_v48, %v6619_v31  ;;  %v6658_v0 = vsub.f32 %v6414_v55, %v6619_v31  ;;  %v6672_v55 = vsub.f32 %v6428_v62, %v6619_v31 }
 0x295   :  { %v1889_v43 = vmul.f32 %v6624_v38, %v6624_v38  ;;  %v1890_v45 = vmul.f32 %v6628_v9, %v6628_v9  ;;  %v1891_v30 = vmul.f32 %v6632_v54, %v6632_v54  ;;  %v1892_v3 = vmul.f32 %v6638_v56, %v6638_v56 }
 0x296   :  { %v2096_v52 = vrot.slane %v2095_v21, 4  ;;  %v1893_v7 = vmul.f32 %v6650_v44, %v6650_v44  ;;  %v6681_v20 = vsub.f32 %v6444_v49, %v6619_v31  ;;  %v1894_v60 = vmul.f32 %v6658_v0, %v6658_v0 }
 0x297   :  { %v1905_v48 = vsel %vm1834_vm13, %v1889_v43, 0.0  ;;  %v1906_v5 = vsel %vm1834_vm13, %v1890_v45, 0.0  ;;  %v1908_v12 = vsel %vm1834_vm13, %v1891_v30, 0.0  ;;  %v1910_v62 = vsel %vm1834_vm13, %v1892_v3, 0.0  ;;  %v2215_v43 = vld [vmem:[#allocation4 + $0x58] sm:$0x1] }
 0x298   :  { %v2097_v19 = vadd.f32 %v2096_v52, %v2095_v21  ;;  %v1907_v61 = vadd.f32 %v1906_v5, %v1905_v48  ;;  %v6688_v26 = vsub.f32 %v6450_v23, %v6619_v31  ;;  %v1895_v28 = vmul.f32 %v6672_v55, %v6672_v55  ;;  %v2218_v45 = vld [vmem:[#allocation4 + $0x60] sm:$0x1] }
 0x299   :  { %v1912_v6 = vsel %vm1834_vm13, %v1893_v7, 0.0  ;;  %v6695_v49 = vsub.f32 %v6462_v33, %v6619_v31  ;;  %v1896_v63 = vmul.f32 %v6681_v20, %v6681_v20  ;;  %v1914_v23 = vsel %vm1834_vm13, %v1894_v60, 0.0  ;;  %v2227_v7 = vld [vmem:[#allocation4 + $0x78] sm:$0x1] }
 0x29a   :  { %v2098_v46 = vrot.slane %v2097_v19, 2  ;;  %v1909_v22 = vadd.f32 %v1908_v12, %v1907_v61  ;;  %8040 = vst [vmem:[#allocation5_spill] sm:$0xff] %v6688_v26  ;;  %v6704_v35 = vsub.f32 %v6476_v27, %v6619_v31  ;;  %v1897_v33 = vmul.f32 %v6688_v26, %v6688_v26  ;;  %v2224_v61 = vld [vmem:[#allocation4 + $0x70] sm:$0x1] }
 0x29b   :  { %v6717_v27 = vsub.f32 %v6510_v25, %v6619_v31  ;;  %v1898_v30 = vmul.f32 %v6695_v49, %v6695_v49  ;;  %v2216_v3 = vsel %vm6708_vm1, 0, %v2215_v43  ;;  %v2219_v48 = vsel %vm6708_vm1, 0, %v2218_v45 }
 0x29c   :  { %v2099_v1 = vadd.f32 %v2098_v46, %v2097_v19  ;;  %v1911_v41 = vadd.f32 %v1910_v62, %v1909_v22  ;;  %v1916_v19 = vsel %vm1834_vm13, %v1895_v28, 0.0  ;;  %v2221_v46 = vld [vmem:[#allocation4 + $0x68] sm:$0x1]  ;;  %2217 = vst [vmem:[#allocation4 + $0x58] sm:$0x1] %v2216_v3  ;;  %v2225_v25 = vsel %vm6708_vm1, 0, %v2224_v61 }
 0x29d   :  { %8043 = vst [vmem:[#allocation6_spill] sm:$0xff] %v6717_v27  ;;  %v2222_v5 = vsel %vm6708_vm1, 0, %v2221_v46  ;;  %v2228_v22 = vsel %vm6708_vm1, 0, %v2227_v7  ;;  %v6734_v60 = vsub.f32 %v6472_v58, %v6619_v31  ;;  %v1899_v62 = vmul.f32 %v6704_v35, %v6704_v35  ;;  %v2233_v28 = vld [vmem:[#allocation4 + $0x88] sm:$0x1] }
 0x29e   :  { %v2100_v34 = vrot.slane %v2099_v1, 1  ;;  %v1913_v2 = vadd.f32 %v1912_v6, %v1911_v41  ;;  %2220 = vst [vmem:[#allocation4 + $0x60] sm:$0x1] %v2219_v48  ;;  %v1920_v41 = vsel %vm1834_vm13, %v1897_v33, 0.0  ;;  %v6747_v58 = vsub.f32 %v6498_v17, %v6619_v31  ;;  %v2265_v17 = vld [vmem:[#allocation4 + $0x3c] sm:$0x1] }
 0x29f   :  { %2223 = vst [vmem:[#allocation4 + $0x68] sm:$0x1] %v2222_v5  ;;  %v1922_v33 = vsel %vm1834_vm13, %v1898_v30, 0.0  ;;  %v2268_v30 = vld [vmem:[#allocation4 + $0x44] sm:$0x1]  ;;  %v6766_v3 = vsub.f32 %v6537_v53, %v6619_v31  ;;  %v1901_v48 = vmul.f32 %v6734_v60, %v6734_v60  ;;  %v1924_v5 = vsel %vm1834_vm13, %v1899_v62, 0.0 }
 0x2a0   :  { %v2101_v47 = vadd.f32 %v2100_v34, %v2099_v1  ;;  %v1915_v21 = vadd.f32 %v1914_v23, %v1913_v2  ;;  %v1918_v34 = vsel %vm1834_vm13, %v1896_v63, 0.0  ;;  %2226 = vst [vmem:[#allocation4 + $0x70] sm:$0x1] %v2225_v25  ;;  %v2234_v63 = vsel %vm6708_vm1, 0, %v2233_v28  ;;  %v2236_v23 = vld [vmem:[#allocation4 + $0x90] sm:$0x1] }
 0x2a1   :  { %2229 = vst [vmem:[#allocation4 + $0x78] sm:$0x1] %v2228_v22  ;;  %v2237_v43 = vsel %vm6708_vm1, 0, %v2236_v23  ;;  %v2277_v25 = vld [vmem:[#allocation4 + $0x5c] sm:$0x1]  ;;  %v1902_v53 = vmul.f32 %v6747_v58, %v6747_v58  ;;  %v1903_v23 = vmul.f32 %v6766_v3, %v6766_v3 }
 0x2a2   :  { %v2102_v24 = vmul.f32 0.0078125, %v2101_v47  ;;  %v1917_v1 = vadd.f32 %v1916_v19, %v1915_v21  ;;  %v2230_v47 = vld [vmem:[#allocation4 + $0x80] sm:$0x1]  ;;  %v1900_v21 = vmul.f32 %v6717_v27, %v6717_v27  ;;  %2235 = vst [vmem:[#allocation4 + $0x88] sm:$0x1] %v2234_v63 }
 0x2a3   :  { %2238 = vst [vmem:[#allocation4 + $0x90] sm:$0x1] %v2237_v43  ;;  %v2280_v22 = vld [vmem:[#allocation4 + $0x64] sm:$0x1]  ;;  %v2286_v63 = vld [vmem:[#allocation4 + $0x74] sm:$0x1] }
 0x2a4   :  { %v6697_v50 = vadd.f32 1e-05, %v2102_v24  ;;  %v1919_v12 = vadd.f32 %v1918_v34, %v1917_v1  ;;  %v2231_v24 = vsel %vm6708_vm1, 0, %v2230_v47  ;;  %v2266_v1 = vsel %vm6758_vm4, 0, %v2265_v17  ;;  %v2289_v17 = vld [vmem:[#allocation4 + $0x7c] sm:$0x1] }
 0x2a5   :  { %2232 = vst [vmem:[#allocation4 + $0x80] sm:$0x1] %v2231_v24  ;;  %v2269_v34 = vsel %vm6758_vm4, 0, %v2268_v30  ;;  %v1926_v47 = vsel %vm1834_vm13, %v1900_v21, 0.0  ;;  %v2281_v62 = vsel %vm6758_vm4, 0, %v2280_v22  ;;  %v2287_v43 = vsel %vm6758_vm4, 0, %v2286_v63 }
 0x2a6   :  { %5189 = vrsqrt.f32 %v6697_v50  ;;  %v1921_v6 = vadd.f32 %v1920_v41, %v1919_v12  ;;  %v2278_v12 = vsel %vm6758_vm4, 0, %v2277_v25  ;;  %2267 = vst [vmem:[#allocation4 + $0x3c] sm:$0x1] %v2266_v1  ;;  %v2283_v24 = vld [vmem:[#allocation4 + $0x6c] sm:$0x1]  ;;  %v2290_v1 = vsel %vm6758_vm4, 0, %v2289_v17 }
 0x2a7   :  { %2270 = vst [vmem:[#allocation4 + $0x44] sm:$0x1] %v2269_v34  ;;  %v1993_v21 = vld [vmem:[%s8027_s2] sm:$0x1]  ;;  %v2292_v30 = vld [vmem:[#allocation4 + $0x84] sm:$0x1]  ;;  %vm2110_vm6 = vweird.f32 %v6697_v50  ;;  %v6817_v63 = vsub.f32 %v6573_v15, %v6619_v31 }
 0x2a8   :  { %v1923_v46 = vadd.f32 %v1922_v33, %v1921_v6  ;;  %v2284_v6 = vsel %vm6758_vm4, 0, %v2283_v24  ;;  %v1928_v33 = vsel %vm1834_vm13, %v1901_v48, 0.0  ;;  %2279 = vst [vmem:[#allocation4 + $0x5c] sm:$0x1] %v2278_v12  ;;  %v1930_v48 = vsel %vm1834_vm13, %v1902_v53, 0.0 }
 0x2a9   :  { %2282 = vst [vmem:[#allocation4 + $0x64] sm:$0x1] %v2281_v62  ;;  %v2295_v34 = vld [vmem:[#allocation4 + $0x8c] sm:$0x1]  ;;  %v2298_v12 = vld [vmem:[#allocation4 + $0x94] sm:$0x1] }
 0x2aa   :  { %v1925_v7 = vadd.f32 %v1924_v5, %v1923_v46  ;;  %2285 = vst [vmem:[#allocation4 + $0x6c] sm:$0x1] %v2284_v6  ;;  %v1932_v22 = vsel %vm1834_vm13, %v1903_v23, 0.0 }
 0x2ab   :  { %2288 = vst [vmem:[#allocation4 + $0x74] sm:$0x1] %v2287_v43 }
 0x2ac   :  { %v6741_v2 = vpop.eup %5189  ;;  %v1927_v28 = vadd.f32 %v1926_v47, %v1925_v7  ;;  %v2296_v7 = vsel %vm6758_vm4, 0, %v2295_v34  ;;  %2291 = vst [vmem:[#allocation4 + $0x7c] sm:$0x1] %v2290_v1 }
 0x2ad   :  { %v2105_v19 = vmul.f32 %v6741_v2, %v6697_v50  ;;  %vm2111_vm5 = vweird.f32 %v6741_v2  ;;  %v2299_v50 = vsel %vm6758_vm4, 0, %v2298_v12  ;;  %2297 = vst [vmem:[#allocation4 + $0x8c] sm:$0x1] %v2296_v7 }
 0x2ae   :  { %v1929_v46 = vadd.f32 %v1928_v33, %v1927_v28  ;;  %vm2112_vm7 = vmor %vm2110_vm6, %vm2111_vm5  ;;  %2300 = vst [vmem:[#allocation4 + $0x94] sm:$0x1] %v2299_v50  ;;  %v6811_v28 = vld [vmem:[%s8025_s3] ss:$0 sm:$0xff]  ;;  %vm2932_vm5 = vcmask 126016   ;;  %vm3128_vm6 = vcmask 191616  }
 0x2af   :  { %v2106_v61 = vmul.f32 %v6741_v2, %v2105_v19  ;;  %8046 = vst [vmem:[#allocation7_spill] sm:$0xff] %v6817_v63 }
 0x2b0   :  { %v1931_v25 = vadd.f32 %v1930_v48, %v1929_v46 }
 0x2b1   :  { %v2107_v41 = vmul.f32 0.5, %v2106_v61  ;;  %v2293_v61 = vsel %vm6758_vm4, 0, %v2292_v30 }
 0x2b2   :  { %v1933_v47 = vadd.f32 %v1932_v22, %v1931_v25  ;;  %2294 = vst [vmem:[#allocation4 + $0x84] sm:$0x1] %v2293_v61 }
 0x2b3   :  { %v2108_v19 = vsub.f32 1.5, %v2107_v41 }
 0x2b5   :  { %v2109_v5 = vmul.f32 %v6741_v2, %v2108_v19 }
 0x2b7   :  { %v2113_v53 = vsel %vm2112_vm7, %v6741_v2, %v2109_v5  ;;  %vm3225_vm7 = vcmask 257216  }
 0x2b8   :  { %v2114_v41 = vmul.f32 %v2113_v53, %v1993_v21 }
 0x2ba   :  { %v2116_v62 = vperm.slane %v2114_v41, 0 }
 0x2bc   :  { %v2124_v24 = vmul.f32 %v2116_v62, %v6532_v51  ;;  %v2125_v6 = vmul.f32 %v2116_v62, %v6543_v57  ;;  %v2126_v2 = vmul.f32 %v2116_v62, %v6552_v4  ;;  %v2127_v23 = vmul.f32 %v2116_v62, %v6561_v13 }
 0x2bd   :  { %v2128_v51 = vmul.f32 %v2116_v62, %v6568_v16  ;;  %v2129_v19 = vmul.f32 %v2116_v62, %v6579_v32  ;;  %v1904_v57 = vmul.f32 %v6817_v63, %v6817_v63  ;;  %v2130_v15 = vmul.f32 %v2116_v62, %v6586_v39 }
 0x2be   :  { %v2143_v33 = vadd.f32 %v6811_v28, %v2124_v24  ;;  %v2144_v21 = vadd.f32 %v6811_v28, %v2125_v6  ;;  %v2145_v43 = vadd.f32 %v6811_v28, %v2126_v2  ;;  %v2146_v4 = vadd.f32 %v6811_v28, %v2127_v23 }
 0x2bf   :  { %v2131_v13 = vmul.f32 %v2116_v62, %v6593_v10  ;;  %v2132_v17 = vmul.f32 %v2116_v62, %v6600_v59  ;;  %v2147_v1 = vadd.f32 %v6811_v28, %v2128_v51  ;;  %v2148_v16 = vadd.f32 %v6811_v28, %v2129_v19 }
 0x2c0   :  { %v2159_v31 = vmax.f32 %v2143_v33, 0.0  ;;  %v2160_v46 = vmax.f32 %v2144_v21, 0.0  ;;  %v2161_v32 = vmax.f32 %v2145_v43, 0.0  ;;  %v1934_v30 = vsel %vm1834_vm13, %v1904_v57, 0.0 }
 0x2c1   :  { %v2133_v48 = vmul.f32 %v2116_v62, %v6607_v8  ;;  %v2162_v5 = vmax.f32 %v2146_v4, 0.0  ;;  %v6835_v61 = vadd.f32 %v1934_v30, %v1933_v47  ;;  %v2149_v39 = vadd.f32 %v6811_v28, %v2130_v15 }
 0x2c2   :  { %v6838_v34 = vpack.c.bf16 %v2159_v31, %v2159_v31  ;;  %v2150_v10 = vadd.f32 %v6811_v28, %v2131_v13  ;;  %v2151_v59 = vadd.f32 %v6811_v28, %v2132_v17  ;;  %v6842_v25 = vpack.c.bf16 %v2160_v46, %v2160_v46 }
 0x2c3   :  { %v2163_v7 = vmax.f32 %v2147_v1, 0.0  ;;  %v2164_v12 = vmax.f32 %v2148_v16, 0.0  ;;  %v2312_v22 = vpack.c.bf16 %v2161_v32, %v2161_v32  ;;  %v2152_v53 = vadd.f32 %v6811_v28, %v2133_v48 }
 0x2c4   :  { %v2313_v50 = vpack.c.bf16 %v2162_v5, %v2162_v5  ;;  %v2118_v47 = vmul.f32 %v2116_v62, %v6486_v37  ;;  %v2119_v41 = vmul.f32 %v2116_v62, %v6490_v11  ;;  %v2165_v24 = vmax.f32 %v2149_v39, 0.0 }
 0x2c5   :  { %v2369_v6 = vshrl.u32 %v6838_v34, 16  ;;  %v2121_v2 = vmul.f32 %v2116_v62, %v6504_v40  ;;  %v2166_v23 = vmax.f32 %v2150_v10, 0.0  ;;  %v2167_v33 = vmax.f32 %v2151_v59, 0.0 }
 0x2c6   :  { %v2377_v21 = vshrl.u32 %v6842_v25, 16  ;;  %v6852_v51 = vmul.f32 %v2116_v62, %v6496_v14  ;;  %v2314_v19 = vpack.c.bf16 %v2163_v7, %v2163_v7  ;;  %v2315_v43 = vpack.c.bf16 %v2164_v12, %v2164_v12 }
 0x2c7   :  { %v2385_v57 = vshrl.u32 %v2312_v22, 16  ;;  %v2168_v4 = vmax.f32 %v2152_v53, 0.0  ;;  %v6854_v15 = vrot.slane %v2369_v6, 7  ;;  %v2393_v11 = vshrl.u32 %v2313_v50, 16  ;;  %v2522_v53 = vld [vmem:[#allocation4 + $0x3c] sm:$0x1] }
 0x2c8   :  { %v6856_v37 = vrot.slane %v2377_v21, 7  ;;  %v2122_v31 = vmul.f32 %v2116_v62, %v6514_v42  ;;  %v2123_v40 = vmul.f32 %v2116_v62, %v6522_v29  ;;  %v6861_v13 = vadd.f32 %v6811_v28, %v2118_v47 }
 0x2c9   :  { %v2316_v17 = vpack.c.bf16 %v2165_v24, %v2165_v24  ;;  %v6864_v14 = vadd.f32 %v6811_v28, %v2119_v41  ;;  %v6867_v46 = vadd.f32 %v6811_v28, %v2121_v2  ;;  %v2317_v1 = vpack.c.bf16 %v2166_v23, %v2166_v23  ;;  %v2528_v2 = vld [vmem:[#allocation4 + $0x44] sm:$0x1] }
 0x2ca   :  { %v6869_v16 = vpack.c.bf16 %v2167_v33, %v2167_v33  ;;  %v6871_v32 = vrot.slane %v2385_v57, 7  ;;  %v6873_v30 = vrot.slane %v2393_v11, 7  ;;  %v2401_v42 = vshrl.u32 %v2314_v19, 16 }
 0x2cb   :  { %v2409_v48 = vshrl.u32 %v2315_v43, 16  ;;  %v6875_v29 = vpack.c.bf16 %v2168_v4, %v2168_v4  ;;  %v2375_v62 = vrot.slane %v6854_v15, 4  ;;  %v2383_v5 = vrot.slane %v6856_v37, 4 }
 0x2cc   :  { %v2388_v39 = vshll.u32 %v2312_v22, 16  ;;  %v2396_v10 = vshll.u32 %v2313_v50, 16  ;;  %v2403_v59 = vrot.slane %v2401_v42, 7  ;;  %v2417_v12 = vshrl.u32 %v2316_v17, 16  ;;  %v2531_v22 = vld [vmem:[#allocation4 + $0x58] sm:$0xf] }
 0x2cd   :  { %v2411_v7 = vrot.slane %v2409_v48, 7  ;;  %v6880_v47 = vadd.f32 %v6811_v28, %v2122_v31  ;;  %v2404_v41 = vshll.u32 %v2314_v19, 16  ;;  %v2412_v24 = vshll.u32 %v2315_v43, 16  ;;  %v2537_v19 = vld [vmem:[#allocation4 + $0x60] sm:$0xf] }
 0x2ce   :  { %v2425_v6 = vshrl.u32 %v2317_v1, 16  ;;  %v2390_v23 = vor.u32 %v2388_v39, %v6871_v32  ;;  %v2398_v33 = vor.u32 %v2396_v10, %v6873_v30  ;;  %v2420_v21 = vshll.u32 %v2316_v17, 16  ;;  %v2543_v43 = vld [vmem:[#allocation4 + $0x68] sm:$0xf]  ;;  %v2259_v31 = vld [vmem:[#allocation4 + $0x2c] sm:$0x1] }
 0x2cf   :  { %v2433_v57 = vshrl.u32 %v6869_v16, 16  ;;  %v2406_v50 = vor.u32 %v2404_v41, %v2403_v59  ;;  %v2407_v4 = vrot.slane %v2403_v59, 4  ;;  %v2414_v11 = vor.u32 %v2412_v24, %v2411_v7  ;;  %v2546_v59 = vld [vmem:[#allocation4 + $0x6c] sm:$0x1]  ;;  %v2549_v41 = vld [vmem:[#allocation4 + $0x70] sm:$0xf] }
 0x2d0   :  { %v2419_v42 = vrot.slane %v2417_v12, 7  ;;  %v2427_v48 = vrot.slane %v2425_v6, 7  ;;  %v2441_v39 = vshrl.u32 %v6875_v29, 16  ;;  %v2523_v17 = vsel %vm6708_vm1, %v2375_v62, %v2522_v53  ;;  %v2552_v62 = vld [vmem:[#allocation4 + $0x74] sm:$0x1] }
 0x2d1   :  { %v2529_v10 = vsel %vm6708_vm1, %v2383_v5, %v2528_v2  ;;  %v2142_v12 = vadd.f32 %v6811_v28, %v2123_v40  ;;  %v2156_v24 = vmax.f32 %v6867_v46, 0.0  ;;  %v2157_v36 = vmax.f32 %v6880_v47, 0.0  ;;  %2524 = vst [vmem:[#allocation4 + $0x3c] sm:$0x1] %v2523_v17 }
 0x2d2   :  { %v2415_v8 = vrot.slane %v2411_v7, 4  ;;  %v2422_v63 = vor.u32 %v2420_v21, %v2419_v42  ;;  %v2428_v6 = vshll.u32 %v2317_v1, 16  ;;  %v2435_v27 = vrot.slane %v2433_v57, 7  ;;  %2530 = vst [vmem:[#allocation4 + $0x44] sm:$0x1] %v2529_v10 }
 0x2d3   :  { %v2532_v26 = vsel %vm6887_vm8, %v2390_v23, %v2531_v22  ;;  %v2423_v53 = vrot.slane %v2419_v42, 4  ;;  %v2436_v5 = vshll.u32 %v6869_v16, 16  ;;  %v2538_v40 = vsel %vm6887_vm8, %v2398_v33, %v2537_v19  ;;  %v2555_v7 = vld [vmem:[#allocation4 + $0x78] sm:$0xf]  ;;  %v2558_v21 = vld [vmem:[#allocation4 + $0x7c] sm:$0x1] }
 0x2d4   :  { %2533 = vst [vmem:[#allocation4 + $0x58] sm:$0xf] %v2532_v26  ;;  %v2544_v46 = vsel %vm6887_vm8, %v2406_v50, %v2543_v43  ;;  %v2430_v47 = vor.u32 %v2428_v6, %v2427_v48  ;;  %v2443_v2 = vrot.slane %v2441_v39, 7  ;;  %v2547_v1 = vsel %vm6708_vm1, %v2407_v4, %v2546_v59  ;;  %v2561_v22 = vld [vmem:[#allocation4 + $0x80] sm:$0xf] }
 0x2d5   :  { %2539 = vst [vmem:[#allocation4 + $0x60] sm:$0xf] %v2538_v40  ;;  %v2550_v23 = vsel %vm6887_vm8, %v2414_v11, %v2549_v41  ;;  %v6912_v26 = vadd.f32 %v6811_v28, %v6852_v51  ;;  %v2158_v16 = vmax.f32 %v2142_v12, 0.0  ;;  %v2431_v33 = vrot.slane %v2427_v48, 4  ;;  %v2564_v19 = vld [vmem:[#allocation4 + $0x84] sm:$0x1] }
 0x2d6   :  { %2545 = vst [vmem:[#allocation4 + $0x68] sm:$0xf] %v2544_v46  ;;  %v2553_v57 = vsel %vm6708_vm1, %v2415_v8, %v2552_v62  ;;  %v6916_v50 = vpack.c.bf16 %v2156_v24, %v2156_v24  ;;  %v2438_v42 = vor.u32 %v2436_v5, %v2435_v27  ;;  %v2444_v4 = vshll.u32 %v6875_v29, 16  ;;  %v2567_v48 = vld [vmem:[#allocation4 + $0x88] sm:$0xf] }
 0x2d7   :  { %2548 = vst [vmem:[#allocation4 + $0x6c] sm:$0x1] %v2547_v1  ;;  %v2556_v11 = vsel %vm6887_vm8, %v2422_v63, %v2555_v7  ;;  %v2153_v28 = vmax.f32 %v6861_v13, 0.0  ;;  %v2439_v51 = vrot.slane %v2435_v27, 4  ;;  %v2559_v43 = vsel %vm6708_vm1, %v2423_v53, %v2558_v21  ;;  %v2570_v13 = vld [vmem:[#allocation4 + $0x8c] sm:$0x1] }
 0x2d8   :  { %2551 = vst [vmem:[#allocation4 + $0x70] sm:$0xf] %v2550_v23  ;;  %v8049_v8 = vrot.slane %v6835_v61, 4  ;;  %v2154_v17 = vmax.f32 %v6864_v14, 0.0  ;;  %v6928_v29 = vpack.c.bf16 %v2157_v36, %v2157_v36  ;;  %v2446_v10 = vor.u32 %v2444_v4, %v2443_v2  ;;  %v2534_v41 = vld [vmem:[#allocation4 + $0x5c] sm:$0x1] }
 0x2d9   :  { %2554 = vst [vmem:[#allocation4 + $0x74] sm:$0x1] %v2553_v57  ;;  %v2562_v63 = vsel %vm6887_vm8, %v2430_v47, %v2561_v22  ;;  %v6932_v27 = vpack.c.bf16 %v2158_v16, %v2158_v16  ;;  %v2447_v59 = vrot.slane %v2443_v2, 4  ;;  %v2565_v12 = vsel %vm6708_vm1, %v2431_v33, %v2564_v19  ;;  %v2573_v24 = vld [vmem:[#allocation4 + $0x90] sm:$0xf] }
 0x2da   :  { %v1937_v39 = vadd.f32 %v8049_v8, %v6835_v61  ;;  %2557 = vst [vmem:[#allocation4 + $0x78] sm:$0xf] %v2556_v11  ;;  %v2345_v14 = vshrl.u32 %v6916_v50, 16  ;;  %v2391_v36 = vrot.slane %v6871_v32, 4  ;;  %v2540_v6 = vld [vmem:[#allocation4 + $0x64] sm:$0x1]  ;;  %v2568_v62 = vsel %vm6887_vm8, %v2438_v42, %v2567_v48 }
 0x2db   :  { %2560 = vst [vmem:[#allocation4 + $0x7c] sm:$0x1] %v2559_v43  ;;  %v2576_v53 = vld [vmem:[#allocation4 + $0x94] sm:$0x1]  ;;  %v2155_v5 = vmax.f32 %v6912_v26, 0.0  ;;  %v2399_v40 = vrot.slane %v6873_v30, 4  ;;  %v2571_v46 = vsel %vm6708_vm1, %v2439_v51, %v2570_v13  ;;  %v2574_v23 = vsel %vm6887_vm8, %v2446_v10, %v2573_v24 }
 0x2dc   :  { %v1938_v61 = vrot.slane %v1937_v39, 2  ;;  %2563 = vst [vmem:[#allocation4 + $0x80] sm:$0xf] %v2562_v63  ;;  %v2182_v47 = vld [vmem:[#allocation4] sm:$0x1]  ;;  %v2348_v2 = vshll.u32 %v6916_v50, 16  ;;  %v2577_v26 = vsel %vm6708_vm1, %v2447_v59, %v2576_v53  ;;  %v2305_v33 = vpack.c.bf16 %v2154_v17, %v2154_v17 }
 0x2dd   :  { %v2353_v32 = vshrl.u32 %v6928_v29, 16  ;;  %v2356_v1 = vshll.u32 %v6928_v29, 16  ;;  %2566 = vst [vmem:[#allocation4 + $0x84] sm:$0x1] %v2565_v12  ;;  %v2361_v21 = vshrl.u32 %v6932_v27, 16  ;;  %v2364_v30 = vshll.u32 %v6932_v27, 16 }
 0x2de   :  { %v1939_v7 = vadd.f32 %v1938_v61, %v1937_v39  ;;  %2569 = vst [vmem:[#allocation4 + $0x88] sm:$0xf] %v2568_v62  ;;  %v6953_v57 = vrot.slane %v2345_v14, 7  ;;  %v2372_v22 = vshll.u32 %v6838_v34, 16  ;;  %v2535_v50 = vsel %vm6708_vm1, %v2391_v36, %v2534_v41  ;;  %v2244_v42 = vld [vmem:[#allocation4 + $0x4] sm:$0x1] }
 0x2df   :  { %2572 = vst [vmem:[#allocation4 + $0x8c] sm:$0x1] %v2571_v46  ;;  %v2304_v4 = vpack.c.bf16 %v2153_v28, %v2153_v28  ;;  %v2541_v11 = vsel %vm6708_vm1, %v2399_v40, %v2540_v6  ;;  %v2194_v51 = vld [vmem:[#allocation4 + $0x20] sm:$0x1]  ;;  %v2188_v43 = vld [vmem:[#allocation4 + $0x10] sm:$0x1]  ;;  %v6964_v17 = vpack.c.bf16 %v2155_v5, %v2155_v5 }
 0x2e0   :  { %v1940_v16 = vrot.slane %v1939_v7, 1  ;;  %2575 = vst [vmem:[#allocation4 + $0x90] sm:$0xf] %v2574_v23  ;;  %v6960_v48 = vrot.slane %v2353_v32, 7  ;;  %v2183_v8 = vsel %vm6708_vm1, 0, %v2182_v47  ;;  %v2245_v28 = vsel %vm6758_vm4, 0, %v2244_v42 }
 0x2e1   :  { %2578 = vst [vmem:[#allocation4 + $0x94] sm:$0x1] %v2577_v26  ;;  %v2185_v39 = vld [vmem:[#allocation4 + $0x8] sm:$0x1]  ;;  %v2195_v13 = vsel %vm6708_vm1, 0, %v2194_v51  ;;  %v2329_v59 = vshrl.u32 %v2305_v33, 16 }
 0x2e2   :  { %v1941_v19 = vadd.f32 %v1940_v16, %v1939_v7  ;;  %2536 = vst [vmem:[#allocation4 + $0x5c] sm:$0x1] %v2535_v50  ;;  %v2197_v63 = vld [vmem:[#allocation4 + $0x28] sm:$0x1]  ;;  %v2191_v41 = vld [vmem:[#allocation4 + $0x18] sm:$0x1]  ;;  %v2350_v16 = vor.u32 %v2348_v2, %v6953_v57 }
 0x2e3   :  { %2542 = vst [vmem:[#allocation4 + $0x64] sm:$0x1] %v2541_v11  ;;  %v2189_v24 = vsel %vm6708_vm1, 0, %v2188_v43  ;;  %v2321_v61 = vshrl.u32 %v2304_v4, 16  ;;  %v6974_v14 = vrot.slane %v2361_v21, 7  ;;  %v2186_v36 = vsel %vm6708_vm1, 0, %v2185_v39 }
 0x2e4   :  { %v1942_v10 = vmul.f32 0.0078125, %v1941_v19  ;;  %2184 = vst [vmem:[#allocation4] sm:$0x1] %v2183_v8  ;;  %v2200_v6 = vld [vmem:[#allocation4 + $0x30] sm:$0x1]  ;;  %v2198_v53 = vsel %vm6708_vm1, 0, %v2197_v63 }
 0x2e5   :  { %2246 = vst [vmem:[#allocation4 + $0x4] sm:$0x1] %v2245_v28  ;;  %v2949_v62 = vld [vmem:[#allocation4] sm:$0xe]  ;;  %v2337_v5 = vshrl.u32 %v6964_v17, 16  ;;  %v6982_v40 = vrot.slane %v2329_v59, 7 }
 0x2e6   :  { %v6970_v12 = vadd.f32 1e-05, %v1942_v10  ;;  %2196 = vst [vmem:[#allocation4 + $0x20] sm:$0x1] %v2195_v13  ;;  %v2192_v46 = vsel %vm6708_vm1, 0, %v2191_v41  ;;  %v6986_v47 = vrot.slane %v2321_v61, 7 }
 0x2e7   :  { %2190 = vst [vmem:[#allocation4 + $0x10] sm:$0x1] %v2189_v24  ;;  %v2203_v7 = vld [vmem:[#allocation4 + $0x38] sm:$0x1]  ;;  %v2201_v32 = vsel %vm6708_vm1, 0, %v2200_v6  ;;  %v4997_v21 = vrot.slane %v2949_v62, 9  ;;  %v2358_v24 = vor.u32 %v2356_v1, %v6960_v48 }
 0x2e8   :  { %5191 = vrsqrt.f32 %v6970_v12  ;;  %2187 = vst [vmem:[#allocation4 + $0x8] sm:$0x1] %v2186_v36  ;;  %v2206_v23 = vld [vmem:[#allocation4 + $0x40] sm:$0x1]  ;;  %v2332_v26 = vshll.u32 %v2305_v33, 16  ;;  %v2324_v50 = vshll.u32 %v2304_v4, 16  ;;  %vm1950_vm15 = vweird.f32 %v6970_v12 }
 0x2e9   :  { %2199 = vst [vmem:[#allocation4 + $0x28] sm:$0x1] %v2198_v53  ;;  %v6991_v42 = vrot.slane %v2337_v5, 7  ;;  %v2204_v11 = vsel %vm6708_vm1, 0, %v2203_v7  ;;  %v2340_v43 = vshll.u32 %v6964_v17, 16  ;;  %v2207_v8 = vsel %vm6708_vm1, 0, %v2206_v23 }
 0x2ea   :  { %2193 = vst [vmem:[#allocation4 + $0x18] sm:$0x1] %v2192_v46  ;;  %v2334_v51 = vor.u32 %v2332_v26, %v6982_v40  ;;  %v2326_v63 = vor.u32 %v2324_v50, %v6986_v47  ;;  %v2366_v5 = vor.u32 %v2364_v30, %v6974_v14  ;;  %v2380_v23 = vshll.u32 %v6842_v25, 16  ;;  %v3270_v52 = vld [vmem:[#allocation4 + $0x88] sm:$0xf] }
 0x2eb   :  { %v2628_v19 = vld [vmem:[#allocation4] sm:$0xf]  ;;  %2202 = vst [vmem:[#allocation4 + $0x30] sm:$0x1] %v2201_v32  ;;  %v2342_v53 = vor.u32 %v2340_v43, %v6991_v42  ;;  %v2247_v32 = vld [vmem:[#allocation4 + $0xc] sm:$0x1] }
 0x2ec   :  { %v2629_v39 = vld [vmem:[#allocation4 + $0x4] sm:$0x1]  ;;  %v2661_v2 = vshrl.u32 %v2628_v19, 16  ;;  %v2664_v4 = vshll.u32 %v2628_v19, 16  ;;  %2205 = vst [vmem:[#allocation4 + $0x38] sm:$0x1] %v2204_v11  ;;  %v2382_v25 = vor.u32 %v2380_v23, %v6856_v37 }
 0x2ed   :  { %v2950_v10 = vld [vmem:[#allocation4 + $0x4] sm:$0x1]  ;;  %v2670_v13 = vshll.u32 %v2629_v39, 16  ;;  %v2501_v41 = vld [vmem:[#allocation4 + $0x20] sm:$0xf]  ;;  %v2248_v39 = vsel %vm6758_vm4, 0, %v2247_v32 }
 0x2ee   :  { %v6999_v33 = vpop.eup %5191  ;;  %v3018_v59 = vrot.slane %v2950_v10, 5  ;;  %v2663_v61 = vrot.slane %v2661_v2, 4  ;;  %v2666_v36 = vrot.slane %v2664_v4, 5  ;;  %v2502_v6 = vsel %vm6887_vm8, %v2350_v16, %v2501_v41  ;;  %v2489_v62 = vld [vmem:[#allocation4 + $0x10] sm:$0xf] }
 0x2ef   :  { %v1945_v17 = vmul.f32 %v6999_v33, %v6970_v12  ;;  %2208 = vst [vmem:[#allocation4 + $0x40] sm:$0x1] %v2207_v8  ;;  %v2490_v1 = vsel %vm6887_vm8, %v2334_v51, %v2489_v62  ;;  %v2483_v7 = vld [vmem:[#allocation4 + $0x8] sm:$0xf]  ;;  %v2672_v16 = vrot.slane %v2670_v13, 5  ;;  %vm1951_vm12 = vweird.f32 %v6999_v33 }
 0x2f0   :  { %v3019_v29 = vsel %vm7003_vm11, %v4997_v21, %v3018_v59  ;;  %2503 = vst [vmem:[#allocation4 + $0x20] sm:$0xf] %v2502_v6  ;;  %v2667_v26 = vor.u32 %v2666_v36, %v2663_v61  ;;  %v2484_v27 = vsel %vm6887_vm8, %v2326_v63, %v2483_v7  ;;  %v2507_v30 = vld [vmem:[#allocation4 + $0x28] sm:$0xf]  ;;  %v2374_v21 = vor.u32 %v2372_v22, %v6854_v15  ;;  %v1832_v15 = vld [vmem:[%s8028_s8] sm:$0x1]  ;;  %vm1952_vm0 = vmor %vm1950_vm15, %vm1951_vm12 }
 0x2f1   :  { %v1946_v46 = vmul.f32 %v6999_v33, %v1945_v17  ;;  %3080 = vrot.lane.b32.xlu1 %v3019_v29, %s5198_s23  ;;  %2491 = vst [vmem:[#allocation4 + $0x10] sm:$0xf] %v2490_v1  ;;  %v2508_v11 = vsel %vm6887_vm8, %v2358_v24, %v2507_v30  ;;  %v2495_v19 = vld [vmem:[#allocation4 + $0x18] sm:$0xf]  ;;  %v2253_v17 = vld [vmem:[#allocation4 + $0x1c] sm:$0x1] }
 0x2f2   :  { %2485 = vst [vmem:[#allocation4 + $0x8] sm:$0xf] %v2484_v27  ;;  %v2668_v51 = vrot.slane %v2667_v26, 4  ;;  %v2496_v43 = vsel %vm6887_vm8, %v2342_v53, %v2495_v19  ;;  %v2513_v8 = vld [vmem:[#allocation4 + $0x30] sm:$0xf]  ;;  %v2254_v36 = vsel %vm6758_vm4, 0, %v2253_v17 }
 0x2f3   :  { %v1947_v50 = vmul.f32 0.5, %v1946_v46  ;;  %2509 = vst [vmem:[#allocation4 + $0x28] sm:$0xf] %v2508_v11  ;;  %v2514_v34 = vsel %vm6887_vm8, %v2366_v5, %v2513_v8  ;;  %v2519_v22 = vld [vmem:[#allocation4 + $0x38] sm:$0xf]  ;;  %v2260_v46 = vsel %vm6758_vm4, 0, %v2259_v31 }
 0x2f4   :  { %2497 = vst [vmem:[#allocation4 + $0x18] sm:$0xf] %v2496_v43  ;;  %v2673_v37 = vsel %vm5286_vm2, %v2668_v51, %v2672_v16  ;;  %v2520_v10 = vsel %vm6887_vm8, %v2374_v21, %v2519_v22  ;;  %v2250_v59 = vld [vmem:[#allocation4 + $0x14] sm:$0x1]  ;;  %v2256_v6 = vld [vmem:[#allocation4 + $0x24] sm:$0x1] }
 0x2f5   :  { %v1948_v2 = vsub.f32 1.5, %v1947_v50  ;;  %2515 = vst [vmem:[#allocation4 + $0x30] sm:$0xf] %v2514_v34  ;;  %2884 = vrot.lane.b32.xlu2 %v2673_v37, %s5197_s11  ;;  %v2251_v62 = vsel %vm6758_vm4, 0, %v2250_v59  ;;  %v2262_v29 = vld [vmem:[#allocation4 + $0x34] sm:$0x1] }
 0x2f6   :  { %v2525_v63 = vld [vmem:[#allocation4 + $0x40] sm:$0xf]  ;;  %2249 = vst [vmem:[#allocation4 + $0xc] sm:$0x1] %v2248_v39  ;;  %v2327_v27 = vrot.slane %v6986_v47, 4  ;;  %s5204_s8 = smov 48  }
 0x2f7   :  { %v1949_v4 = vmul.f32 %v6999_v33, %v1948_v2  ;;  %2521 = vst [vmem:[#allocation4 + $0x38] sm:$0xf] %v2520_v10  ;;  %v2526_v13 = vsel %vm6887_vm8, %v2382_v25, %v2525_v63  ;;  %v3148_v5 = vld [vmem:[#allocation4 + $0x20] sm:$0xf]  ;;  %v2359_v50 = vrot.slane %v6960_v48, 4  ;;  %v8057_v34 = vmov 0  }
 0x2f8   :  { %v3146_v24 = vld [vmem:[#allocation4 + $0x10] sm:$0xf]  ;;  %2527 = vst [vmem:[#allocation4 + $0x40] sm:$0xf] %v2526_v13  ;;  %v3759_v37 = vld [vmem:[#allocation4 + $0x20] sm:$0xf] }
 0x2f9   :  { %v1953_v41 = vsel %vm1952_vm0, %v6999_v33, %v1949_v4  ;;  %3179 = vrot.lane.b32.xlu1 %v3146_v24, %s5200_s27  ;;  %v3145_v12 = vld [vmem:[#allocation4 + $0x8] sm:$0xf]  ;;  %2255 = vst [vmem:[#allocation4 + $0x1c] sm:$0x1] %v2254_v36  ;;  %v2257_v33 = vsel %vm6758_vm4, 0, %v2256_v6  ;;  %vm3546_vm8 = vcmask 322816  }
 0x2fa   :  { %v1954_v61 = vmul.f32 %v1953_v41, %v1832_v15  ;;  %3177 = vrot.lane.b32.xlu0 %v3145_v12, %s5200_s27  ;;  %2252 = vst [vmem:[#allocation4 + $0x14] sm:$0x1] %v2251_v62  ;;  %v3760_v19 = vld [vmem:[#allocation4 + $0x28] sm:$0xf]  ;;  %vm4158_vm12 = vcmask 519616   ;;  %vm4351_vm15 = vcmask 585216  }
 0x2fb   :  { %2258 = vst [vmem:[#allocation4 + $0x24] sm:$0x1] %v2257_v33  ;;  %v3758_v16 = vld [vmem:[#allocation4 + $0x18] sm:$0xf]  ;;  %v3149_v15 = vld [vmem:[#allocation4 + $0x28] sm:$0xf] }
 0x2fc   :  { %v7060_v53 = vperm.slane %v1954_v61, 0  ;;  %2261 = vst [vmem:[#allocation4 + $0x2c] sm:$0x1] %v2260_v46  ;;  %v3147_v43 = vld [vmem:[#allocation4 + $0x18] sm:$0xf] }
 0x2fd   :  { %3183 = vrot.lane.b32.xlu2 %v3148_v5, %s5200_s27  ;;  %v2486_v30 = vld [vmem:[#allocation4 + $0xc] sm:$0x1]  ;;  %v3150_v39 = vld [vmem:[#allocation4 + $0x30] sm:$0xf]  ;;  %2580 = vst.msk [vmem:[#allocation3] sm:$0xf] %vm2579_vm3, %v8057_v34 }
 0x2fe   :  { %v7069_v1 = vmul.f32 %v7060_v53, %v6695_v49  ;;  %v7073_v7 = vmul.f32 %v7060_v53, %v6704_v35  ;;  %v7077_v32 = vmul.f32 %v7060_v53, %v6734_v60  ;;  %v7081_v23 = vmul.f32 %v7060_v53, %v6747_v58  ;;  %v3757_v58 = vld [vmem:[#allocation4 + $0x10] sm:$0xf]  ;;  %2581 = vst.msk [vmem:[#allocation3 + $0x4] sm:$0xf] %vm2579_vm3, %v8057_v34  ;;  %v3762_v22 = vld [vmem:[#allocation4 + $0x38] sm:$0xf] }
 0x2ff   :  { %v7085_v26 = vmul.f32 %v7060_v53, %v6766_v3  ;;  %v2263_v49 = vsel %vm6758_vm4, 0, %v2262_v29  ;;  %v2335_v35 = vrot.slane %v6982_v40, 4  ;;  %v2343_v60 = vrot.slane %v6991_v42, 4  ;;  %v3761_v4 = vld [vmem:[#allocation4 + $0x30] sm:$0xf] }
 0x300   :  { %8052 = vst [vmem:[#allocation8_spill] sm:$0xff] %v7069_v1  ;;  %v2351_v3 = vrot.slane %v6953_v57, 4  ;;  %v2498_v21 = vld [vmem:[#allocation4 + $0x1c] sm:$0x1]  ;;  %v2487_v40 = vsel %vm6708_vm1, %v2327_v27, %v2486_v30  ;;  %v2367_v57 = vrot.slane %v6974_v14, 4 }
 0x301   :  { %8053 = vst [vmem:[#allocation9_spill] sm:$0xff] %v7073_v7  ;;  %3791 = vrot.lane.b32.xlu1 %v3758_v16, %s5204_s8  ;;  %v2492_v11 = vld [vmem:[#allocation4 + $0x14] sm:$0x1]  ;;  %v2499_v47 = vsel %vm6708_vm1, %v2343_v60, %v2498_v21  ;;  %v2951_v10 = vld [vmem:[#allocation4 + $0x8] sm:$0xe] }
 0x302   :  { %8054 = vst [vmem:[#allocation10_spill] sm:$0xff] %v7077_v32  ;;  %3789 = vrot.lane.b32.xlu0 %v3757_v58, %s5204_s8  ;;  %v2493_v42 = vsel %vm6708_vm1, %v2335_v35, %v2492_v11  ;;  %v2504_v25 = vld [vmem:[#allocation4 + $0x24] sm:$0x1]  ;;  %v3563_v17 = vld [vmem:[#allocation4 + $0x8] sm:$0xe]  ;;  %v4998_v41 = vrot.slane %v2951_v10, 9 }
 0x303   :  { %8055 = vst [vmem:[#allocation11_spill] sm:$0xff] %v7081_v23  ;;  %v2505_v48 = vsel %vm6708_vm1, %v2351_v3, %v2504_v25  ;;  %v2510_v51 = vld [vmem:[#allocation4 + $0x2c] sm:$0x1]  ;;  %v3152_v13 = vld [vmem:[#allocation4 + $0x40] sm:$0xf]  ;;  %v5013_v6 = vrot.slane %v3563_v17, 9 }
 0x304   :  { %8056 = vst [vmem:[#allocation12_spill] sm:$0xff] %v7085_v26  ;;  %v2511_v8 = vsel %vm6708_vm1, %v2359_v50, %v2510_v51  ;;  %v3151_v59 = vld [vmem:[#allocation4 + $0x38] sm:$0xf]  ;;  %v3565_v46 = vld [vmem:[#allocation4 + $0x10] sm:$0xe] }
 0x305   :  { %2264 = vst [vmem:[#allocation4 + $0x34] sm:$0x1] %v2263_v49  ;;  %3795 = vrot.lane.b32.xlu2 %v3760_v19, %s5204_s8  ;;  %v2955_v12 = vld [vmem:[#allocation4 + $0x18] sm:$0xe]  ;;  %v4175_v49 = vld [vmem:[#allocation4 + $0x10] sm:$0xe] }
 0x306   :  { %2488 = vst [vmem:[#allocation4 + $0xc] sm:$0x1] %v2487_v40  ;;  %v5000_v5 = vrot.slane %v2955_v12, 9  ;;  %v5014_v27 = vrot.slane %v3565_v46, 9  ;;  %v3569_v30 = vld [vmem:[#allocation4 + $0x20] sm:$0xe] }
 0x307   :  { %2500 = vst [vmem:[#allocation4 + $0x1c] sm:$0x1] %v2499_v47  ;;  %v5029_v21 = vrot.slane %v4175_v49, 9  ;;  %v5016_v19 = vrot.slane %v3569_v30, 9  ;;  %v4177_v47 = vld [vmem:[#allocation4 + $0x18] sm:$0xe] }
 0x308   :  { %2494 = vst [vmem:[#allocation4 + $0x14] sm:$0x1] %v2493_v42  ;;  %v2957_v12 = vld [vmem:[#allocation4 + $0x20] sm:$0xe]  ;;  %v3567_v46 = vld [vmem:[#allocation4 + $0x18] sm:$0xe] }
 0x309   :  { %3181 = vrot.lane.b32.xlu1 %v3147_v43, %s5200_s27  ;;  %2506 = vst [vmem:[#allocation4 + $0x24] sm:$0x1] %v2505_v48  ;;  %v5030_v48 = vrot.slane %v4177_v47, 9  ;;  %v2959_v43 = vld [vmem:[#allocation4 + $0x28] sm:$0xe] }
 0x30a   :  { %3187 = vrot.lane.b32.xlu0 %v3150_v39, %s5200_s27  ;;  %2512 = vst [vmem:[#allocation4 + $0x2c] sm:$0x1] %v2511_v8  ;;  %v4181_v39 = vld [vmem:[#allocation4 + $0x28] sm:$0xe]  ;;  %v3581_v32 = vld [vmem:[#allocation4 + $0x60] sm:$0xe] }
 0x30b   :  { %2582 = vst.msk [vmem:[#allocation3 + $0x8] sm:$0xf] %vm2579_vm3, %v8057_v34  ;;  %v3571_v30 = vld [vmem:[#allocation4 + $0x28] sm:$0xe]  ;;  %v3882_v45 = vld [vmem:[#allocation4 + $0x90] sm:$0xf] }
 0x30c   :  { %v2516_v2 = vld [vmem:[#allocation4 + $0x34] sm:$0x1]  ;;  %2583 = vst.msk [vmem:[#allocation3 + $0xc] sm:$0xf] %vm2579_vm3, %v8057_v34 }
 0x30d   :  { %v2517_v14 = vsel %vm6708_vm1, %v2367_v57, %v2516_v2  ;;  %3185 = vrot.lane.b32.xlu2 %v3149_v15, %s5200_s27  ;;  %v2952_v63 = vld [vmem:[#allocation4 + $0xc] sm:$0x1]  ;;  %2584 = vst.msk [vmem:[#allocation3 + $0x10] sm:$0xf] %vm2579_vm3, %v8057_v34 }
 0x30e   :  { %2518 = vst [vmem:[#allocation4 + $0x34] sm:$0x1] %v2517_v14  ;;  %v3022_v24 = vrot.slane %v2952_v63, 5  ;;  %v3564_v61 = vld [vmem:[#allocation4 + $0xc] sm:$0x1]  ;;  %v5002_v14 = vrot.slane %v2959_v43, 9 }
 0x30f   :  { %2585 = vst.msk [vmem:[#allocation3 + $0x14] sm:$0xf] %vm2579_vm3, %v8057_v34  ;;  %v2956_v36 = vld [vmem:[#allocation4 + $0x1c] sm:$0x1]  ;;  %v3629_v62 = vrot.slane %v3564_v61, 5 }
 0x310   :  { %2586 = vst.msk [vmem:[#allocation3 + $0x18] sm:$0xf] %vm2579_vm3, %v8057_v34  ;;  %v3023_v31 = vsel %vm7003_vm11, %v4998_v41, %v3022_v24  ;;  %v3030_v33 = vrot.slane %v2956_v36, 5  ;;  %v3566_v29 = vld [vmem:[#allocation4 + $0x14] sm:$0x1] }
 0x311   :  { %3793 = vrot.lane.b32.xlu1 %v3759_v37, %s5204_s8  ;;  %2587 = vst.msk [vmem:[#allocation3 + $0x1c] sm:$0xf] %vm2579_vm3, %v8057_v34  ;;  %v3630_v16 = vsel %vm7003_vm11, %v5013_v6, %v3629_v62  ;;  %v3633_v60 = vrot.slane %v3566_v29, 5  ;;  %v4176_v58 = vld [vmem:[#allocation4 + $0x14] sm:$0x1]  ;;  %v5032_v37 = vrot.slane %v4181_v39, 9 }
 0x312   :  { %3799 = vrot.lane.b32.xlu0 %v3762_v22, %s5204_s8  ;;  %2588 = vst.msk [vmem:[#allocation3 + $0x20] sm:$0xf] %vm2579_vm3, %v8057_v34  ;;  %v3031_v35 = vsel %vm7003_vm11, %v5000_v5, %v3030_v33  ;;  %v3570_v3 = vld [vmem:[#allocation4 + $0x24] sm:$0x1]  ;;  %v4241_v50 = vrot.slane %v4176_v58, 5  ;;  %v5001_v5 = vrot.slane %v2957_v12, 9 }
 0x313   :  { %2589 = vst.msk [vmem:[#allocation3 + $0x24] sm:$0xf] %vm2579_vm3, %v8057_v34  ;;  %v3634_v11 = vsel %vm7003_vm11, %v5014_v27, %v3633_v60  ;;  %v3641_v40 = vrot.slane %v3570_v3, 5  ;;  %v4178_v42 = vld [vmem:[#allocation4 + $0x1c] sm:$0x1] }
 0x314   :  { %2590 = vst.msk [vmem:[#allocation3 + $0x28] sm:$0xf] %vm2579_vm3, %v8057_v34  ;;  %v4242_v25 = vsel %vm7003_vm11, %v5029_v21, %v4241_v50  ;;  %v4245_v51 = vrot.slane %v4178_v42, 5  ;;  %v2960_v8 = vld [vmem:[#allocation4 + $0x2c] sm:$0x1] }
 0x315   :  { %3797 = vrot.lane.b32.xlu2 %v3761_v4, %s5204_s8  ;;  %2591 = vst.msk [vmem:[#allocation3 + $0x2c] sm:$0xf] %vm2579_vm3, %v8057_v34  ;;  %v3642_v57 = vsel %vm7003_vm11, %v5016_v19, %v3641_v40  ;;  %v4182_v2 = vld [vmem:[#allocation4 + $0x2c] sm:$0x1]  ;;  %v2953_v4 = vld [vmem:[#allocation4 + $0x10] sm:$0xe] }
 0x316   :  { %2592 = vst.msk [vmem:[#allocation3 + $0x30] sm:$0xf] %vm2579_vm3, %v8057_v34  ;;  %v4246_v15 = vsel %vm7003_vm11, %v5030_v48, %v4245_v51  ;;  %v4253_v22 = vrot.slane %v4182_v2, 5  ;;  %v2954_v10 = vld [vmem:[#allocation4 + $0x14] sm:$0x1]  ;;  %v5017_v40 = vrot.slane %v3571_v30, 9 }
 0x317   :  { %2593 = vst.msk [vmem:[#allocation3 + $0x34] sm:$0xf] %vm2579_vm3, %v8057_v34  ;;  %v2596_v63 = vld [vmem:[#allocation4] sm:$0xf]  ;;  %v3026_v41 = vrot.slane %v2954_v10, 5 }
 0x318   :  { %2594 = vst.msk [vmem:[#allocation3 + $0x38] sm:$0xf] %vm2579_vm3, %v8057_v34  ;;  %v3573_v24 = vld [vmem:[#allocation4 + $0x30] sm:$0xe]  ;;  %v3574_v61 = vld [vmem:[#allocation4 + $0x34] sm:$0x1] }
 0x319   :  { %3191 = vrot.lane.b32.xlu1 %v3152_v13, %s5200_s27  ;;  %2595 = vst.msk [vmem:[#allocation3 + $0x3c] sm:$0xf] %vm2579_vm3, %v8057_v34  ;;  %v3038_v34 = vrot.slane %v2960_v8, 5  ;;  %v4254_v13 = vsel %vm7003_vm11, %v5032_v37, %v4253_v22  ;;  %v2958_v36 = vld [vmem:[#allocation4 + $0x24] sm:$0x1]  ;;  %v5018_v6 = vrot.slane %v3573_v24, 9 }
 0x31a   :  { %3189 = vrot.lane.b32.xlu0 %v3151_v59, %s5200_s27  ;;  %2612 = vst.msk [vmem:[#allocation3] sm:$0xf] %vm2169_vm14, %v2596_v63  ;;  %v4999_v59 = vrot.slane %v2953_v4, 9  ;;  %v3649_v62 = vrot.slane %v3574_v61, 5  ;;  %v3034_v33 = vrot.slane %v2958_v36, 5 }
 0x31b   :  { %v3039_v17 = vsel %vm7003_vm11, %v5002_v14, %v3038_v34  ;;  %v3568_v29 = vld [vmem:[#allocation4 + $0x1c] sm:$0x1]  ;;  %v4185_v60 = vld [vmem:[#allocation4 + $0x38] sm:$0xe]  ;;  %v3572_v3 = vld [vmem:[#allocation4 + $0x2c] sm:$0x1] }
 0x31c   :  { %v3035_v49 = vsel %vm7003_vm11, %v5001_v5, %v3034_v33  ;;  %v3637_v27 = vrot.slane %v3568_v29, 5  ;;  %v4186_v58 = vld [vmem:[#allocation4 + $0x3c] sm:$0x1]  ;;  %v5034_v21 = vrot.slane %v4185_v60, 9  ;;  %v3645_v47 = vrot.slane %v3572_v3, 5 }
 0x31d   :  { %3082 = vrot.lane.b32.xlu2 %v3023_v31, %s5198_s23  ;;  %v3027_v31 = vsel %vm7003_vm11, %v4999_v59, %v3026_v41  ;;  %v4261_v50 = vrot.slane %v4186_v58, 5  ;;  %v4179_v42 = vld [vmem:[#allocation4 + $0x20] sm:$0xe]  ;;  %v2961_v48 = vld [vmem:[#allocation4 + $0x30] sm:$0xe] }
 0x31e   :  { %v5031_v39 = vrot.slane %v4179_v42, 9  ;;  %v4183_v2 = vld [vmem:[#allocation4 + $0x30] sm:$0xe]  ;;  %v3242_v14 = vld [vmem:[#allocation4 + $0x8] sm:$0xf]  ;;  %v3646_v34 = vsel %vm7003_vm11, %v5017_v40, %v3645_v47  ;;  %v5003_v24 = vrot.slane %v2961_v48, 9 }
 0x31f   :  { %v4262_v8 = vsel %vm7003_vm11, %v5034_v21, %v4261_v50  ;;  %v2962_v37 = vld [vmem:[#allocation4 + $0x34] sm:$0x1]  ;;  %v2964_v63 = vld [vmem:[#allocation4 + $0x3c] sm:$0x1]  ;;  %v3275_v59 = vshrl.u32 %v3242_v14, 16  ;;  %v3278_v41 = vshll.u32 %v3242_v14, 16 }
 0x320   :  { %v4184_v10 = vld [vmem:[#allocation4 + $0x34] sm:$0x1]  ;;  %v3042_v61 = vrot.slane %v2962_v37, 5  ;;  %v5033_v12 = vrot.slane %v4183_v2, 9  ;;  %v3248_v36 = vld [vmem:[#allocation4 + $0x20] sm:$0xf] }
 0x321   :  { %3691 = vrot.lane.b32.xlu1 %v3630_v16, %s5205_s20  ;;  %v3650_v16 = vsel %vm7003_vm11, %v5018_v6, %v3649_v62  ;;  %v4257_v62 = vrot.slane %v4184_v10, 5  ;;  %v3244_v33 = vld [vmem:[#allocation4 + $0x10] sm:$0xf]  ;;  %v3046_v29 = vrot.slane %v2964_v63, 5  ;;  %v3317_v60 = vshrl.u32 %v3248_v36, 16 }
 0x322   :  { %3086 = vrot.lane.b32.xlu0 %v3031_v35, %s5198_s23  ;;  %v5015_v35 = vrot.slane %v3567_v46, 9  ;;  %v2963_v46 = vld [vmem:[#allocation4 + $0x38] sm:$0xe]  ;;  %v3043_v58 = vsel %vm7003_vm11, %v5003_v24, %v3042_v61  ;;  %v2631_v30 = vld [vmem:[#allocation4 + $0xc] sm:$0x1]  ;;  %v3320_v3 = vshll.u32 %v3248_v36, 16 }
 0x323   :  { %v3289_v21 = vshrl.u32 %v3244_v33, 16  ;;  %v3292_v50 = vshll.u32 %v3244_v33, 16  ;;  %v3854_v42 = vld [vmem:[#allocation4 + $0x10] sm:$0xf]  ;;  %v2638_v33 = vld [vmem:[#allocation4 + $0x28] sm:$0xf] }
 0x324   :  { %v3638_v19 = vsel %vm7003_vm11, %v5015_v35, %v3637_v27  ;;  %v3277_v35 = vrot.slane %v3275_v59, 4  ;;  %v3280_v27 = vrot.slane %v3278_v41, 5  ;;  %v3322_v2 = vrot.slane %v3320_v3, 5  ;;  %v3856_v59 = vld [vmem:[#allocation4 + $0x18] sm:$0xf] }
 0x325   :  { %3693 = vrot.lane.b32.xlu2 %v3634_v11, %s5205_s20  ;;  %v2634_v11 = vld [vmem:[#allocation4 + $0x18] sm:$0xf]  ;;  %v3887_v14 = vshrl.u32 %v3854_v42, 16  ;;  %v3890_v10 = vshll.u32 %v3854_v42, 16  ;;  %v2601_v42 = vld [vmem:[#allocation4 + $0x28] sm:$0xf] }
 0x326   :  { %v2703_v51 = vshrl.u32 %v2634_v11, 16  ;;  %v2706_v43 = vshll.u32 %v2634_v11, 16  ;;  %v4258_v11 = vsel %vm7003_vm11, %v5033_v12, %v4257_v62  ;;  %v3281_v48 = vor.u32 %v3280_v27, %v3277_v35  ;;  %v3855_v27 = vld [vmem:[#allocation4 + $0x14] sm:$0x1]  ;;  %2617 = vst.msk [vmem:[#allocation3 + $0x14] sm:$0xf] %vm2169_vm14, %v2601_v42 }
 0x327   :  { %v3889_v62 = vrot.slane %v3887_v14, 4  ;;  %v3246_v42 = vld [vmem:[#allocation4 + $0x18] sm:$0xf] }
 0x328   :  { %v3282_v36 = vrot.slane %v3281_v48, 4 }
 0x329   :  { %4303 = vrot.lane.b32.xlu1 %v4242_v25, %s5206_s21  ;;  %v4180_v25 = vld [vmem:[#allocation4 + $0x24] sm:$0x1] }
 0x32a   :  { %3697 = vrot.lane.b32.xlu0 %v3642_v57, %s5205_s20  ;;  %v2630_v57 = vld [vmem:[#allocation4 + $0x8] sm:$0xf] }
 0x32b   :  { %v2675_v22 = vshrl.u32 %v2630_v57, 16  ;;  %v2678_v4 = vshll.u32 %v2630_v57, 16 }
 0x32d   :  { %4305 = vrot.lane.b32.xlu2 %v4246_v15, %s5206_s21  ;;  %v4249_v15 = vrot.slane %v4180_v25, 5  ;;  %v2680_v5 = vrot.slane %v2678_v4, 5  ;;  %v3243_v25 = vld [vmem:[#allocation4 + $0xc] sm:$0x1] }
 0x32e   :  { %v3284_v63 = vshll.u32 %v3243_v25, 16 }
 0x32f   :  { %v4250_v6 = vsel %vm7003_vm11, %v5031_v39, %v4249_v15  ;;  %v3249_v39 = vld [vmem:[#allocation4 + $0x24] sm:$0x1]  ;;  %v3294_v15 = vrot.slane %v3292_v50, 5  ;;  %v2734_v50 = vshll.u32 %v2638_v33, 16 }
 0x330   :  { %v3326_v61 = vshll.u32 %v3249_v39, 16  ;;  %v3286_v35 = vrot.slane %v3284_v63, 5  ;;  %v3857_v63 = vld [vmem:[#allocation4 + $0x1c] sm:$0x1] }
 0x331   :  { %3090 = vrot.lane.b32.xlu1 %v3039_v17, %s5198_s23  ;;  %v2705_v17 = vrot.slane %v2703_v51, 4  ;;  %v2684_v51 = vshll.u32 %v2631_v30, 16 }
 0x332   :  { %4309 = vrot.lane.b32.xlu0 %v4254_v13, %s5206_s21  ;;  %v2708_v13 = vrot.slane %v2706_v43, 5  ;;  %v3319_v43 = vrot.slane %v3317_v60, 4  ;;  %v3328_v30 = vrot.slane %v3326_v61, 5  ;;  %v3287_v25 = vsel %vm5286_vm2, %v3282_v36, %v3286_v35  ;;  %v3252_v36 = vld [vmem:[#allocation4 + $0x30] sm:$0xf] }
 0x333   :  { %v2686_v24 = vrot.slane %v2684_v51, 5  ;;  %v3345_v35 = vshrl.u32 %v3252_v36, 16 }
 0x335   :  { %3084 = vrot.lane.b32.xlu2 %v3027_v31, %s5198_s23  ;;  %v2677_v31 = vrot.slane %v2675_v22, 4 }
 0x337   :  { %v2681_v47 = vor.u32 %v2680_v5, %v2677_v31  ;;  %v3245_v31 = vld [vmem:[#allocation4 + $0x14] sm:$0x1] }
 0x338   :  { %v3298_v3 = vshll.u32 %v3245_v31, 16 }
 0x339   :  { %3701 = vrot.lane.b32.xlu1 %v3650_v16, %s5205_s20  ;;  %v2635_v16 = vld [vmem:[#allocation4 + $0x1c] sm:$0x1]  ;;  %v2682_v4 = vrot.slane %v2681_v47, 4  ;;  %v3861_v47 = vld [vmem:[#allocation4 + $0x2c] sm:$0x1] }
 0x33a   :  { %3088 = vrot.lane.b32.xlu0 %v3035_v49, %s5198_s23  ;;  %v2709_v49 = vor.u32 %v2708_v13, %v2705_v17  ;;  %v2712_v40 = vshll.u32 %v2635_v16, 16  ;;  %v3901_v16 = vshrl.u32 %v3856_v59, 16 }
 0x33c   :  { %v2710_v57 = vrot.slane %v2709_v49, 4  ;;  %v2714_v22 = vrot.slane %v2712_v40, 5  ;;  %v3904_v49 = vshll.u32 %v3856_v59, 16  ;;  %v3903_v48 = vrot.slane %v3901_v16, 4 }
 0x33d   :  { %3695 = vrot.lane.b32.xlu2 %v3638_v19, %s5205_s20  ;;  %v5004_v19 = vrot.slane %v2963_v46, 9  ;;  %v2687_v46 = vsel %vm5286_vm2, %v2682_v4, %v2686_v24  ;;  %v2639_v24 = vld [vmem:[#allocation4 + $0x2c] sm:$0x1]  ;;  %v3910_v16 = vshll.u32 %v3857_v63, 16 }
 0x33e   :  { %v2715_v41 = vsel %vm5286_vm2, %v2710_v57, %v2714_v22  ;;  %v3906_v51 = vrot.slane %v3904_v49, 5  ;;  %v2736_v22 = vrot.slane %v2734_v50, 5  ;;  %v3250_v49 = vld [vmem:[#allocation4 + $0x28] sm:$0xf]  ;;  %v3253_v50 = vld [vmem:[#allocation4 + $0x34] sm:$0x1] }
 0x33f   :  { %v3047_v37 = vsel %vm7003_vm11, %v5004_v19, %v3046_v29  ;;  %v3892_v29 = vrot.slane %v3890_v10, 5 }
 0x340   :  { %v3907_v61 = vor.u32 %v3906_v51, %v3903_v48  ;;  %v2633_v48 = vld [vmem:[#allocation4 + $0x14] sm:$0x1]  ;;  %v3331_v51 = vshrl.u32 %v3250_v49, 16 }
 0x341   :  { %4313 = vrot.lane.b32.xlu1 %v4262_v8, %s5206_s21  ;;  %v3860_v8 = vld [vmem:[#allocation4 + $0x28] sm:$0xf]  ;;  %v3893_v57 = vor.u32 %v3892_v29, %v3889_v62 }
 0x342   :  { %3699 = vrot.lane.b32.xlu0 %v3646_v34, %s5205_s20  ;;  %v3291_v34 = vrot.slane %v3289_v21, 4  ;;  %v3929_v17 = vshrl.u32 %v3860_v8, 16  ;;  %v3932_v13 = vshll.u32 %v3860_v8, 16  ;;  %v2731_v21 = vshrl.u32 %v2638_v33, 16  ;;  %v2599_v33 = vld [vmem:[#allocation4 + $0x18] sm:$0xf] }
 0x343   :  { %v3896_v8 = vshll.u32 %v3855_v27, 16  ;;  %v3894_v59 = vrot.slane %v3893_v57, 4  ;;  %2615 = vst.msk [vmem:[#allocation3 + $0xc] sm:$0xf] %vm2169_vm14, %v2599_v33  ;;  %v3348_v27 = vshll.u32 %v3252_v36, 16  ;;  %v3912_v57 = vrot.slane %v3910_v16, 5 }
 0x344   :  { %v3295_v5 = vor.u32 %v3294_v15, %v3291_v34  ;;  %v3931_v60 = vrot.slane %v3929_v17, 4  ;;  %v3300_v34 = vrot.slane %v3298_v3, 5  ;;  %v3938_v15 = vshll.u32 %v3861_v47, 16  ;;  %v3862_v16 = vld [vmem:[#allocation4 + $0x30] sm:$0xf] }
 0x345   :  { %4307 = vrot.lane.b32.xlu2 %v4250_v6, %s5206_s21  ;;  %v3323_v6 = vor.u32 %v3322_v2, %v3319_v43  ;;  %v2632_v43 = vld [vmem:[#allocation4 + $0x10] sm:$0xf] }
 0x346   :  { %v3296_v40 = vrot.slane %v3295_v5, 4  ;;  %v2689_v17 = vshrl.u32 %v2632_v43, 16 }
 0x347   :  { %v3324_v19 = vrot.slane %v3323_v6, 4  ;;  %v3898_v6 = vrot.slane %v3896_v8, 5 }
 0x349   :  { %3092 = vrot.lane.b32.xlu1 %v3043_v58, %s5198_s23  ;;  %v3934_v58 = vrot.slane %v3932_v13, 5  ;;  %v3329_v10 = vsel %vm5286_vm2, %v3324_v19, %v3328_v30  ;;  %v2692_v13 = vshll.u32 %v2632_v43, 16  ;;  %v2597_v30 = vld [vmem:[#allocation4 + $0x8] sm:$0xf]  ;;  %v3899_v3 = vsel %vm5286_vm2, %v3894_v59, %v3898_v6 }
 0x34a   :  { %4311 = vrot.lane.b32.xlu0 %v4258_v11, %s5206_s21  ;;  %v2636_v11 = vld [vmem:[#allocation4 + $0x20] sm:$0xf]  ;;  %2613 = vst.msk [vmem:[#allocation3 + $0x4] sm:$0xf] %vm2169_vm14, %v2597_v30  ;;  %v2740_v19 = vshll.u32 %v2639_v24, 16  ;;  %v3334_v43 = vshll.u32 %v3250_v49, 16 }
 0x34b   :  { %v3935_v39 = vor.u32 %v3934_v58, %v3931_v60  ;;  %v2717_v2 = vshrl.u32 %v2636_v11, 16  ;;  %v2720_v14 = vshll.u32 %v2636_v11, 16  ;;  %v2691_v60 = vrot.slane %v2689_v17, 4  ;;  %v2602_v49 = vld [vmem:[#allocation4 + $0x30] sm:$0xf] }
 0x34c   :  { %v2694_v58 = vrot.slane %v2692_v13, 5  ;;  %v2742_v63 = vrot.slane %v2740_v19, 5  ;;  %v2698_v13 = vshll.u32 %v2633_v48, 16  ;;  %v3333_v24 = vrot.slane %v3331_v51, 4  ;;  %2618 = vst.msk [vmem:[#allocation3 + $0x18] sm:$0xf] %vm2169_vm14, %v2602_v49 }
 0x34d   :  { %3094 = vrot.lane.b32.xlu2 %v3047_v37, %s5198_s23  ;;  %v2733_v37 = vrot.slane %v2731_v21, 4  ;;  %v3936_v62 = vrot.slane %v3935_v39, 4  ;;  %v2719_v31 = vrot.slane %v2717_v2, 4  ;;  %v2722_v5 = vrot.slane %v2720_v14, 5  ;;  %v2640_v48 = vld [vmem:[#allocation4 + $0x30] sm:$0xf] }
 0x34e   :  { %v3908_v21 = vrot.slane %v3907_v61, 4  ;;  %v3347_v39 = vrot.slane %v3345_v35, 4  ;;  %v3350_v2 = vrot.slane %v3348_v27, 5  ;;  %v3354_v14 = vshll.u32 %v3253_v50, 16  ;;  %v3247_v50 = vld [vmem:[#allocation4 + $0x1c] sm:$0x1] }
 0x34f   :  { %v2885_v12 = vpop.permute.xlu2 %2884  ;;  %v2737_v29 = vor.u32 %v2736_v22, %v2733_v37  ;;  %v3303_v22 = vshrl.u32 %v3246_v42, 16  ;;  %v3336_v61 = vrot.slane %v3334_v43, 5  ;;  %v2700_v35 = vrot.slane %v2698_v13, 5 }
 0x350   :  { %2933 = vst.msk [vmem:[#allocation3] sm:$0xf] %vm2932_vm5, %v2885_v12  ;;  %v2637_v12 = vld [vmem:[#allocation4 + $0x24] sm:$0x1]  ;;  %v3913_v37 = vsel %vm5286_vm2, %v3908_v21, %v3912_v57 }
 0x351   :  { %2890 = vrot.lane.b32.xlu1 %v2715_v41, %s5197_s11  ;;  %v3301_v41 = vsel %vm5286_vm2, %v3296_v40, %v3300_v34  ;;  %v2723_v40 = vor.u32 %v2722_v5, %v2719_v31  ;;  %v2726_v47 = vshll.u32 %v2637_v12, 16  ;;  %v2695_v34 = vor.u32 %v2694_v58, %v2691_v60  ;;  %v3858_v60 = vld [vmem:[#allocation4 + $0x20] sm:$0xf] }
 0x352   :  { %2886 = vrot.lane.b32.xlu0 %v2687_v46, %s5197_s11  ;;  %v3940_v46 = vrot.slane %v3938_v15, 5  ;;  %v3864_v15 = vld [vmem:[#allocation4 + $0x38] sm:$0xf]  ;;  %v3356_v31 = vrot.slane %v3354_v14, 5  ;;  %v3337_v30 = vor.u32 %v3336_v61, %v3333_v24  ;;  %v3915_v51 = vshrl.u32 %v3858_v60, 16 }
 0x353   :  { %v2724_v17 = vrot.slane %v2723_v40, 4  ;;  %v3957_v12 = vshrl.u32 %v3864_v15, 16  ;;  %v3960_v36 = vshll.u32 %v3864_v15, 16  ;;  %v2728_v6 = vrot.slane %v2726_v47, 5  ;;  %v3865_v14 = vld [vmem:[#allocation4 + $0x3c] sm:$0x1] }
 0x354   :  { %v3941_v11 = vsel %vm5286_vm2, %v3936_v62, %v3940_v46  ;;  %v3351_v62 = vor.u32 %v3350_v2, %v3347_v39  ;;  %v2696_v5 = vrot.slane %v2695_v34, 4  ;;  %v3305_v46 = vrot.slane %v3303_v22, 4  ;;  %v2600_v34 = vld [vmem:[#allocation4 + $0x20] sm:$0xf] }
 0x355   :  { %3498 = vrot.lane.b32.xlu2 %v3287_v25, %s5202_s19  ;;  %v2738_v25 = vrot.slane %v2737_v29, 4  ;;  %v2729_v58 = vsel %vm5286_vm2, %v2724_v17, %v2728_v6  ;;  %v3962_v21 = vrot.slane %v3960_v36, 5  ;;  %v3943_v47 = vshrl.u32 %v3862_v16, 16  ;;  %2616 = vst.msk [vmem:[#allocation3 + $0x10] sm:$0xf] %vm2169_vm14, %v2600_v34 }
 0x356   :  { %v3352_v19 = vrot.slane %v3351_v62, 4  ;;  %v2701_v40 = vsel %vm5286_vm2, %v2696_v5, %v2700_v35  ;;  %v3918_v43 = vshll.u32 %v3858_v60, 16  ;;  %v2748_v24 = vshll.u32 %v2640_v48, 16  ;;  %v2642_v62 = vld [vmem:[#allocation4 + $0x38] sm:$0xf] }
 0x357   :  { %v7219_v4 = vpop.permute.xlu2 %3183  ;;  %v2743_v33 = vsel %vm5286_vm2, %v2738_v25, %v2742_v63  ;;  %v2209_v25 = vld [vmem:[#allocation4 + $0x48] sm:$0x1]  ;;  %v2598_v63 = vld [vmem:[#allocation4 + $0x10] sm:$0xf]  ;;  %v3945_v13 = vrot.slane %v3943_v47, 4  ;;  %v3917_v36 = vrot.slane %v3915_v51, 4 }
 0x358   :  { %v2210_v39 = vsel %vm6708_vm1, 0, %v2209_v25  ;;  %2614 = vst.msk [vmem:[#allocation3 + $0x8] sm:$0xf] %vm2169_vm14, %v2598_v63  ;;  %v3357_v61 = vsel %vm5286_vm2, %v3352_v19, %v3356_v31  ;;  %v3920_v6 = vrot.slane %v3918_v43, 5  ;;  %v2750_v31 = vrot.slane %v2748_v24, 5 }
 0x359   :  { %3504 = vrot.lane.b32.xlu1 %v3329_v10, %s5202_s19  ;;  %v3306_v10 = vshll.u32 %v3246_v42, 16  ;;  %v3946_v42 = vshll.u32 %v3862_v16, 16  ;;  %2211 = vst [vmem:[#allocation4 + $0x48] sm:$0x1] %v2210_v39  ;;  %v3859_v60 = vld [vmem:[#allocation4 + $0x24] sm:$0x1] }
 0x35a   :  { %3500 = vrot.lane.b32.xlu0 %v3301_v41, %s5202_s19  ;;  %v3251_v41 = vld [vmem:[#allocation4 + $0x2c] sm:$0x1]  ;;  %v3924_v25 = vshll.u32 %v3859_v60, 16  ;;  %v3256_v63 = vld [vmem:[#allocation4 + $0x40] sm:$0xf] }
 0x35b   :  { %v3308_v29 = vrot.slane %v3306_v10, 5  ;;  %v3340_v27 = vshll.u32 %v3251_v41, 16  ;;  %v3312_v10 = vshll.u32 %v3247_v50, 16  ;;  %v2745_v41 = vshrl.u32 %v2640_v48, 16 }
 0x35c   :  { %v2762_v50 = vshll.u32 %v2642_v62, 16 }
 0x35d   :  { %4110 = vrot.lane.b32.xlu2 %v3899_v3, %s5207_s22  ;;  %v3959_v3 = vrot.slane %v3957_v12, 4  ;;  %v3309_v57 = vor.u32 %v3308_v29, %v3305_v46  ;;  %v3342_v2 = vrot.slane %v3340_v27, 5  ;;  %v3314_v46 = vrot.slane %v3312_v10, 5  ;;  %v3863_v29 = vld [vmem:[#allocation4 + $0x34] sm:$0x1] }
 0x35e   :  { %v2747_v27 = vrot.slane %v2745_v41, 4  ;;  %v3952_v19 = vshll.u32 %v3863_v29, 16  ;;  %v2603_v41 = vld [vmem:[#allocation4 + $0x38] sm:$0xf]  ;;  %v3376_v29 = vshll.u32 %v3256_v63, 16 }
 0x35f   :  { %v7234_v8 = vpop.permute.xlu2 %3795  ;;  %v3963_v22 = vor.u32 %v3962_v21, %v3959_v3  ;;  %v3310_v12 = vrot.slane %v3309_v57, 4  ;;  %v3254_v3 = vld [vmem:[#allocation4 + $0x38] sm:$0xf]  ;;  %v2759_v21 = vshrl.u32 %v2642_v62, 16  ;;  %2619 = vst.msk [vmem:[#allocation3 + $0x1c] sm:$0xf] %vm2169_vm14, %v2603_v41 }
 0x360   :  { %v2751_v51 = vor.u32 %v2750_v31, %v2747_v27  ;;  %v3359_v43 = vshrl.u32 %v3254_v3, 16  ;;  %v3362_v39 = vshll.u32 %v3254_v3, 16 }
 0x361   :  { %4116 = vrot.lane.b32.xlu1 %v3941_v11, %s5207_s22  ;;  %v3964_v49 = vrot.slane %v3963_v22, 4  ;;  %v2761_v34 = vrot.slane %v2759_v21, 4  ;;  %v3954_v22 = vrot.slane %v3952_v19, 5 }
 0x362   :  { %4112 = vrot.lane.b32.xlu0 %v3913_v37, %s5207_s22  ;;  %v3338_v37 = vrot.slane %v3337_v30, 4  ;;  %v3921_v30 = vor.u32 %v3920_v6, %v3917_v36  ;;  %v3361_v36 = vrot.slane %v3359_v43, 4  ;;  %v3364_v6 = vrot.slane %v3362_v39, 5 }
 0x363   :  { %v3081_v59 = vpop.permute.xlu1 %3080 }
 0x364   :  { %3129 = vst.msk [vmem:[#allocation3] sm:$0xf] %vm3128_vm6, %v3081_v59  ;;  %v3948_v59 = vrot.slane %v3946_v42, 5  ;;  %v3343_v5 = vsel %vm5286_vm2, %v3338_v37, %v3342_v2  ;;  %v2641_v42 = vld [vmem:[#allocation4 + $0x34] sm:$0x1]  ;;  %v2764_v37 = vrot.slane %v2762_v50, 5  ;;  %v3365_v19 = vor.u32 %v3364_v6, %v3361_v36 }
 0x365   :  { %2894 = vrot.lane.b32.xlu2 %v2743_v33, %s5197_s11  ;;  %v3966_v33 = vshll.u32 %v3865_v14, 16  ;;  %v3922_v14 = vrot.slane %v3921_v30, 4  ;;  %v2754_v10 = vshll.u32 %v2641_v42, 16  ;;  %v3255_v50 = vld [vmem:[#allocation4 + $0x3c] sm:$0x1] }
 0x366   :  { %v3949_v35 = vor.u32 %v3948_v59, %v3945_v13  ;;  %v3575_v13 = vld [vmem:[#allocation4 + $0x38] sm:$0xe]  ;;  %v2643_v59 = vld [vmem:[#allocation4 + $0x3c] sm:$0x1] }
 0x367   :  { %v7247_v11 = vpop.permute.xlu2 %3185  ;;  %v2768_v60 = vshll.u32 %v2643_v59, 16  ;;  %v5019_v3 = vrot.slane %v3575_v13, 9 }
 0x368   :  { %v3950_v48 = vrot.slane %v3949_v35, 4  ;;  %v2756_v35 = vrot.slane %v2754_v10, 5  ;;  %v3866_v10 = vld [vmem:[#allocation4 + $0x40] sm:$0xf] }
 0x369   :  { %2892 = vrot.lane.b32.xlu1 %v2729_v58, %s5197_s11  ;;  %v3315_v58 = vsel %vm5286_vm2, %v3310_v12, %v3314_v46  ;;  %v2752_v12 = vrot.slane %v2751_v51, 4  ;;  %v3373_v46 = vshrl.u32 %v3256_v63, 16  ;;  %v2770_v51 = vrot.slane %v2768_v60, 5  ;;  %v4188_v60 = vld [vmem:[#allocation4 + $0x44] sm:$0x1] }
 0x36a   :  { %2888 = vrot.lane.b32.xlu0 %v2701_v40, %s5197_s11  ;;  %v3968_v40 = vrot.slane %v3966_v33, 5  ;;  %v2765_v33 = vor.u32 %v2764_v37, %v2761_v34 }
 0x36b   :  { %v7255_v15 = vpop.permute.xlu1 %3179  ;;  %v3375_v42 = vrot.slane %v3373_v46, 4  ;;  %v3764_v46 = vld [vmem:[#allocation4 + $0x48] sm:$0xf] }
 0x36c   :  { %v3178_v17 = vpop.permute.xlu0 %3177  ;;  %v3969_v2 = vsel %vm5286_vm2, %v3964_v49, %v3968_v40  ;;  %v2271_v49 = vld [vmem:[#allocation4 + $0x4c] sm:$0x1]  ;;  %v2766_v40 = vrot.slane %v2765_v33, 4  ;;  %v2646_v33 = vld [vmem:[#allocation4 + $0x58] sm:$0xf] }
 0x36d   :  { %3226 = vst.msk [vmem:[#allocation3] sm:$0xf] %vm3225_vm7, %v3178_v17  ;;  %3508 = vrot.lane.b32.xlu2 %v3357_v61, %s5202_s19  ;;  %v3926_v17 = vrot.slane %v3924_v25, 5  ;;  %v3955_v61 = vsel %vm5286_vm2, %v3950_v48, %v3954_v22  ;;  %v2272_v27 = vsel %vm6758_vm4, 0, %v2271_v49  ;;  %v3378_v25 = vrot.slane %v3376_v29, 5 }
 0x36e   :  { %2273 = vst [vmem:[#allocation4 + $0x4c] sm:$0x1] %v2272_v27  ;;  %v3368_v48 = vshll.u32 %v3255_v50, 16  ;;  %v2771_v34 = vsel %vm5286_vm2, %v2766_v40, %v2770_v51  ;;  %v2274_v22 = vld [vmem:[#allocation4 + $0x54] sm:$0x1] }
 0x36f   :  { %v7265_v16 = vpop.permute.xlu2 %3797  ;;  %v3927_v62 = vsel %vm5286_vm2, %v3922_v14, %v3926_v17  ;;  %v3366_v14 = vrot.slane %v3365_v19, 4  ;;  %v3379_v37 = vor.u32 %v3378_v25, %v3375_v42  ;;  %v2275_v63 = vsel %vm6758_vm4, 0, %v2274_v22  ;;  %v3578_v29 = vld [vmem:[#allocation4 + $0x44] sm:$0x1]  ;;  %v2212_v49 = vld [vmem:[#allocation4 + $0x50] sm:$0x1] }
 0x370   :  { %v3370_v17 = vrot.slane %v3368_v48, 5  ;;  %2276 = vst [vmem:[#allocation4 + $0x54] sm:$0x1] %v2275_v63  ;;  %v4187_v27 = vld [vmem:[#allocation4 + $0x40] sm:$0xe]  ;;  %v2787_v42 = vshrl.u32 %v2646_v33, 16 }
 0x371   :  { %3506 = vrot.lane.b32.xlu1 %v3343_v5, %s5202_s19  ;;  %v3576_v5 = vld [vmem:[#allocation4 + $0x3c] sm:$0x1]  ;;  %v3380_v6 = vrot.slane %v3379_v37, 4  ;;  %v2605_v50 = vld [vmem:[#allocation4 + $0x58] sm:$0xf]  ;;  %v2790_v25 = vshll.u32 %v2646_v33, 16 }
 0x372   :  { %3502 = vrot.lane.b32.xlu0 %v3315_v58, %s5202_s19  ;;  %v2757_v58 = vsel %vm5286_vm2, %v2752_v12, %v2756_v35  ;;  %v3653_v21 = vrot.slane %v3576_v5, 5  ;;  %v3868_v12 = vld [vmem:[#allocation4 + $0x48] sm:$0xf]  ;;  %v3371_v36 = vsel %vm5286_vm2, %v3366_v14, %v3370_v17  ;;  %v3974_v5 = vshll.u32 %v3866_v10, 16  ;;  %2621 = vst.msk [vmem:[#allocation3 + $0x24] sm:$0xf] %vm2169_vm14, %v2605_v50 }
 0x373   :  { %v7271_v47 = vpop.permute.xlu1 %3791  ;;  %v3657_v48 = vrot.slane %v3578_v29, 5  ;;  %v5035_v63 = vrot.slane %v4187_v27, 9  ;;  %v4265_v17 = vrot.slane %v4188_v60, 5 }
 0x374   :  { %v7273_v57 = vpop.permute.xlu0 %3789  ;;  %v3654_v39 = vsel %vm7003_vm11, %v5019_v3, %v3653_v21  ;;  %v3988_v3 = vshll.u32 %v3868_v12, 16  ;;  %v2213_v21 = vsel %vm6708_vm1, 0, %v2212_v49 }
 0x375   :  { %4120 = vrot.lane.b32.xlu2 %v3969_v2, %s5207_s22  ;;  %v3257_v2 = vld [vmem:[#allocation4 + $0x44] sm:$0x1]  ;;  %2214 = vst [vmem:[#allocation4 + $0x50] sm:$0x1] %v2213_v21  ;;  %v3763_v21 = vld [vmem:[#allocation4 + $0x40] sm:$0xf] }
 0x376   :  { %v3382_v59 = vshll.u32 %v3257_v2, 16  ;;  %v3976_v2 = vrot.slane %v3974_v5, 5  ;;  %v3990_v22 = vrot.slane %v3988_v3, 5  ;;  %v2647_v5 = vld [vmem:[#allocation4 + $0x5c] sm:$0x1] }
 0x377   :  { %v7278_v24 = vpop.permute.xlu2 %3082 }
 0x378   :  { %v3384_v35 = vrot.slane %v3382_v59, 5  ;;  %v2789_v59 = vrot.slane %v2787_v42, 4 }
 0x379   :  { %4118 = vrot.lane.b32.xlu1 %v3955_v61, %s5207_s22  ;;  %v3577_v61 = vld [vmem:[#allocation4 + $0x40] sm:$0xe] }
 0x37a   :  { %4114 = vrot.lane.b32.xlu0 %v3927_v62, %s5207_s22  ;;  %v3971_v62 = vshrl.u32 %v3866_v10, 16  ;;  %v5020_v40 = vrot.slane %v3577_v61, 9  ;;  %v3385_v51 = vsel %vm5286_vm2, %v3380_v6, %v3384_v35  ;;  %v2792_v61 = vrot.slane %v2790_v25, 5  ;;  %v4189_v25 = vld [vmem:[#allocation4 + $0x48] sm:$0xe] }
 0x37b   :  { %v7289_v31 = vpop.permute.xlu1 %3181  ;;  %v4266_v35 = vsel %vm7003_vm11, %v5035_v63, %v4265_v17  ;;  %v2645_v63 = vld [vmem:[#allocation4 + $0x54] sm:$0x1] }
 0x37c   :  { %v7293_v30 = vpop.permute.xlu0 %3187  ;;  %v2644_v29 = vld [vmem:[#allocation4 + $0x50] sm:$0xf]  ;;  %v2793_v27 = vor.u32 %v2792_v61, %v2789_v59  ;;  %v3260_v59 = vld [vmem:[#allocation4 + $0x60] sm:$0xf] }
 0x37d   :  { %2896 = vrot.lane.b32.xlu2 %v2757_v58, %s5197_s11  ;;  %v3985_v58 = vshrl.u32 %v3868_v12, 16  ;;  %v3869_v12 = vld [vmem:[#allocation4 + $0x4c] sm:$0x1]  ;;  %v2773_v60 = vshrl.u32 %v2644_v29, 16 }
 0x37f   :  { %v7296_v43 = vpop.permute.xlu2 %3693  ;;  %v3987_v37 = vrot.slane %v3985_v58, 4  ;;  %v2776_v58 = vshll.u32 %v2644_v29, 16 }
 0x381   :  { %3703 = vrot.lane.b32.xlu1 %v3654_v39, %s5205_s20  ;;  %v3973_v39 = vrot.slane %v3971_v62, 4  ;;  %v3991_v33 = vor.u32 %v3990_v22, %v3987_v37  ;;  %v2794_v37 = vrot.slane %v2793_v27, 4  ;;  %v4190_v22 = vld [vmem:[#allocation4 + $0x4c] sm:$0x1]  ;;  %v3404_v27 = vshll.u32 %v3260_v59, 16 }
 0x382   :  { %2898 = vrot.lane.b32.xlu0 %v2771_v34, %s5197_s11  ;;  %v3867_v34 = vld [vmem:[#allocation4 + $0x44] sm:$0x1] }
 0x383   :  { %v7306_v13 = vpop.permute.xlu1 %3793  ;;  %v3977_v6 = vor.u32 %v3976_v2, %v3973_v39  ;;  %v3980_v62 = vshll.u32 %v3867_v34, 16  ;;  %v2775_v39 = vrot.slane %v2773_v60, 4  ;;  %v2778_v2 = vrot.slane %v2776_v58, 5 }
 0x384   :  { %v7308_v41 = vpop.permute.xlu0 %3799 }
 0x385   :  { %3510 = vrot.lane.b32.xlu2 %v3371_v36, %s5202_s19  ;;  %v3658_v36 = vsel %vm7003_vm11, %v5020_v40, %v3657_v48  ;;  %v3978_v3 = vrot.slane %v3977_v6, 4  ;;  %v3982_v50 = vrot.slane %v3980_v62, 5  ;;  %v2796_v40 = vshll.u32 %v2647_v5, 16 }
 0x386   :  { %v3992_v48 = vrot.slane %v3991_v33, 4  ;;  %v4269_v6 = vrot.slane %v4190_v22, 5  ;;  %v2779_v5 = vor.u32 %v2778_v2, %v2775_v39  ;;  %v2782_v33 = vshll.u32 %v2645_v63, 16  ;;  %v3258_v39 = vld [vmem:[#allocation4 + $0x58] sm:$0xf] }
 0x387   :  { %v7315_v19 = vpop.permute.xlu2 %4305  ;;  %v3983_v17 = vsel %vm5286_vm2, %v3978_v3, %v3982_v50  ;;  %v2798_v61 = vrot.slane %v2796_v40, 5  ;;  %v2965_v40 = vld [vmem:[#allocation4 + $0x50] sm:$0xe]  ;;  %v3261_v63 = vld [vmem:[#allocation4 + $0x64] sm:$0x1] }
 0x388   :  { %v2780_v3 = vrot.slane %v2779_v5, 4  ;;  %v5005_v2 = vrot.slane %v2965_v40, 9  ;;  %v3390_v5 = vshll.u32 %v3258_v39, 16 }
 0x389   :  { %3803 = vrot.lane.b32.xlu1 %v3764_v46, %s5204_s8  ;;  %v3994_v46 = vshll.u32 %v3869_v12, 16  ;;  %v5036_v12 = vrot.slane %v4189_v25, 9  ;;  %v2799_v29 = vsel %vm5286_vm2, %v2794_v37, %v2798_v61  ;;  %v2966_v25 = vld [vmem:[#allocation4 + $0x54] sm:$0x1]  ;;  %v3153_v61 = vld [vmem:[#allocation4 + $0x58] sm:$0xf] }
 0x38a   :  { %3512 = vrot.lane.b32.xlu0 %v3385_v51, %s5202_s19  ;;  %v3050_v37 = vrot.slane %v2966_v25, 5 }
 0x38b   :  { %v7322_v14 = vpop.permute.xlu1 %3191  ;;  %v3996_v51 = vrot.slane %v3994_v46, 5  ;;  %v4270_v60 = vsel %vm7003_vm11, %v5036_v12, %v4269_v6  ;;  %v2968_v6 = vld [vmem:[#allocation4 + $0x5c] sm:$0x1] }
 0x38c   :  { %v7324_v10 = vpop.permute.xlu0 %3189  ;;  %v3054_v25 = vrot.slane %v2968_v6, 5 }
 0x38d   :  { %3705 = vrot.lane.b32.xlu2 %v3658_v36, %s5205_s20  ;;  %v2609_v36 = vld [vmem:[#allocation4 + $0x78] sm:$0xf]  ;;  %v3997_v62 = vsel %vm5286_vm2, %v3992_v48, %v3996_v51  ;;  %v3406_v51 = vrot.slane %v3404_v27, 5  ;;  %v3872_v27 = vld [vmem:[#allocation4 + $0x68] sm:$0xf] }
 0x38e   :  { %2625 = vst.msk [vmem:[#allocation3 + $0x34] sm:$0xf] %vm2169_vm14, %v2609_v36  ;;  %v2967_v36 = vld [vmem:[#allocation4 + $0x58] sm:$0xe]  ;;  %v4016_v6 = vshll.u32 %v3872_v27, 16 }
 0x38f   :  { %v7329_v49 = vpop.permute.xlu2 %3084  ;;  %v5006_v40 = vrot.slane %v2967_v36, 9  ;;  %v4013_v36 = vshrl.u32 %v3872_v27, 16  ;;  %v5147_v27 = vld [vmem:[%s8029_s4 + $0x30] sm:$0xff] }
 0x391   :  { %4315 = vrot.lane.b32.xlu1 %v4266_v35, %s5206_s21  ;;  %v3401_v35 = vshrl.u32 %v3260_v59, 16 }
 0x392   :  { %3801 = vrot.lane.b32.xlu0 %v3763_v21, %s5204_s8  ;;  %v2784_v21 = vrot.slane %v2782_v33, 5  ;;  %v3410_v33 = vshll.u32 %v3261_v63, 16  ;;  %v2610_v63 = vld [vmem:[#allocation4 + $0x80] sm:$0xf] }
 0x393   :  { %v7335_v42 = vpop.permute.xlu1 %3691  ;;  %v3403_v48 = vrot.slane %v3401_v35, 4  ;;  %2626 = vst.msk [vmem:[#allocation3 + $0x38] sm:$0xf] %vm2169_vm14, %v2610_v63 }
 0x394   :  { %v7337_v34 = vpop.permute.xlu0 %3086  ;;  %v2785_v22 = vsel %vm5286_vm2, %v2780_v3, %v2784_v21 }
 0x395   :  { %4122 = vrot.lane.b32.xlu2 %v3983_v17, %s5207_s22  ;;  %v2608_v17 = vld [vmem:[#allocation4 + $0x70] sm:$0xf]  ;;  %v3407_v12 = vor.u32 %v3406_v51, %v3403_v48  ;;  %v2606_v48 = vld [vmem:[#allocation4 + $0x60] sm:$0xf] }
 0x396   :  { %2624 = vst.msk [vmem:[#allocation3 + $0x30] sm:$0xf] %vm2169_vm14, %v2608_v17 }
 0x397   :  { %v7345_v46 = vpop.permute.xlu2 %3695  ;;  %v3408_v21 = vrot.slane %v3407_v12, 4  ;;  %2622 = vst.msk [vmem:[#allocation3 + $0x28] sm:$0xf] %vm2169_vm14, %v2606_v48  ;;  %v3259_v12 = vld [vmem:[#allocation4 + $0x5c] sm:$0x1] }
 0x399   :  { %2902 = vrot.lane.b32.xlu1 %v2799_v29, %s5197_s11  ;;  %v3051_v29 = vsel %vm7003_vm11, %v5005_v2, %v3050_v37  ;;  %v2607_v2 = vld [vmem:[#allocation4 + $0x68] sm:$0xf]  ;;  %v3412_v37 = vrot.slane %v3410_v33, 5 }
 0x39a   :  { %4124 = vrot.lane.b32.xlu0 %v3997_v62, %s5207_s22  ;;  %v3387_v62 = vshrl.u32 %v3258_v39, 16  ;;  %v3392_v39 = vrot.slane %v3390_v5, 5  ;;  %2623 = vst.msk [vmem:[#allocation3 + $0x2c] sm:$0xf] %vm2169_vm14, %v2607_v2  ;;  %v4015_v2 = vrot.slane %v4013_v36, 4 }
 0x39b   :  { %v7353_v58 = vpop.permute.xlu1 %4303  ;;  %v3873_v36 = vld [vmem:[#allocation4 + $0x6c] sm:$0x1] }
 0x39c   :  { %v7355_v50 = vpop.permute.xlu0 %3697  ;;  %v3389_v51 = vrot.slane %v3387_v62, 4  ;;  %v3055_v62 = vsel %vm7003_vm11, %v5006_v40, %v3054_v25  ;;  %v3870_v40 = vld [vmem:[#allocation4 + $0x60] sm:$0xf]  ;;  %v5146_v25 = vld [vmem:[%s8029_s4 + $0x28] sm:$0xff] }
 0x39d   :  { %4317 = vrot.lane.b32.xlu2 %v4270_v60, %s5206_s21  ;;  %v5148_v60 = vld [vmem:[%s8029_s4 + $0x38] sm:$0xff]  ;;  %v3999_v7 = vshrl.u32 %v3870_v40, 16 }
 0x39e   :  { %4496 = vmatpush.bf16.msra.mxu2 %v5148_v60  ;;  %5165 = vmatpush.bf16.msra.mxu3 %v5148_v60  ;;  %v3393_v5 = vor.u32 %v3392_v39, %v3389_v51  ;;  %v3396_v60 = vshll.u32 %v3259_v12, 16 }
 0x39f   :  { %v7360_v59 = vpop.permute.xlu2 %4307 }
 0x3a0   :  { %v3394_v63 = vrot.slane %v3393_v5, 4  ;;  %v3398_v12 = vrot.slane %v3396_v60, 5  ;;  %v4022_v60 = vshll.u32 %v3873_v36, 16 }
 0x3a1   :  { %3193 = vrot.lane.b32.xlu1 %v3153_v61, %s5200_s27  ;;  %v3413_v61 = vsel %vm5286_vm2, %v3408_v21, %v3412_v37  ;;  %v3580_v21 = vld [vmem:[#allocation4 + $0x5c] sm:$0x1]  ;;  %v4018_v37 = vrot.slane %v4016_v6, 5 }
 0x3a2   :  { %2900 = vrot.lane.b32.xlu0 %v2785_v22, %s5197_s11  ;;  %v2611_v22 = vld [vmem:[#allocation4 + $0x88] sm:$0xf]  ;;  %4497 = vmatpush.bf16.msra.mxu2 %v5147_v27  ;;  %v3661_v39 = vrot.slane %v3580_v21, 5  ;;  %v3582_v21 = vld [vmem:[#allocation4 + $0x64] sm:$0x1] }
 0x3a3   :  { %v7367_v35 = vpop.permute.xlu1 %3090  ;;  %2627 = vst.msk [vmem:[#allocation3 + $0x3c] sm:$0xf] %vm2169_vm14, %v2611_v22  ;;  %v3154_v22 = vld [vmem:[#allocation4 + $0x60] sm:$0xf]  ;;  %5166 = vmatpush.bf16.msra.mxu3 %v5147_v27  ;;  %v4019_v5 = vor.u32 %v4018_v37, %v4015_v2  ;;  %v3665_v36 = vrot.slane %v3582_v21, 5 }
 0x3a4   :  { %v7372_v3 = vpop.permute.xlu0 %4309 }
 0x3a5   :  { %3096 = vrot.lane.b32.xlu2 %v3051_v29, %s5198_s23  ;;  %v3579_v29 = vld [vmem:[#allocation4 + $0x58] sm:$0xe] }
 0x3a6   :  { %v5021_v51 = vrot.slane %v3579_v29, 9  ;;  %v4002_v29 = vshll.u32 %v3870_v40, 16  ;;  %4498 = vmatpush.bf16.msra.mxu2 %v5146_v25 }
 0x3a7   :  { %v7378_v17 = vpop.permute.xlu2 %3094  ;;  %5167 = vmatpush.bf16.msra.mxu3 %v5146_v25  ;;  %v5144_v25 = vld [vmem:[%s8029_s4 + $0x18] sm:$0xff] }
 0x3a8   :  { %v3662_v37 = vsel %vm7003_vm11, %v5021_v51, %v3661_v39  ;;  %v3871_v39 = vld [vmem:[#allocation4 + $0x64] sm:$0x1] }
 0x3a9   :  { %3516 = vrot.lane.b32.xlu1 %v3413_v61, %s5202_s19  ;;  %v2652_v61 = vld [vmem:[#allocation4 + $0x70] sm:$0xf] }
 0x3aa   :  { %3098 = vrot.lane.b32.xlu0 %v3055_v62, %s5198_s23  ;;  %v3765_v62 = vld [vmem:[#allocation4 + $0x60] sm:$0xf]  ;;  %v2829_v26 = vshrl.u32 %v2652_v61, 16  ;;  %v2832_v23 = vshll.u32 %v2652_v61, 16 }
 0x3ab   :  { %v7387_v33 = vpop.permute.xlu1 %3701 }
 0x3ac   :  { %v7389_v48 = vpop.permute.xlu0 %3088  ;;  %v2831_v61 = vrot.slane %v2829_v26, 4  ;;  %v2834_v40 = vrot.slane %v2832_v23, 5  ;;  %v2653_v26 = vld [vmem:[#allocation4 + $0x74] sm:$0x1] }
 0x3ad   :  { %3195 = vrot.lane.b32.xlu2 %v3154_v22, %s5200_s27  ;;  %v3399_v22 = vsel %vm5286_vm2, %v3394_v63, %v3398_v12  ;;  %v4020_v63 = vrot.slane %v4019_v5, 4  ;;  %v5022_v12 = vrot.slane %v3581_v32, 9 }
 0x3ae   :  { %v2835_v32 = vor.u32 %v2834_v40, %v2831_v61 }
 0x3af   :  { %v3499_v6 = vpop.permute.xlu2 %3498 }
 0x3b0   :  { %3547 = vst.msk [vmem:[#allocation3] sm:$0xf] %vm3546_vm8, %v3499_v6  ;;  %v4001_v6 = vrot.slane %v3999_v7, 4  ;;  %v3666_v7 = vsel %vm7003_vm11, %v5022_v12, %v3665_v36  ;;  %v2836_v40 = vrot.slane %v2835_v32, 4  ;;  %v4192_v12 = vld [vmem:[#allocation4 + $0x64] sm:$0x1] }
 0x3b1   :  { %3805 = vrot.lane.b32.xlu1 %v3765_v62, %s5204_s8  ;;  %3740 = vst.msk [vmem:[#allocation3] sm:$0xf] %vm3739_vm9, %v7335_v42  ;;  %v5145_v42 = vld [vmem:[%s8029_s4 + $0x20] sm:$0xff]  ;;  %v4004_v62 = vrot.slane %v4002_v29, 5  ;;  %v2654_v29 = vld [vmem:[#allocation4 + $0x78] sm:$0xf] }
 0x3b2   :  { %3514 = vrot.lane.b32.xlu0 %v3399_v22, %s5202_s19  ;;  %3838 = vst.msk [vmem:[#allocation3] sm:$0xf] %vm3837_vm10, %v7273_v57  ;;  %v4024_v57 = vrot.slane %v4022_v60, 5  ;;  %4499 = vmatpush.bf16.msra.mxu2 %v5145_v42  ;;  %v2838_v22 = vshll.u32 %v2653_v26, 16  ;;  %v3766_v60 = vld [vmem:[#allocation4 + $0x68] sm:$0xf] }
 0x3b3   :  { %v7405_v2 = vpop.permute.xlu1 %4313  ;;  %5168 = vmatpush.bf16.msra.mxu3 %v5145_v42  ;;  %v4005_v5 = vor.u32 %v4004_v62, %v4001_v6  ;;  %v4191_v42 = vld [vmem:[#allocation4 + $0x60] sm:$0xe]  ;;  %v2843_v36 = vshrl.u32 %v2654_v29, 16  ;;  %v2846_v6 = vshll.u32 %v2654_v29, 16  ;;  %v3266_v62 = vld [vmem:[#allocation4 + $0x78] sm:$0xf] }
 0x3b4   :  { %v7411_v27 = vpop.permute.xlu0 %3699  ;;  %v4025_v51 = vsel %vm5286_vm2, %v4020_v63, %v4024_v57  ;;  %v5143_v63 = vld [vmem:[%s8029_s4 + $0x10] sm:$0xff]  ;;  %v2840_v57 = vrot.slane %v2838_v22, 5  ;;  %v5142_v26 = vld [vmem:[%s8029_s4 + $0x8] sm:$0xff]  ;;  %v3443_v29 = vshrl.u32 %v3266_v62, 16  ;;  %v3446_v1 = vshll.u32 %v3266_v62, 16 }
 0x3b5   :  { %3707 = vrot.lane.b32.xlu2 %v3662_v37, %s5205_s20  ;;  %v4008_v37 = vshll.u32 %v3871_v39, 16 }
 0x3b6   :  { %4500 = vmatpush.bf16.msra.mxu2 %v5144_v25  ;;  %v2841_v32 = vsel %vm5286_vm2, %v2836_v40, %v2840_v57  ;;  %v3448_v57 = vrot.slane %v3446_v1, 5 }
 0x3b7   :  { %v4111_v23 = vpop.permute.xlu2 %4110  ;;  %5169 = vmatpush.bf16.msra.mxu3 %v5144_v25  ;;  %v4010_v25 = vrot.slane %v4008_v37, 5  ;;  %v4194_v37 = vld [vmem:[#allocation4 + $0x6c] sm:$0x1] }
 0x3b8   :  { %4159 = vst.msk [vmem:[#allocation3] sm:$0xf] %vm4158_vm12, %v4111_v23  ;;  %v5037_v23 = vrot.slane %v4191_v42, 9  ;;  %v2848_v42 = vrot.slane %v2846_v6, 5  ;;  %v2655_v6 = vld [vmem:[#allocation4 + $0x7c] sm:$0x1] }
 0x3b9   :  { %4128 = vrot.lane.b32.xlu1 %v4025_v51, %s5207_s22  ;;  %4352 = vst.msk [vmem:[#allocation3] sm:$0xf] %vm4351_vm15, %v7353_v58  ;;  %v4006_v58 = vrot.slane %v4005_v5, 4  ;;  %v4273_v51 = vrot.slane %v4192_v12, 5  ;;  %v2976_v5 = vld [vmem:[#allocation4 + $0x7c] sm:$0x1] }
 0x3ba   :  { %3709 = vrot.lane.b32.xlu0 %v3666_v7, %s5205_s20  ;;  %4501 = vmatpush.bf16.msra.mxu2 %v5143_v63  ;;  %v2975_v7 = vld [vmem:[#allocation4 + $0x78] sm:$0xe]  ;;  %v4193_v12 = vld [vmem:[#allocation4 + $0x68] sm:$0xe] }
 0x3bb   :  { %v7429_v21 = vpop.permute.xlu1 %3092  ;;  %5170 = vmatpush.bf16.msra.mxu3 %v5143_v63  ;;  %v4011_v22 = vsel %vm5286_vm2, %v4006_v58, %v4010_v25  ;;  %v5141_v63 = vld [vmem:[%s8029_s4] sm:$0xff]  ;;  %v5010_v62 = vrot.slane %v2975_v7, 9  ;;  %v3070_v58 = vrot.slane %v2976_v5, 5  ;;  %v4274_v25 = vsel %vm7003_vm11, %v5037_v23, %v4273_v51  ;;  %v2973_v51 = vld [vmem:[#allocation4 + $0x70] sm:$0xe] }
 0x3bc   :  { %v7434_v61 = vpop.permute.xlu0 %4311  ;;  %v2974_v5 = vld [vmem:[#allocation4 + $0x74] sm:$0x1] }
 0x3bd   :  { %3807 = vrot.lane.b32.xlu2 %v3766_v60, %s5204_s8  ;;  %v2845_v60 = vrot.slane %v2843_v36, 4 }
 0x3be   :  { %4502 = vmatpush.bf16.msra.mxu2 %v5142_v26 }
 0x3bf   :  { %v2895_v39 = vpop.permute.xlu2 %2894  ;;  %5171 = vmatpush.bf16.msra.mxu3 %v5142_v26  ;;  %v3267_v26 = vld [vmem:[#allocation4 + $0x7c] sm:$0x1] }
 0x3c0   :  { %2938 = vst.msk [vmem:[#allocation3 + $0x14] sm:$0xf] %vm2932_vm5, %v2895_v39  ;;  %v2849_v39 = vor.u32 %v2848_v42, %v2845_v60 }
 0x3c1   :  { %2908 = vrot.lane.b32.xlu1 %v2841_v32, %s5197_s11  ;;  %3134 = vst.msk [vmem:[#allocation3 + $0x14] sm:$0xf] %vm3128_vm6, %v7367_v35  ;;  %v3445_v35 = vrot.slane %v3443_v29, 4  ;;  %v5038_v32 = vrot.slane %v4193_v12, 9  ;;  %v3268_v29 = vld [vmem:[#allocation4 + $0x80] sm:$0xf] }
 0x3c2   :  { %4126 = vrot.lane.b32.xlu0 %v4011_v22, %s5207_s22  ;;  %3231 = vst.msk [vmem:[#allocation3 + $0x14] sm:$0xf] %vm3225_vm7, %v7293_v30  ;;  %v4277_v22 = vrot.slane %v4194_v37, 5  ;;  %4503 = vmatpush.bf16.msra.mxu2 %v5141_v63  ;;  %v2852_v30 = vshll.u32 %v2655_v6, 16 }
 0x3c3   :  { %v2891_v40 = vpop.permute.xlu1 %2890  ;;  %5172 = vmatpush.bf16.msra.mxu3 %v5141_v63  ;;  %v3449_v23 = vor.u32 %v3448_v57, %v3445_v35  ;;  %v5009_v63 = vrot.slane %v2973_v51, 9  ;;  %v3590_v57 = vld [vmem:[#allocation4 + $0x84] sm:$0x1] }
 0x3c4   :  { %2936 = vst.msk [vmem:[#allocation3 + $0xc] sm:$0xf] %vm2932_vm5, %v2891_v40  ;;  %v2887_v36 = vpop.permute.xlu0 %2886  ;;  %v4278_v7 = vsel %vm7003_vm11, %v5038_v32, %v4277_v22  ;;  %v2854_v60 = vrot.slane %v2852_v30, 5  ;;  %v3066_v40 = vrot.slane %v2974_v5, 5 }
 0x3c5   :  { %3132 = vst.msk [vmem:[#allocation3 + $0xc] sm:$0xf] %vm3128_vm6, %v7337_v34  ;;  %4319 = vrot.lane.b32.xlu2 %v4274_v25, %s5206_s21  ;;  %v3071_v34 = vsel %vm7003_vm11, %v5010_v62, %v3070_v58  ;;  %v3450_v37 = vrot.slane %v3449_v23, 4  ;;  %v3460_v58 = vshll.u32 %v3268_v29, 16 }
 0x3c6   :  { %3229 = vst.msk [vmem:[#allocation3 + $0xc] sm:$0xf] %vm3225_vm7, %v7219_v4  ;;  %v2850_v4 = vrot.slane %v2849_v39, 4 }
 0x3c7   :  { %2934 = vst.msk [vmem:[#allocation3 + $0x4] sm:$0xf] %vm2932_vm5, %v2887_v36  ;;  %v3509_v1 = vpop.permute.xlu2 %3508  ;;  %v3878_v36 = vld [vmem:[#allocation4 + $0x80] sm:$0xf]  ;;  %v3462_v22 = vrot.slane %v3460_v58, 5 }
 0x3c8   :  { %3130 = vst.msk [vmem:[#allocation3 + $0x4] sm:$0xf] %vm3128_vm6, %v7278_v24  ;;  %v3452_v24 = vshll.u32 %v3267_v26, 16  ;;  %v2855_v62 = vsel %vm5286_vm2, %v2850_v4, %v2854_v60  ;;  %v4055_v25 = vshrl.u32 %v3878_v36, 16  ;;  %v4058_v39 = vshll.u32 %v3878_v36, 16 }
 0x3c9   :  { %3552 = vst.msk [vmem:[#allocation3 + $0x14] sm:$0xf] %vm3546_vm8, %v3509_v1  ;;  %3106 = vrot.lane.b32.xlu1 %v3071_v34, %s5198_s23  ;;  %v3681_v26 = vrot.slane %v3590_v57, 5  ;;  %v3269_v34 = vld [vmem:[#allocation4 + $0x84] sm:$0x1] }
 0x3ca   :  { %3745 = vst.msk [vmem:[#allocation3 + $0x14] sm:$0xf] %vm3739_vm9, %v7387_v33  ;;  %4321 = vrot.lane.b32.xlu0 %v4278_v7, %s5206_s21  ;;  %v3457_v33 = vshrl.u32 %v3268_v29, 16  ;;  %v4057_v23 = vrot.slane %v4055_v25, 4  ;;  %v4060_v51 = vrot.slane %v4058_v39, 5 }
 0x3cb   :  { %3843 = vst.msk [vmem:[#allocation3 + $0x14] sm:$0xf] %vm3837_vm10, %v7308_v41  ;;  %v3505_v42 = vpop.permute.xlu1 %3504  ;;  %v3454_v41 = vrot.slane %v3452_v24, 5  ;;  %v3157_v4 = vld [vmem:[#allocation4 + $0x78] sm:$0xf] }
 0x3cc   :  { %3227 = vst.msk [vmem:[#allocation3 + $0x4] sm:$0xf] %vm3225_vm7, %v7255_v15  ;;  %v3501_v12 = vpop.permute.xlu0 %3500  ;;  %v3589_v15 = vld [vmem:[#allocation4 + $0x80] sm:$0xe]  ;;  %v3459_v32 = vrot.slane %v3457_v33, 4  ;;  %v4061_v29 = vor.u32 %v4060_v51, %v4057_v23 }
 0x3cd   :  { %3550 = vst.msk [vmem:[#allocation3 + $0xc] sm:$0xf] %vm3546_vm8, %v3505_v42  ;;  %2910 = vrot.lane.b32.xlu2 %v2855_v62, %s5197_s11  ;;  %v3455_v35 = vsel %vm5286_vm2, %v3450_v37, %v3454_v41  ;;  %v5026_v30 = vrot.slane %v3589_v15, 9  ;;  %v3158_v24 = vld [vmem:[#allocation4 + $0x80] sm:$0xf] }
 0x3ce   :  { %3743 = vst.msk [vmem:[#allocation3 + $0xc] sm:$0xf] %vm3739_vm9, %v7355_v50  ;;  %v3067_v50 = vsel %vm7003_vm11, %v5009_v63, %v3066_v40  ;;  %v3463_v7 = vor.u32 %v3462_v22, %v3459_v32  ;;  %v3880_v37 = vld [vmem:[#allocation4 + $0x88] sm:$0xf]  ;;  %v4062_v62 = vrot.slane %v4061_v29, 4 }
 0x3cf   :  { %3841 = vst.msk [vmem:[#allocation3 + $0xc] sm:$0xf] %vm3837_vm10, %v7234_v8  ;;  %v4121_v6 = vpop.permute.xlu2 %4120  ;;  %v4069_v36 = vshrl.u32 %v3880_v37, 16  ;;  %v4072_v41 = vshll.u32 %v3880_v37, 16  ;;  %v4202_v57 = vld [vmem:[#allocation4 + $0x8c] sm:$0x1] }
 0x3d0   :  { %3548 = vst.msk [vmem:[#allocation3 + $0x4] sm:$0xf] %vm3546_vm8, %v3501_v12  ;;  %v3464_v60 = vrot.slane %v3463_v7, 4  ;;  %v3588_v12 = vld [vmem:[#allocation4 + $0x7c] sm:$0x1] }
 0x3d1   :  { %4164 = vst.msk [vmem:[#allocation3 + $0x14] sm:$0xf] %vm4158_vm12, %v4121_v6  ;;  %3522 = vrot.lane.b32.xlu1 %v3455_v35, %s5202_s19  ;;  %v4071_v25 = vrot.slane %v4069_v36, 4  ;;  %v4074_v39 = vrot.slane %v4072_v41, 5  ;;  %v3770_v7 = vld [vmem:[#allocation4 + $0x88] sm:$0xf] }
 0x3d2   :  { %4357 = vst.msk [vmem:[#allocation3 + $0x14] sm:$0xf] %vm4351_vm15, %v7405_v2  ;;  %3104 = vrot.lane.b32.xlu0 %v3067_v50, %s5198_s23  ;;  %v3466_v2 = vshll.u32 %v3269_v34, 16  ;;  %v2648_v50 = vld [vmem:[#allocation4 + $0x60] sm:$0xf] }
 0x3d3   :  { %3741 = vst.msk [vmem:[#allocation3 + $0x4] sm:$0xf] %vm3739_vm9, %v7296_v43  ;;  %v4117_v8 = vpop.permute.xlu1 %4116  ;;  %v3879_v43 = vld [vmem:[#allocation4 + $0x84] sm:$0x1]  ;;  %v4075_v34 = vor.u32 %v4074_v39, %v4071_v25  ;;  %v2804_v51 = vshll.u32 %v2648_v50, 16 }
 0x3d4   :  { %3839 = vst.msk [vmem:[#allocation3 + $0x4] sm:$0xf] %vm3837_vm10, %v7271_v47  ;;  %v4113_v1 = vpop.permute.xlu0 %4112  ;;  %v3682_v47 = vsel %vm7003_vm11, %v5026_v30, %v3681_v26  ;;  %v4064_v42 = vshll.u32 %v3879_v43, 16  ;;  %v4293_v30 = vrot.slane %v4202_v57, 5  ;;  %v2801_v26 = vshrl.u32 %v2648_v50, 16 }
 0x3d5   :  { %4162 = vst.msk [vmem:[#allocation3 + $0xc] sm:$0xf] %vm4158_vm12, %v4117_v8  ;;  %3201 = vrot.lane.b32.xlu2 %v3157_v4, %s5200_s27  ;;  %v2650_v4 = vld [vmem:[#allocation4 + $0x68] sm:$0xf]  ;;  %v2970_v43 = vld [vmem:[#allocation4 + $0x64] sm:$0x1] }
 0x3d6   :  { %4355 = vst.msk [vmem:[#allocation3 + $0xc] sm:$0xf] %vm4351_vm15, %v7372_v3  ;;  %v3587_v3 = vld [vmem:[#allocation4 + $0x78] sm:$0xe]  ;;  %v2806_v29 = vrot.slane %v2804_v51, 5 }
 0x3d7   :  { %4160 = vst.msk [vmem:[#allocation3 + $0x4] sm:$0xf] %vm4158_vm12, %v4113_v1  ;;  %v2897_v5 = vpop.permute.xlu2 %2896  ;;  %v5025_v33 = vrot.slane %v3587_v3, 9  ;;  %v3769_v1 = vld [vmem:[#allocation4 + $0x80] sm:$0xf] }
 0x3d8   :  { %4353 = vst.msk [vmem:[#allocation3 + $0x4] sm:$0xf] %vm4351_vm15, %v7315_v19  ;;  %v3468_v19 = vrot.slane %v3466_v2, 5  ;;  %v4199_v2 = vld [vmem:[#allocation4 + $0x80] sm:$0xe] }
 0x3d9   :  { %2939 = vst.msk [vmem:[#allocation3 + $0x18] sm:$0xf] %vm2932_vm5, %v2897_v5  ;;  %3717 = vrot.lane.b32.xlu1 %v3682_v47, %s5205_s20  ;;  %v2803_v47 = vrot.slane %v2801_v26, 4  ;;  %v2971_v39 = vld [vmem:[#allocation4 + $0x68] sm:$0xe] }
 0x3da   :  { %3135 = vst.msk [vmem:[#allocation3 + $0x18] sm:$0xf] %vm3128_vm6, %v7429_v21  ;;  %3203 = vrot.lane.b32.xlu0 %v3158_v24, %s5200_s27  ;;  %v3469_v58 = vsel %vm5286_vm2, %v3464_v60, %v3468_v19  ;;  %v3677_v21 = vrot.slane %v3588_v12, 5  ;;  %v4200_v24 = vld [vmem:[#allocation4 + $0x84] sm:$0x1]  ;;  %v2815_v60 = vshrl.u32 %v2650_v4, 16 }
 0x3db   :  { %3232 = vst.msk [vmem:[#allocation3 + $0x18] sm:$0xf] %vm3225_vm7, %v7324_v10  ;;  %v2893_v63 = vpop.permute.xlu1 %2892  ;;  %v4066_v10 = vrot.slane %v4064_v42, 5  ;;  %v2818_v42 = vshll.u32 %v2650_v4, 16  ;;  %v3156_v26 = vld [vmem:[#allocation4 + $0x70] sm:$0xf] }
 0x3dc   :  { %2937 = vst.msk [vmem:[#allocation3 + $0x10] sm:$0xf] %vm2932_vm5, %v2893_v63  ;;  %v2889_v40 = vpop.permute.xlu0 %2888  ;;  %v2649_v63 = vld [vmem:[#allocation4 + $0x64] sm:$0x1]  ;;  %v3583_v51 = vld [vmem:[#allocation4 + $0x68] sm:$0xe] }
 0x3dd   :  { %3133 = vst.msk [vmem:[#allocation3 + $0x10] sm:$0xf] %vm3128_vm6, %v7389_v48  ;;  %3524 = vrot.lane.b32.xlu2 %v3469_v58, %s5202_s19  ;;  %v4067_v35 = vsel %vm5286_vm2, %v4062_v62, %v4066_v10  ;;  %v4201_v48 = vld [vmem:[#allocation4 + $0x88] sm:$0xe]  ;;  %v4289_v62 = vrot.slane %v4200_v24, 5  ;;  %v2817_v58 = vrot.slane %v2815_v60, 4 }
 0x3de   :  { %3230 = vst.msk [vmem:[#allocation3 + $0x10] sm:$0xf] %vm3225_vm7, %v7247_v11  ;;  %v3678_v11 = vsel %vm7003_vm11, %v5025_v33, %v3677_v21  ;;  %v5042_v8 = vrot.slane %v4201_v48, 9  ;;  %v2807_v33 = vor.u32 %v2806_v29, %v2803_v47  ;;  %v2820_v21 = vrot.slane %v2818_v42, 5  ;;  %v3262_v48 = vld [vmem:[#allocation4 + $0x68] sm:$0xf] }
 0x3df   :  { %2935 = vst.msk [vmem:[#allocation3 + $0x8] sm:$0xf] %vm2932_vm5, %v2889_v40  ;;  %v5133_v15 = vld [vmem:[#allocation3] sm:$0xff]  ;;  %v3511_v6 = vpop.permute.xlu2 %3510  ;;  %v5041_v40 = vrot.slane %v4199_v2, 9  ;;  %v2810_v36 = vshll.u32 %v2649_v63, 16  ;;  %v3415_v50 = vshrl.u32 %v3262_v48, 16 }
 0x3e0   :  { %3131 = vst.msk [vmem:[#allocation3 + $0x8] sm:$0xf] %vm3128_vm6, %v7329_v49  ;;  %4504 = vmatmul.bf16.vlgmr.msra.gmra.mxu2 %v5133_v15  ;;  %v3881_v49 = vld [vmem:[#allocation4 + $0x8c] sm:$0x1]  ;;  %v2604_v2 = vld [vmem:[#allocation4 + $0x50] sm:$0xf] }
 0x3e1   :  { %3553 = vst.msk [vmem:[#allocation3 + $0x18] sm:$0xf] %vm3546_vm8, %v3511_v6  ;;  %4134 = vrot.lane.b32.xlu1 %v4067_v35, %s5207_s22  ;;  %v4078_v23 = vshll.u32 %v3881_v49, 16  ;;  %v2651_v15 = vld [vmem:[#allocation4 + $0x6c] sm:$0x1]  ;;  %v4290_v6 = vsel %vm7003_vm11, %v5041_v40, %v4289_v62  ;;  %v2821_v35 = vor.u32 %v2820_v21, %v2817_v58  ;;  %v2812_v57 = vrot.slane %v2810_v36, 5 }
 0x3e2   :  { %3228 = vst.msk [vmem:[#allocation3 + $0x8] sm:$0xf] %vm3225_vm7, %v7289_v31  ;;  %3715 = vrot.lane.b32.xlu0 %v3678_v11, %s5205_s20  ;;  %v2969_v31 = vld [vmem:[#allocation4 + $0x60] sm:$0xe]  ;;  %v5023_v29 = vrot.slane %v3583_v51, 9 }
 0x3e3   :  { %v3507_v32 = vpop.permute.xlu1 %3506  ;;  %v4080_v3 = vrot.slane %v4078_v23, 5  ;;  %v5007_v37 = vrot.slane %v2969_v31, 9  ;;  %2620 = vst.msk [vmem:[#allocation3 + $0x20] sm:$0xf] %vm2169_vm14, %v2604_v2  ;;  %v3263_v42 = vld [vmem:[#allocation4 + $0x6c] sm:$0x1] }
 0x3e4   :  { %3551 = vst.msk [vmem:[#allocation3 + $0x10] sm:$0xf] %vm3546_vm8, %v3507_v32  ;;  %v3503_v22 = vpop.permute.xlu0 %3502  ;;  %v2972_v32 = vld [vmem:[#allocation4 + $0x6c] sm:$0x1]  ;;  %v3265_v62 = vld [vmem:[#allocation4 + $0x74] sm:$0x1] }
 0x3e5   :  { %3744 = vst.msk [vmem:[#allocation3 + $0x10] sm:$0xf] %vm3739_vm9, %v7411_v27  ;;  %3813 = vrot.lane.b32.xlu2 %v3769_v1, %s5204_s8  ;;  %v4294_v27 = vsel %vm7003_vm11, %v5042_v8, %v4293_v30  ;;  %v3418_v8 = vshll.u32 %v3262_v48, 16  ;;  %v3264_v1 = vld [vmem:[#allocation4 + $0x70] sm:$0xf]  ;;  %v3062_v4 = vrot.slane %v2972_v32, 5 }
 0x3e6   :  { %3842 = vst.msk [vmem:[#allocation3 + $0x10] sm:$0xf] %vm3837_vm10, %v7265_v16  ;;  %v4076_v16 = vrot.slane %v4075_v34, 4  ;;  %v5008_v34 = vrot.slane %v2971_v39, 9  ;;  %v3429_v47 = vshrl.u32 %v3264_v1, 16  ;;  %v3432_v24 = vshll.u32 %v3264_v1, 16 }
 0x3e7   :  { %3549 = vst.msk [vmem:[#allocation3 + $0x8] sm:$0xf] %vm3546_vm8, %v3503_v22  ;;  %v7543_v5 = vpop.permute.xlu2 %3705  ;;  %v2822_v22 = vrot.slane %v2821_v35, 4  ;;  %v3874_v21 = vld [vmem:[#allocation4 + $0x70] sm:$0xf] }
 0x3e8   :  { %3742 = vst.msk [vmem:[#allocation3 + $0x8] sm:$0xf] %vm3739_vm9, %v7345_v46  ;;  %v3058_v46 = vrot.slane %v2970_v43, 5  ;;  %v3417_v43 = vrot.slane %v3415_v50, 4  ;;  %v4027_v35 = vshrl.u32 %v3874_v21, 16 }
 0x3e9   :  { %3840 = vst.msk [vmem:[#allocation3 + $0x8] sm:$0xf] %vm3837_vm10, %v7306_v13  ;;  %4329 = vrot.lane.b32.xlu1 %v4294_v27, %s5206_s21  ;;  %v4081_v13 = vsel %vm5286_vm2, %v4076_v16, %v4080_v3  ;;  %v3420_v27 = vrot.slane %v3418_v8, 5  ;;  %v3063_v3 = vsel %vm7003_vm11, %v5008_v34, %v3062_v4  ;;  %v3768_v39 = vld [vmem:[#allocation4 + $0x78] sm:$0xf] }
 0x3ea   :  { %3815 = vrot.lane.b32.xlu0 %v3770_v7, %s5204_s8  ;;  %v3059_v10 = vsel %vm7003_vm11, %v5007_v37, %v3058_v46  ;;  %v3584_v7 = vld [vmem:[#allocation4 + $0x6c] sm:$0x1]  ;;  %v3431_v37 = vrot.slane %v3429_v47, 4  ;;  %v3434_v46 = vrot.slane %v3432_v24, 5  ;;  %v3876_v50 = vld [vmem:[#allocation4 + $0x78] sm:$0xf] }
 0x3eb   :  { %v4119_v12 = vpop.permute.xlu1 %4118  ;;  %v3669_v60 = vrot.slane %v3584_v7, 5  ;;  %v4029_v1 = vrot.slane %v4027_v35, 4  ;;  %v4041_v4 = vshrl.u32 %v3876_v50, 16  ;;  %v4044_v7 = vshll.u32 %v3876_v50, 16  ;;  %v3875_v47 = vld [vmem:[#allocation4 + $0x74] sm:$0x1] }
 0x3ec   :  { %4163 = vst.msk [vmem:[#allocation3 + $0x10] sm:$0xf] %vm4158_vm12, %v4119_v12  ;;  %v4115_v19 = vpop.permute.xlu0 %4114  ;;  %v3421_v12 = vor.u32 %v3420_v27, %v3417_v43  ;;  %v3435_v58 = vor.u32 %v3434_v46, %v3431_v37  ;;  %v2659_v37 = vld [vmem:[#allocation4 + $0x8c] sm:$0x1]  ;;  %v4197_v35 = vld [vmem:[#allocation4 + $0x78] sm:$0xe] }
 0x3ed   :  { %4356 = vst.msk [vmem:[#allocation3 + $0x10] sm:$0xf] %vm4351_vm15, %v7434_v61  ;;  %4136 = vrot.lane.b32.xlu2 %v4081_v13, %s5207_s22  ;;  %v2808_v61 = vrot.slane %v2807_v33, 4  ;;  %v3670_v40 = vsel %vm7003_vm11, %v5023_v29, %v3669_v60  ;;  %v3155_v33 = vld [vmem:[#allocation4 + $0x68] sm:$0xf]  ;;  %v4043_v60 = vrot.slane %v4041_v4, 4 }
 0x3ee   :  { %4161 = vst.msk [vmem:[#allocation3 + $0x8] sm:$0xf] %vm4158_vm12, %v4115_v19  ;;  %v3424_v19 = vshll.u32 %v3263_v42, 16  ;;  %v3422_v13 = vrot.slane %v3421_v12, 4  ;;  %v4046_v42 = vrot.slane %v4044_v7, 5  ;;  %v4036_v12 = vshll.u32 %v3875_v47, 16 }
 0x3ef   :  { %4354 = vst.msk [vmem:[#allocation3 + $0x8] sm:$0xf] %vm4351_vm15, %v7360_v59  ;;  %v7562_v41 = vpop.permute.xlu2 %4122  ;;  %v2824_v59 = vshll.u32 %v2651_v15, 16  ;;  %v2813_v49 = vsel %vm5286_vm2, %v2808_v61, %v2812_v57  ;;  %v3585_v61 = vld [vmem:[#allocation4 + $0x70] sm:$0xe]  ;;  %v3436_v57 = vrot.slane %v3435_v58, 4 }
 0x3f0   :  { %v3426_v36 = vrot.slane %v3424_v19, 5  ;;  %v4047_v58 = vor.u32 %v4046_v42, %v4043_v60  ;;  %v3273_v42 = vld [vmem:[#allocation4 + $0x94] sm:$0x1] }
 0x3f1   :  { %3100 = vrot.lane.b32.xlu1 %v3059_v10, %s5198_s23  ;;  %v2826_v23 = vrot.slane %v2824_v59, 5  ;;  %v2658_v59 = vld [vmem:[#allocation4 + $0x88] sm:$0xf] }
 0x3f2   :  { %4327 = vrot.lane.b32.xlu0 %v4290_v6, %s5206_s21  ;;  %v3586_v6 = vld [vmem:[#allocation4 + $0x74] sm:$0x1]  ;;  %v3427_v48 = vsel %vm5286_vm2, %v3422_v13, %v3426_v36  ;;  %v2871_v34 = vshrl.u32 %v2658_v59, 16 }
 0x3f3   :  { %v3704_v11 = vpop.permute.xlu1 %3703 }
 0x3f4   :  { %3746 = vst.msk [vmem:[#allocation3 + $0x18] sm:$0xf] %vm3739_vm9, %v3704_v11  ;;  %v2899_v25 = vpop.permute.xlu0 %2898  ;;  %v4030_v11 = vshll.u32 %v3874_v21, 16  ;;  %v2873_v24 = vrot.slane %v2871_v34, 4 }
 0x3f5   :  { %2940 = vst.msk [vmem:[#allocation3 + $0x1c] sm:$0xf] %vm2932_vm5, %v2899_v25  ;;  %2904 = vrot.lane.b32.xlu2 %v2813_v49, %s5197_s11  ;;  %v5135_v25 = vld [vmem:[#allocation3 + $0x10] sm:$0xff]  ;;  %v5024_v49 = vrot.slane %v3585_v61, 9 }
 0x3f6   :  { %3136 = vst.msk [vmem:[#allocation3 + $0x1c] sm:$0xf] %vm3128_vm6, %v7378_v17  ;;  %v5134_v30 = vld [vmem:[#allocation3 + $0x8] sm:$0xff]  ;;  %v2827_v17 = vsel %vm5286_vm2, %v2822_v22, %v2826_v23  ;;  %v4195_v22 = vld [vmem:[#allocation4 + $0x70] sm:$0xe]  ;;  %v2874_v23 = vshll.u32 %v2658_v59, 16 }
 0x3f7   :  { %3233 = vst.msk [vmem:[#allocation3 + $0x1c] sm:$0xf] %vm3225_vm7, %v7322_v14  ;;  %v7579_v31 = vpop.permute.xlu2 %4317  ;;  %4509 = vmatmul.bf16.gmra.mxu2 %v5134_v30  ;;  %v3673_v30 = vrot.slane %v3586_v6, 5  ;;  %v4032_v51 = vrot.slane %v4030_v11, 5  ;;  %v5039_v2 = vrot.slane %v4195_v22, 9  ;;  %v4048_v59 = vrot.slane %v4047_v58, 4 }
 0x3f8   :  { %v3471_v58 = vshrl.u32 %v3270_v52, 16 }
 0x3f9   :  { %3199 = vrot.lane.b32.xlu1 %v3156_v26, %s5200_s27  ;;  %v4196_v26 = vld [vmem:[#allocation4 + $0x74] sm:$0x1]  ;;  %v4033_v29 = vor.u32 %v4032_v51, %v4029_v1  ;;  %v2657_v1 = vld [vmem:[#allocation4 + $0x84] sm:$0x1] }
 0x3fa   :  { %2906 = vrot.lane.b32.xlu0 %v2827_v17, %s5197_s11  ;;  %v4281_v17 = vrot.slane %v4196_v26, 5 }
 0x3fb   :  { %v3804_v14 = vpop.permute.xlu1 %3803  ;;  %v4034_v13 = vrot.slane %v4033_v29, 4 }
 0x3fc   :  { %v3513_v16 = vpop.permute.xlu0 %3512  ;;  %v4282_v19 = vsel %vm7003_vm11, %v5039_v2, %v4281_v17  ;;  %v2866_v2 = vshll.u32 %v2657_v1, 16 }
 0x3fd   :  { %3554 = vst.msk [vmem:[#allocation3 + $0x1c] sm:$0xf] %vm3546_vm8, %v3513_v16  ;;  %3102 = vrot.lane.b32.xlu2 %v3063_v3, %s5198_s23  ;;  %v3674_v16 = vsel %vm7003_vm11, %v5024_v49, %v3673_v30  ;;  %v2656_v3 = vld [vmem:[#allocation4 + $0x80] sm:$0xf]  ;;  %v4198_v49 = vld [vmem:[#allocation4 + $0x7c] sm:$0x1] }
 0x3fe   :  { %3747 = vst.msk [vmem:[#allocation3 + $0x1c] sm:$0xf] %vm3739_vm9, %v7543_v5  ;;  %v3438_v5 = vshll.u32 %v3265_v62, 16  ;;  %v3877_v62 = vld [vmem:[#allocation4 + $0x7c] sm:$0x1]  ;;  %v2857_v21 = vshrl.u32 %v2656_v3, 16 }
 0x3ff   :  { %3845 = vst.msk [vmem:[#allocation3 + $0x1c] sm:$0xf] %vm3837_vm10, %v3804_v14  ;;  %v7593_v63 = vpop.permute.xlu2 %3096  ;;  %v2876_v14 = vrot.slane %v2874_v23, 5  ;;  %v2860_v36 = vshll.u32 %v2656_v3, 16  ;;  %v4285_v51 = vrot.slane %v4198_v49, 5  ;;  %v2868_v60 = vrot.slane %v2866_v2, 5 }
 0x400   :  { %v3440_v32 = vrot.slane %v3438_v5, 5 }
 0x401   :  { %3711 = vrot.lane.b32.xlu1 %v3670_v40, %s5205_s20  ;;  %v2877_v40 = vor.u32 %v2876_v14, %v2873_v24 }
 0x402   :  { %3197 = vrot.lane.b32.xlu0 %v3155_v33, %s5200_s27  ;;  %v3767_v33 = vld [vmem:[#allocation4 + $0x70] sm:$0xf] }
 0x403   :  { %v4316_v10 = vpop.permute.xlu1 %4315  ;;  %v2878_v6 = vrot.slane %v2877_v40, 4 }
 0x404   :  { %v3802_v15 = vpop.permute.xlu0 %3801 }
 0x405   :  { %3844 = vst.msk [vmem:[#allocation3 + $0x18] sm:$0xf] %vm3837_vm10, %v3802_v15  ;;  %3518 = vrot.lane.b32.xlu2 %v3427_v48, %s5202_s19  ;;  %v4050_v15 = vshll.u32 %v3877_v62, 16  ;;  %v3272_v48 = vld [vmem:[#allocation4 + $0x90] sm:$0xf] }
 0x406   :  { %4165 = vst.msk [vmem:[#allocation3 + $0x18] sm:$0xf] %vm4158_vm12, %v7562_v41  ;;  %v3441_v41 = vsel %vm5286_vm2, %v3436_v57, %v3440_v32  ;;  %v5040_v32 = vrot.slane %v4197_v35, 9  ;;  %v3485_v34 = vshrl.u32 %v3272_v48, 16  ;;  %v3488_v23 = vshll.u32 %v3272_v48, 16 }
 0x407   :  { %4358 = vst.msk [vmem:[#allocation3 + $0x18] sm:$0xf] %vm4351_vm15, %v4316_v10  ;;  %v7606_v8 = vpop.permute.xlu2 %3195  ;;  %4514 = vmatmul.bf16.gmra.mxu2 %v5135_v25  ;;  %v4038_v10 = vrot.slane %v4036_v12, 5  ;;  %v2859_v25 = vrot.slane %v2857_v21, 4  ;;  %v4052_v22 = vrot.slane %v4050_v15, 5  ;;  %v3494_v21 = vshll.u32 %v3273_v42, 16 }
 0x408   :  { %v3487_v47 = vrot.slane %v3485_v34, 4  ;;  %v3490_v24 = vrot.slane %v3488_v23, 5  ;;  %v4286_v14 = vsel %vm7003_vm11, %v5040_v32, %v4285_v51  ;;  %v3159_v12 = vld [vmem:[#allocation4 + $0x88] sm:$0xf] }
 0x409   :  { %3811 = vrot.lane.b32.xlu1 %v3768_v39, %s5204_s8  ;;  %v4039_v57 = vsel %vm5286_vm2, %v4034_v13, %v4038_v10  ;;  %v2862_v39 = vrot.slane %v2860_v36, 5  ;;  %v2979_v13 = vld [vmem:[#allocation4 + $0x88] sm:$0xe]  ;;  %v3496_v48 = vrot.slane %v3494_v21, 5 }
 0x40a   :  { %3520 = vrot.lane.b32.xlu0 %v3441_v41, %s5202_s19  ;;  %v2239_v41 = vld [vmem:[#allocation4 + $0x98] sm:$0x1]  ;;  %v3491_v40 = vor.u32 %v3490_v24, %v3487_v47 }
 0x40b   :  { %v2903_v43 = vpop.permute.xlu1 %2902  ;;  %v2863_v4 = vor.u32 %v2862_v39, %v2859_v25  ;;  %v2240_v7 = vsel %vm6708_vm1, 0, %v2239_v41  ;;  %v3271_v25 = vld [vmem:[#allocation4 + $0x8c] sm:$0x1]  ;;  %v2301_v39 = vld [vmem:[#allocation4 + $0x9c] sm:$0x1] }
 0x40c   :  { %2942 = vst.msk [vmem:[#allocation3 + $0x24] sm:$0xf] %vm2932_vm5, %v2903_v43  ;;  %v4125_v27 = vpop.permute.xlu0 %4124  ;;  %v3492_v10 = vrot.slane %v3491_v40, 4  ;;  %v3480_v1 = vshll.u32 %v3271_v25, 16  ;;  %v3160_v41 = vld [vmem:[#allocation4 + $0x90] sm:$0xf] }
 0x40d   :  { %4166 = vst.msk [vmem:[#allocation3 + $0x1c] sm:$0xf] %vm4158_vm12, %v4125_v27  ;;  %3713 = vrot.lane.b32.xlu2 %v3674_v16, %s5205_s20  ;;  %v2977_v27 = vld [vmem:[#allocation4 + $0x80] sm:$0xe]  ;;  %v2978_v16 = vld [vmem:[#allocation4 + $0x84] sm:$0x1] }
 0x40e   :  { %4359 = vst.msk [vmem:[#allocation3 + $0x1c] sm:$0xf] %vm4351_vm15, %v7579_v31  ;;  %v2880_v31 = vshll.u32 %v2659_v37, 16  ;;  %v2864_v29 = vrot.slane %v2863_v4, 4  ;;  %v5011_v37 = vrot.slane %v2977_v27, 9  ;;  %v3482_v2 = vrot.slane %v3480_v1, 5 }
 0x40f   :  { %v7619_v46 = vpop.permute.xlu2 %3707  ;;  %2241 = vst [vmem:[#allocation4 + $0x98] sm:$0x1] %v2240_v7  ;;  %v3592_v4 = vld [vmem:[#allocation4 + $0x8c] sm:$0x1]  ;;  %v3771_v27 = vld [vmem:[#allocation4 + $0x90] sm:$0xf] }
 0x410   :  { %v2882_v50 = vrot.slane %v2880_v31, 5  ;;  %v2869_v62 = vsel %vm5286_vm2, %v2864_v29, %v2868_v60  ;;  %v3685_v24 = vrot.slane %v3592_v4, 5  ;;  %v4086_v29 = vshll.u32 %v3882_v45, 16  ;;  %v3594_v60 = vld [vmem:[#allocation4 + $0x94] sm:$0x1] }
 0x411   :  { %4323 = vrot.lane.b32.xlu1 %v4282_v19, %s5206_s21  ;;  %v3074_v19 = vrot.slane %v2978_v16, 5  ;;  %v4083_v16 = vshrl.u32 %v3882_v45, 16  ;;  %v4205_v25 = vld [vmem:[#allocation4 + $0x98] sm:$0xe] }
 0x412   :  { %3809 = vrot.lane.b32.xlu0 %v3767_v33, %s5204_s8  ;;  %v2883_v26 = vsel %vm5286_vm2, %v2878_v6, %v2882_v50  ;;  %v2980_v33 = vld [vmem:[#allocation4 + $0x8c] sm:$0x1]  ;;  %v3473_v6 = vrot.slane %v3471_v58, 4 }
 0x413   :  { %v3194_v5 = vpop.permute.xlu1 %3193  ;;  %v3078_v15 = vrot.slane %v2980_v33, 5  ;;  %v3689_v33 = vrot.slane %v3594_v60, 5  ;;  %v4085_v58 = vrot.slane %v4083_v16, 4 }
 0x414   :  { %v2901_v61 = vpop.permute.xlu0 %2900 }
 0x415   :  { %2941 = vst.msk [vmem:[#allocation3 + $0x20] sm:$0xf] %vm2932_vm5, %v2901_v61  ;;  %v5136_v11 = vld [vmem:[#allocation3 + $0x18] sm:$0xff]  ;;  %4130 = vrot.lane.b32.xlu2 %v4039_v57, %s5207_s22  ;;  %v3075_v61 = vsel %vm7003_vm11, %v5011_v37, %v3074_v19 }
 0x416   :  { %3137 = vst.msk [vmem:[#allocation3 + $0x20] sm:$0xf] %vm3128_vm6, %v7593_v63  ;;  %v4053_v63 = vsel %vm5286_vm2, %v4048_v59, %v4052_v22  ;;  %v3884_v50 = vld [vmem:[#allocation4 + $0x98] sm:$0xf] }
 0x417   :  { %3234 = vst.msk [vmem:[#allocation3 + $0x20] sm:$0xf] %vm3225_vm7, %v3194_v5  ;;  %v7632_v30 = vpop.permute.xlu2 %3807  ;;  %4519 = vmatmul.bf16.gmra.mxu2 %v5136_v11  ;;  %v5012_v5 = vrot.slane %v2979_v13, 9  ;;  %v3497_v11 = vsel %vm5286_vm2, %v3492_v10, %v3496_v48  ;;  %v4097_v32 = vshrl.u32 %v3884_v50, 16  ;;  %v4100_v22 = vshll.u32 %v3884_v50, 16 }
 0x418   :  { %v4203_v48 = vld [vmem:[#allocation4 + $0x90] sm:$0xe] }
 0x419   :  { %2914 = vrot.lane.b32.xlu1 %v2883_v26, %s5197_s11  ;;  %v3079_v59 = vsel %vm7003_vm11, %v5012_v5, %v3078_v15  ;;  %v4099_v34 = vrot.slane %v4097_v32, 4  ;;  %v4102_v23 = vrot.slane %v4100_v22, 5  ;;  %v3772_v15 = vld [vmem:[#allocation4 + $0x98] sm:$0xf]  ;;  %v5043_v50 = vrot.slane %v4203_v48, 9 }
 0x41a   :  { %4132 = vrot.lane.b32.xlu0 %v4053_v63, %s5207_s22  ;;  %v3591_v63 = vld [vmem:[#allocation4 + $0x88] sm:$0xe]  ;;  %v5044_v22 = vrot.slane %v4205_v25, 9 }
 0x41b   :  { %v3517_v43 = vpop.permute.xlu1 %3516  ;;  %v5027_v47 = vrot.slane %v3591_v63, 9 }
 0x41c   :  { %v3099_v17 = vpop.permute.xlu0 %3098 }
 0x41d   :  { %3138 = vst.msk [vmem:[#allocation3 + $0x24] sm:$0xf] %vm3128_vm6, %v3099_v17  ;;  %4325 = vrot.lane.b32.xlu2 %v4286_v14, %s5206_s21  ;;  %v3686_v19 = vsel %vm7003_vm11, %v5027_v47, %v3685_v24 }
 0x41e   :  { %3235 = vst.msk [vmem:[#allocation3 + $0x24] sm:$0xf] %vm3225_vm7, %v7606_v8  ;;  %v3474_v8 = vshll.u32 %v3270_v52, 16 }
 0x41f   :  { %3556 = vst.msk [vmem:[#allocation3 + $0x24] sm:$0xf] %vm3546_vm8, %v3517_v43  ;;  %v7649_v3 = vpop.permute.xlu2 %4319  ;;  %v4103_v43 = vor.u32 %v4102_v23, %v4099_v34 }
 0x420   :  { %v3476_v35 = vrot.slane %v3474_v8, 5  ;;  %v4088_v8 = vrot.slane %v4086_v29, 5 }
 0x421   :  { %3205 = vrot.lane.b32.xlu1 %v3159_v12, %s5200_s27  ;;  %v4104_v42 = vrot.slane %v4103_v43, 4 }
 0x422   :  { %2912 = vrot.lane.b32.xlu0 %v2869_v62, %s5197_s11  ;;  %v3477_v49 = vor.u32 %v3476_v35, %v3473_v6  ;;  %v4089_v5 = vor.u32 %v4088_v8, %v4085_v58 }
 0x423   :  { %v3806_v36 = vpop.permute.xlu1 %3805 }
 0x424   :  { %v3515_v31 = vpop.permute.xlu0 %3514  ;;  %v3478_v7 = vrot.slane %v3477_v49, 4 }
 0x425   :  { %3555 = vst.msk [vmem:[#allocation3 + $0x20] sm:$0xf] %vm3546_vm8, %v3515_v31  ;;  %3108 = vrot.lane.b32.xlu2 %v3075_v61, %s5198_s23  ;;  %v3883_v31 = vld [vmem:[#allocation4 + $0x94] sm:$0x1] }
 0x426   :  { %3748 = vst.msk [vmem:[#allocation3 + $0x20] sm:$0xf] %vm3739_vm9, %v7619_v46  ;;  %v2302_v46 = vsel %vm6758_vm4, 0, %v2301_v39  ;;  %v3483_v14 = vsel %vm5286_vm2, %v3478_v7, %v3482_v2  ;;  %v4092_v6 = vshll.u32 %v3883_v31, 16 }
 0x427   :  { %3846 = vst.msk [vmem:[#allocation3 + $0x20] sm:$0xf] %vm3837_vm10, %v3806_v36  ;;  %v2911_v57 = vpop.permute.xlu2 %2910 }
 0x428   :  { %2946 = vst.msk [vmem:[#allocation3 + $0x34] sm:$0xf] %vm2932_vm5, %v2911_v57  ;;  %v4204_v57 = vld [vmem:[#allocation4 + $0x94] sm:$0x1] }
 0x429   :  { %3528 = vrot.lane.b32.xlu1 %v3497_v11, %s5202_s19  ;;  %2303 = vst [vmem:[#allocation4 + $0x9c] sm:$0x1] %v2302_v46  ;;  %v4094_v11 = vrot.slane %v4092_v6, 5  ;;  %v4297_v49 = vrot.slane %v4204_v57, 5 }
 0x42a   :  { %3110 = vrot.lane.b32.xlu0 %v3079_v59, %s5198_s23 }
 0x42b   :  { %v4129_v26 = vpop.permute.xlu1 %4128  ;;  %v4298_v23 = vsel %vm7003_vm11, %v5043_v50, %v4297_v49 }
 0x42c   :  { %v3710_v51 = vpop.permute.xlu0 %3709 }
 0x42d   :  { %3749 = vst.msk [vmem:[#allocation3 + $0x24] sm:$0xf] %vm3739_vm9, %v3710_v51  ;;  %3207 = vrot.lane.b32.xlu2 %v3160_v41, %s5200_s27 }
 0x42e   :  { %3847 = vst.msk [vmem:[#allocation3 + $0x24] sm:$0xf] %vm3837_vm10, %v7632_v30  ;;  %v3593_v30 = vld [vmem:[#allocation4 + $0x90] sm:$0xe] }
 0x42f   :  { %4168 = vst.msk [vmem:[#allocation3 + $0x24] sm:$0xf] %vm4158_vm12, %v4129_v26  ;;  %v3202_v17 = vpop.permute.xlu2 %3201  ;;  %v5028_v13 = vrot.slane %v3593_v30, 9 }
 0x430   :  { %v3885_v52 = vld [vmem:[#allocation4 + $0x9c] sm:$0x1] }
 0x431   :  { %3817 = vrot.lane.b32.xlu1 %v3771_v27, %s5204_s8  ;;  %v4106_v12 = vshll.u32 %v3885_v52, 16  ;;  %v3690_v10 = vsel %vm7003_vm11, %v5028_v13, %v3689_v33  ;;  %v4206_v39 = vld [vmem:[#allocation4 + $0x9c] sm:$0x1] }
 0x432   :  { %3526 = vrot.lane.b32.xlu0 %v3483_v14, %s5202_s19  ;;  %v4301_v26 = vrot.slane %v4206_v39, 5 }
 0x433   :  { %v2909_v37 = vpop.permute.xlu1 %2908  ;;  %v4108_v62 = vrot.slane %v4106_v12, 5 }
 0x434   :  { %2945 = vst.msk [vmem:[#allocation3 + $0x30] sm:$0xf] %vm2932_vm5, %v2909_v37  ;;  %v4127_v40 = vpop.permute.xlu0 %4126  ;;  %v4302_v18 = vsel %vm7003_vm11, %v5044_v22, %v4301_v26 }
 0x435   :  { %4167 = vst.msk [vmem:[#allocation3 + $0x20] sm:$0xf] %vm4158_vm12, %v4127_v40  ;;  %3719 = vrot.lane.b32.xlu2 %v3686_v19, %s5205_s20  ;;  %v4109_v21 = vsel %vm5286_vm2, %v4104_v42, %v4108_v62 }
 0x436   :  { %4360 = vst.msk [vmem:[#allocation3 + $0x20] sm:$0xf] %vm4351_vm15, %v7649_v3  ;;  %v4090_v3 = vrot.slane %v4089_v5, 4 }
 0x437   :  { %v3525_v36 = vpop.permute.xlu2 %3524 }
 0x438   :  { %v4095_v46 = vsel %vm5286_vm2, %v4090_v3, %v4094_v11 }
 0x439   :  { %4140 = vrot.lane.b32.xlu1 %v4109_v21, %s5207_s22 }
 0x43a   :  { %3721 = vrot.lane.b32.xlu0 %v3690_v10, %s5205_s20 }
 0x43b   :  { %v3107_v61 = vpop.permute.xlu1 %3106 }
 0x43c   :  { %3142 = vst.msk [vmem:[#allocation3 + $0x34] sm:$0xf] %vm3128_vm6, %v3107_v61  ;;  %v4322_v35 = vpop.permute.xlu0 %4321 }
 0x43d   :  { %4361 = vst.msk [vmem:[#allocation3 + $0x24] sm:$0xf] %vm4351_vm15, %v4322_v35  ;;  %3819 = vrot.lane.b32.xlu2 %v3772_v15, %s5204_s8 }
 0x43f   :  { %v3814_v59 = vpop.permute.xlu2 %3813 }
 0x442   :  { %4138 = vrot.lane.b32.xlu0 %v4095_v46, %s5207_s22 }
 0x443   :  { %v3523_v32 = vpop.permute.xlu1 %3522 }
 0x444   :  { %v3105_v1 = vpop.permute.xlu0 %3104  ;;  %v5137_v34 = vld [vmem:[#allocation3 + $0x20] sm:$0xff] }
 0x445   :  { %3141 = vst.msk [vmem:[#allocation3 + $0x30] sm:$0xf] %vm3128_vm6, %v3105_v1  ;;  %4331 = vrot.lane.b32.xlu2 %v4298_v23, %s5206_s21  ;;  %4524 = vmatmul.bf16.gmra.mxu2 %v5137_v34 }
 0x446   :  { %3238 = vst.msk [vmem:[#allocation3 + $0x30] sm:$0xf] %vm3225_vm7, %v3202_v17 }
 0x447   :  { %3559 = vst.msk [vmem:[#allocation3 + $0x30] sm:$0xf] %vm3546_vm8, %v3523_v32  ;;  %v4137_v41 = vpop.permute.xlu2 %4136 }
 0x44a   :  { %4333 = vrot.lane.b32.xlu0 %v4302_v18, %s5206_s21 }
 0x44b   :  { %v3718_v51 = vpop.permute.xlu1 %3717 }
 0x44c   :  { %v3204_v63 = vpop.permute.xlu0 %3203 }
 0x44d   :  { %3239 = vst.msk [vmem:[#allocation3 + $0x34] sm:$0xf] %vm3225_vm7, %v3204_v63 }
 0x44e   :  { %3560 = vst.msk [vmem:[#allocation3 + $0x34] sm:$0xf] %vm3546_vm8, %v3525_v36 }
 0x44f   :  { %3753 = vst.msk [vmem:[#allocation3 + $0x34] sm:$0xf] %vm3739_vm9, %v3718_v51  ;;  %v2905_v4 = vpop.permute.xlu2 %2904 }
 0x450   :  { %2943 = vst.msk [vmem:[#allocation3 + $0x28] sm:$0xf] %vm2932_vm5, %v2905_v4 }
 0x453   :  { %v4135_v7 = vpop.permute.xlu1 %4134 }
 0x454   :  { %v3716_v45 = vpop.permute.xlu0 %3715 }
 0x455   :  { %3752 = vst.msk [vmem:[#allocation3 + $0x30] sm:$0xf] %vm3739_vm9, %v3716_v45 }
 0x456   :  { %3850 = vst.msk [vmem:[#allocation3 + $0x30] sm:$0xf] %vm3837_vm10, %v3814_v59 }
 0x457   :  { %4171 = vst.msk [vmem:[#allocation3 + $0x30] sm:$0xf] %vm4158_vm12, %v4135_v7  ;;  %v3103_v28 = vpop.permute.xlu2 %3102 }
 0x45b   :  { %v4330_v43 = vpop.permute.xlu1 %4329 }
 0x45c   :  { %v3816_v2 = vpop.permute.xlu0 %3815 }
 0x45d   :  { %3851 = vst.msk [vmem:[#allocation3 + $0x34] sm:$0xf] %vm3837_vm10, %v3816_v2 }
 0x45e   :  { %4172 = vst.msk [vmem:[#allocation3 + $0x34] sm:$0xf] %vm4158_vm12, %v4137_v41 }
 0x45f   :  { %4365 = vst.msk [vmem:[#allocation3 + $0x34] sm:$0xf] %vm4351_vm15, %v4330_v43  ;;  %v3519_v47 = vpop.permute.xlu2 %3518 }
 0x463   :  { %v3101_v17 = vpop.permute.xlu1 %3100  ;;  %v4505_v25 = vpop.f32.mrf.mxu2 }
 0x464   :  { %3139 = vst.msk [vmem:[#allocation3 + $0x28] sm:$0xf] %vm3128_vm6, %v3101_v17  ;;  %v4328_v27 = vpop.permute.xlu0 %4327  ;;  %v4547_v18 = vsel %vm1834_vm13, %v4505_v25, 0.0 }
 0x465   :  { %4364 = vst.msk [vmem:[#allocation3 + $0x30] sm:$0xf] %vm4351_vm15, %v4328_v27 }
 0x467   :  { %v3714_v29 = vpop.permute.xlu2 %3713 }
 0x46b   :  { %v3200_v24 = vpop.permute.xlu1 %3199  ;;  %v4507_v39 = vpop.f32.mrf.mxu2 }
 0x46c   :  { %v2907_v14 = vpop.permute.xlu0 %2906  ;;  %v5139_v16 = vld [vmem:[#allocation3 + $0x30] sm:$0xff]  ;;  %v4548_v23 = vsel %vm1834_vm13, %v4507_v39, 0.0 }
 0x46d   :  { %2944 = vst.msk [vmem:[#allocation3 + $0x2c] sm:$0xf] %vm2932_vm5, %v2907_v14  ;;  %4534 = vmatmul.bf16.vlgmr.msra.gmra.mxu3 %v5139_v16  ;;  %v4549_v51 = vadd.f32 %v4548_v23, %v4547_v18 }
 0x46e   :  { %3140 = vst.msk [vmem:[#allocation3 + $0x2c] sm:$0xf] %vm3128_vm6, %v3103_v28 }
 0x46f   :  { %3237 = vst.msk [vmem:[#allocation3 + $0x2c] sm:$0xf] %vm3225_vm7, %v3200_v24  ;;  %v4131_v60 = vpop.permute.xlu2 %4130 }
 0x473   :  { %v3712_v52 = vpop.permute.xlu1 %3711 }
 0x474   :  { %v3198_v30 = vpop.permute.xlu0 %3197 }
 0x475   :  { %3236 = vst.msk [vmem:[#allocation3 + $0x28] sm:$0xf] %vm3225_vm7, %v3198_v30 }
 0x476   :  { %3557 = vst.msk [vmem:[#allocation3 + $0x28] sm:$0xf] %vm3546_vm8, %v3519_v47 }
 0x477   :  { %3750 = vst.msk [vmem:[#allocation3 + $0x28] sm:$0xf] %vm3739_vm9, %v3712_v52  ;;  %v4326_v37 = vpop.permute.xlu2 %4325 }
 0x47a   :  { %v4510_v50 = vpop.f32.mrf.mxu2 }
 0x47b   :  { %v3812_v42 = vpop.permute.xlu1 %3811  ;;  %v4550_v41 = vsel %vm1834_vm13, %v4510_v50, 0.0 }
 0x47c   :  { %v3521_v12 = vpop.permute.xlu0 %3520  ;;  %v4551_v4 = vadd.f32 %v4550_v41, %v4549_v51 }
 0x47d   :  { %3558 = vst.msk [vmem:[#allocation3 + $0x2c] sm:$0xf] %vm3546_vm8, %v3521_v12 }
 0x47e   :  { %3751 = vst.msk [vmem:[#allocation3 + $0x2c] sm:$0xf] %vm3739_vm9, %v3714_v29 }
 0x47f   :  { %3849 = vst.msk [vmem:[#allocation3 + $0x2c] sm:$0xf] %vm3837_vm10, %v3812_v42  ;;  %v3109_v33 = vpop.permute.xlu2 %3108 }
 0x482   :  { %v4512_v49 = vpop.f32.mrf.mxu2 }
 0x483   :  { %v4324_v19 = vpop.permute.xlu1 %4323  ;;  %v4552_v63 = vsel %vm1834_vm13, %v4512_v49, 0.0 }
 0x484   :  { %v3810_v40 = vpop.permute.xlu0 %3809  ;;  %v4553_v45 = vadd.f32 %v4552_v63, %v4551_v4 }
 0x485   :  { %3848 = vst.msk [vmem:[#allocation3 + $0x28] sm:$0xf] %vm3837_vm10, %v3810_v40 }
 0x486   :  { %4169 = vst.msk [vmem:[#allocation3 + $0x28] sm:$0xf] %vm4158_vm12, %v4131_v60 }
 0x487   :  { %4362 = vst.msk [vmem:[#allocation3 + $0x28] sm:$0xf] %vm4351_vm15, %v4324_v19  ;;  %v3208_v36 = vpop.permute.xlu2 %3207 }
 0x48a   :  { %v4515_v46 = vpop.f32.mrf.mxu2 }
 0x48b   :  { %v2915_v62 = vpop.permute.xlu1 %2914  ;;  %v4554_v7 = vsel %vm1834_vm13, %v4515_v46, 0.0 }
 0x48c   :  { %2948 = vst.msk [vmem:[#allocation3 + $0x3c] sm:$0xf] %vm2932_vm5, %v2915_v62  ;;  %v4133_v13 = vpop.permute.xlu0 %4132  ;;  %v4555_v17 = vadd.f32 %v4554_v7, %v4553_v45 }
 0x48d   :  { %4170 = vst.msk [vmem:[#allocation3 + $0x2c] sm:$0xf] %vm4158_vm12, %v4133_v13 }
 0x48e   :  { %4363 = vst.msk [vmem:[#allocation3 + $0x2c] sm:$0xf] %vm4351_vm15, %v4326_v37 }
 0x48f   :  { %v3720_v5 = vpop.permute.xlu2 %3719 }
 0x492   :  { %v4517_v32 = vpop.f32.mrf.mxu2 }
 0x493   :  { %v3206_v58 = vpop.permute.xlu1 %3205  ;;  %v4556_v2 = vsel %vm1834_vm13, %v4517_v32, 0.0 }
 0x494   :  { %v2913_v8 = vpop.permute.xlu0 %2912  ;;  %v4557_v47 = vadd.f32 %v4556_v2, %v4555_v17 }
 0x495   :  { %2947 = vst.msk [vmem:[#allocation3 + $0x38] sm:$0xf] %vm2932_vm5, %v2913_v8  ;;  %v5138_v21 = vld [vmem:[#allocation3 + $0x28] sm:$0xff] }
 0x496   :  { %3143 = vst.msk [vmem:[#allocation3 + $0x38] sm:$0xf] %vm3128_vm6, %v3109_v33  ;;  %4529 = vmatmul.bf16.gmra.mxu2 %v5138_v21 }
 0x497   :  { %3240 = vst.msk [vmem:[#allocation3 + $0x38] sm:$0xf] %vm3225_vm7, %v3206_v58  ;;  %v3820_v6 = vpop.permute.xlu2 %3819 }
 0x49a   :  { %v4520_v22 = vpop.f32.mrf.mxu2 }
 0x49b   :  { %v3529_v31 = vpop.permute.xlu1 %3528  ;;  %v4558_v27 = vsel %vm1834_vm13, %v4520_v22, 0.0 }
 0x49c   :  { %v3111_v10 = vpop.permute.xlu0 %3110  ;;  %v4559_v14 = vadd.f32 %v4558_v27, %v4557_v47 }
 0x49d   :  { %3144 = vst.msk [vmem:[#allocation3 + $0x3c] sm:$0xf] %vm3128_vm6, %v3111_v10 }
 0x49e   :  { %3241 = vst.msk [vmem:[#allocation3 + $0x3c] sm:$0xf] %vm3225_vm7, %v3208_v36 }
 0x49f   :  { %3562 = vst.msk [vmem:[#allocation3 + $0x3c] sm:$0xf] %vm3546_vm8, %v3529_v31  ;;  %v4332_v57 = vpop.permute.xlu2 %4331 }
 0x4a2   :  { %v7750_v26 = vpop.f32.mrf.mxu2 }
 0x4a3   :  { %v3818_v15 = vpop.permute.xlu1 %3817  ;;  %v4560_v24 = vsel %vm1834_vm13, %v7750_v26, 0.0 }
 0x4a4   :  { %v3527_v61 = vpop.permute.xlu0 %3526  ;;  %v4561_v29 = vadd.f32 %v4560_v24, %v4559_v14 }
 0x4a5   :  { %3561 = vst.msk [vmem:[#allocation3 + $0x38] sm:$0xf] %vm3546_vm8, %v3527_v61 }
 0x4a6   :  { %3754 = vst.msk [vmem:[#allocation3 + $0x38] sm:$0xf] %vm3739_vm9, %v3720_v5 }
 0x4a7   :  { %3852 = vst.msk [vmem:[#allocation3 + $0x38] sm:$0xf] %vm3837_vm10, %v3818_v15 }
 0x4ab   :  { %v4141_v3 = vpop.permute.xlu1 %4140 }
 0x4ac   :  { %v3722_v35 = vpop.permute.xlu0 %3721 }
 0x4ad   :  { %3755 = vst.msk [vmem:[#allocation3 + $0x3c] sm:$0xf] %vm3739_vm9, %v3722_v35 }
 0x4ae   :  { %3853 = vst.msk [vmem:[#allocation3 + $0x3c] sm:$0xf] %vm3837_vm10, %v3820_v6 }
 0x4af   :  { %4174 = vst.msk [vmem:[#allocation3 + $0x3c] sm:$0xf] %vm4158_vm12, %v4141_v3 }
 0x4b4   :  { %v4139_v48 = vpop.permute.xlu0 %4138 }
 0x4b5   :  { %4173 = vst.msk [vmem:[#allocation3 + $0x38] sm:$0xf] %vm4158_vm12, %v4139_v48 }
 0x4b6   :  { %4366 = vst.msk [vmem:[#allocation3 + $0x38] sm:$0xf] %vm4351_vm15, %v4332_v57 }
 0x4bc   :  { %v4334_v11 = vpop.permute.xlu0 %4333 }
 0x4bd   :  { %4367 = vst.msk [vmem:[#allocation3 + $0x3c] sm:$0xf] %vm4351_vm15, %v4334_v11 }
 0x4c4   :  { %v5140_v59 = vld [vmem:[#allocation3 + $0x38] sm:$0xff] }
 0x4c5   :  { %4539 = vmatmul.bf16.gmra.mxu3 %v5140_v59 }
 0x4c8   :  { %v7752_v1 = vpop.f32.mrf.mxu2 }
 0x4c9   :  { %v4562_v16 = vsel %vm1834_vm13, %v7752_v1, 0.0 }
 0x4ca   :  { %v4563_v30 = vadd.f32 %v4562_v16, %v4561_v29 }
 0x4d0   :  { %v7754_v34 = vpop.f32.mrf.mxu2 }
 0x4d1   :  { %v4564_v52 = vsel %vm1834_vm13, %v7754_v34, 0.0 }
 0x4d2   :  { %v4565_v37 = vadd.f32 %v4564_v52, %v4563_v30 }
 0x4f0   :  { %v7761_v28 = vpop.f32.mrf.mxu3 }
 0x4f1   :  { %v4570_v33 = vsel %vm1834_vm13, %v7761_v28, 0.0 }
 0x4f8   :  { %v7773_v60 = vpop.f32.mrf.mxu3 }
 0x4f9   :  { %v4572_v8 = vsel %vm1834_vm13, %v7773_v60, 0.0 }
 0x519   :  { %v7763_v43 = vpop.f32.mrf.mxu2 }
 0x51a   :  { %v4566_v12 = vsel %vm1834_vm13, %v7763_v43, 0.0 }
 0x51b   :  { %v4567_v40 = vadd.f32 %v4566_v12, %v4565_v37 }
 0x521   :  { %v4532_v42 = vpop.f32.mrf.mxu2 }
 0x522   :  { %v4568_v19 = vsel %vm1834_vm13, %v4532_v42, 0.0 }
 0x523   :  { %v4569_v62 = vadd.f32 %v4568_v19, %v4567_v40 }
 0x525   :  { %v4571_v58 = vadd.f32 %v4570_v33, %v4569_v62 }
 0x527   :  { %v4573_v36 = vadd.f32 %v4572_v8, %v4571_v58 }
 0x548   :  { %v4540_v13 = vpop.f32.mrf.mxu3 }
 0x549   :  { %v4574_v21 = vsel %vm1834_vm13, %v4540_v13, 0.0 }
 0x54a   :  { %v4575_v31 = vadd.f32 %v4574_v21, %v4573_v36 }
 0x550   :  { %v4542_v10 = vpop.f32.mrf.mxu3 }
 0x551   :  { %v4576_v5 = vsel %vm1834_vm13, %v4542_v10, 0.0 }
 0x552   :  { %v4577_v15 = vadd.f32 %v4576_v5, %v4575_v31 }
 0x554   :  { %v4578_v61 = vrot.slane %v4577_v15, 4 }
 0x556   :  { %v4579_v6 = vadd.f32 %v4578_v61, %v4577_v15 }
 0x558   :  { %v4580_v35 = vrot.slane %v4579_v6, 2 }
 0x55a   :  { %v4581_v3 = vadd.f32 %v4580_v35, %v4579_v6 }
 0x55c   :  { %v4582_v48 = vrot.slane %v4581_v3, 1 }
 0x55e   :  { %v4583_v57 = vadd.f32 %v4582_v48, %v4581_v3 }
 0x560   :  { %v4584_v11 = vmul.f32 0.0078125, %v4583_v57 }
 0x562   :  { %v7784_v59 = vsub.f32 %v4505_v25, %v4584_v11  ;;  %v7786_v23 = vsub.f32 %v4507_v39, %v4584_v11  ;;  %v7788_v18 = vsub.f32 %v4510_v50, %v4584_v11  ;;  %v7790_v41 = vsub.f32 %v4512_v49, %v4584_v11 }
 0x563   :  { %v7796_v4 = vsub.f32 %v4515_v46, %v4584_v11  ;;  %v7800_v45 = vsub.f32 %v4517_v32, %v4584_v11  ;;  %v7806_v2 = vsub.f32 %v4520_v22, %v4584_v11  ;;  %v7812_v47 = vsub.f32 %v7750_v26, %v4584_v11 }
 0x564   :  { %v4601_v51 = vmul.f32 %v7784_v59, %v7784_v59  ;;  %v4602_v63 = vmul.f32 %v7786_v23, %v7786_v23  ;;  %v4603_v7 = vmul.f32 %v7788_v18, %v7788_v18  ;;  %v4604_v25 = vmul.f32 %v7790_v41, %v7790_v41 }
 0x565   :  { %v4605_v17 = vmul.f32 %v7796_v4, %v7796_v4  ;;  %v4606_v32 = vmul.f32 %v7800_v45, %v7800_v45  ;;  %v7818_v16 = vsub.f32 %v7752_v1, %v4584_v11  ;;  %v4607_v22 = vmul.f32 %v7806_v2, %v7806_v2 }
 0x566   :  { %v4617_v39 = vsel %vm1834_vm13, %v4601_v51, 0.0  ;;  %v4618_v50 = vsel %vm1834_vm13, %v4602_v63, 0.0  ;;  %v4620_v46 = vsel %vm1834_vm13, %v4603_v7, 0.0  ;;  %v4622_v24 = vsel %vm1834_vm13, %v4604_v25, 0.0 }
 0x567   :  { %v4619_v49 = vadd.f32 %v4618_v50, %v4617_v39  ;;  %v4624_v29 = vsel %vm1834_vm13, %v4605_v17, 0.0  ;;  %v7824_v30 = vsub.f32 %v7754_v34, %v4584_v11  ;;  %v4608_v26 = vmul.f32 %v7812_v47, %v7812_v47 }
 0x568   :  { %v4626_v12 = vsel %vm1834_vm13, %v4606_v32, 0.0  ;;  %v7830_v19 = vsub.f32 %v7763_v43, %v4584_v11  ;;  %v4609_v1 = vmul.f32 %v7818_v16, %v7818_v16  ;;  %v4628_v40 = vsel %vm1834_vm13, %v4607_v22, 0.0 }
 0x569   :  { %v4621_v27 = vadd.f32 %v4620_v46, %v4619_v49  ;;  %v7835_v33 = vsub.f32 %v4532_v42, %v4584_v11  ;;  %v4610_v34 = vmul.f32 %v7824_v30, %v7824_v30  ;;  %v4630_v58 = vsel %vm1834_vm13, %v4608_v26, 0.0 }
 0x56a   :  { %v7841_v21 = vsub.f32 %v7761_v28, %v4584_v11  ;;  %v4611_v43 = vmul.f32 %v7830_v19, %v7830_v19  ;;  %v4632_v36 = vsel %vm1834_vm13, %v4609_v1, 0.0  ;;  %v7847_v5 = vsub.f32 %v7773_v60, %v4584_v11 }
 0x56b   :  { %v4623_v14 = vadd.f32 %v4622_v24, %v4621_v27  ;;  %v4612_v42 = vmul.f32 %v7835_v33, %v7835_v33  ;;  %v4634_v15 = vsel %vm1834_vm13, %v4610_v34, 0.0  ;;  %v7852_v6 = vsub.f32 %v4540_v13, %v4584_v11 }
 0x56c   :  { %v4613_v28 = vmul.f32 %v7841_v21, %v7841_v21  ;;  %v4636_v35 = vsel %vm1834_vm13, %v4611_v43, 0.0  ;;  %v7857_v48 = vsub.f32 %v4542_v10, %v4584_v11  ;;  %v4614_v60 = vmul.f32 %v7847_v5, %v7847_v5 }
 0x56d   :  { %v4625_v52 = vadd.f32 %v4624_v29, %v4623_v14  ;;  %v4638_v57 = vsel %vm1834_vm13, %v4612_v42, 0.0  ;;  %v4615_v63 = vmul.f32 %v7852_v6, %v7852_v6  ;;  %v1958_v43 = vmul.f32 %v7060_v53, %v6624_v38 }
 0x56e   :  { %v4640_v13 = vsel %vm1834_vm13, %v4613_v28, 0.0  ;;  %v4616_v25 = vmul.f32 %v7857_v48, %v7857_v48  ;;  %v4642_v39 = vsel %vm1834_vm13, %v4614_v60, 0.0  ;;  %v1960_v42 = vmul.f32 %v7060_v53, %v6632_v54 }
 0x56f   :  { %v4627_v37 = vadd.f32 %v4626_v12, %v4625_v52  ;;  %v4644_v10 = vsel %vm1834_vm13, %v4615_v63, 0.0  ;;  %v1962_v28 = vmul.f32 %v7060_v53, %v6650_v44  ;;  %v1963_v38 = vmul.f32 %v7060_v53, %v6658_v0  ;;  %v8058_v44 = vld [vmem:[#allocation5_spill] sm:$0xff] }
 0x570   :  { %v4646_v49 = vsel %vm1834_vm13, %v4616_v25, 0.0  ;;  %v1966_v0 = vmul.f32 %v7060_v53, %v8058_v44 }
 0x571   :  { %v4629_v62 = vadd.f32 %v4628_v40, %v4627_v37 }
 0x573   :  { %v4631_v8 = vadd.f32 %v4630_v58, %v4629_v62  ;;  %v4545_v62 = vld [vmem:[%s8031_s5] sm:$0x1] }
 0x575   :  { %v4633_v31 = vadd.f32 %v4632_v36, %v4631_v8  ;;  %v7878_v36 = vld [vmem:[%s8026_s9] ss:$0 sm:$0xff] }
 0x576   :  { %v1981_v25 = vadd.f32 %v7878_v36, %v1962_v28 }
 0x577   :  { %v4635_v61 = vadd.f32 %v4634_v15, %v4633_v31  ;;  %v1959_v31 = vmul.f32 %v7060_v53, %v6628_v9 }
 0x579   :  { %v4637_v3 = vadd.f32 %v4636_v35, %v4635_v61  ;;  %v1961_v61 = vmul.f32 %v7060_v53, %v6638_v56  ;;  %v1964_v35 = vmul.f32 %v7060_v53, %v6672_v55  ;;  %v7900_v56 = vld [vmem:[%s8030_s6] ss:$0 sm:$0xff] }
 0x57b   :  { %v4639_v51 = vadd.f32 %v4638_v57, %v4637_v3  ;;  %v1965_v3 = vmul.f32 %v7060_v53, %v6681_v20  ;;  %v8059_v57 = vld [vmem:[#allocation6_spill] sm:$0xff] }
 0x57c   :  { %v1969_v55 = vmul.f32 %v7060_v53, %v8059_v57 }
 0x57d   :  { %v4641_v7 = vadd.f32 %v4640_v13, %v4639_v51  ;;  %v1977_v51 = vadd.f32 %v7878_v36, %v1958_v43  ;;  %v1979_v13 = vadd.f32 %v7878_v36, %v1960_v42  ;;  %v1985_v43 = vadd.f32 %v7878_v36, %v1966_v0 }
 0x57e   :  { %v1988_v0 = vadd.f32 %v7878_v36, %v1969_v55 }
 0x57f   :  { %v4643_v50 = vadd.f32 %v4642_v39, %v4641_v7  ;;  %v1980_v7 = vadd.f32 %v7878_v36, %v1961_v61 }
 0x581   :  { %v4645_v11 = vadd.f32 %v4644_v10, %v4643_v50 }
 0x583   :  { %v4647_v17 = vadd.f32 %v4646_v49, %v4645_v11 }
 0x585   :  { %v4648_v46 = vrot.slane %v4647_v17, 4 }
 0x587   :  { %v4649_v27 = vadd.f32 %v4648_v46, %v4647_v17 }
 0x589   :  { %v4650_v32 = vrot.slane %v4649_v27, 2 }
 0x58b   :  { %v4651_v24 = vadd.f32 %v4650_v32, %v4649_v27  ;;  %v1984_v27 = vadd.f32 %v7878_v36, %v1965_v3  ;;  %v8060_v32 = vld [vmem:[#allocation8_spill] sm:$0xff] }
 0x58d   :  { %v4652_v14 = vrot.slane %v4651_v24, 1 }
 0x58f   :  { %v4653_v22 = vadd.f32 %v4652_v14, %v4651_v24  ;;  %v1986_v24 = vadd.f32 %v7878_v36, %v8060_v32  ;;  %v8061_v14 = vld [vmem:[#allocation9_spill] sm:$0xff] }
 0x591   :  { %v4654_v29 = vmul.f32 0.0078125, %v4653_v22  ;;  %v1987_v22 = vadd.f32 %v7878_v36, %v8061_v14 }
 0x593   :  { %v4655_v52 = vadd.f32 1e-05, %v4654_v29 }
 0x595   :  { %5193 = vrsqrt.f32 %v4655_v52  ;;  %vm4662_vm14 = vweird.f32 %v4655_v52 }
 0x59b   :  { %v5194_v26 = vpop.eup %5193 }
 0x59c   :  { %v4657_v12 = vmul.f32 %v5194_v26, %v4655_v52  ;;  %vm4663_vm2 = vweird.f32 %v5194_v26 }
 0x59d   :  { %vm4664_vm1 = vmor %vm4662_vm14, %vm4663_vm2 }
 0x59e   :  { %v4658_v37 = vmul.f32 %v5194_v26, %v4657_v12 }
 0x5a0   :  { %v4659_v1 = vmul.f32 0.5, %v4658_v37 }
 0x5a2   :  { %v4660_v40 = vsub.f32 1.5, %v4659_v1 }
 0x5a4   :  { %v4661_v34 = vmul.f32 %v5194_v26, %v4660_v40 }
 0x5a6   :  { %v4665_v58 = vsel %vm4664_vm1, %v5194_v26, %v4661_v34 }
 0x5a7   :  { %v4666_v8 = vmul.f32 %v4665_v58, %v4545_v62 }
 0x5a9   :  { %v4668_v15 = vperm.slane %v4666_v8, 0 }
 0x5ab   :  { %v4670_v9 = vmul.f32 %v4668_v15, %v7784_v59  ;;  %v4671_v54 = vmul.f32 %v4668_v15, %v7786_v23  ;;  %v4672_v60 = vmul.f32 %v4668_v15, %v7788_v18  ;;  %v4673_v20 = vmul.f32 %v4668_v15, %v7790_v41 }
 0x5ac   :  { %v1978_v59 = vadd.f32 %v7878_v36, %v1959_v31  ;;  %v4674_v23 = vmul.f32 %v4668_v15, %v7796_v4  ;;  %v4679_v18 = vmul.f32 %v4668_v15, %v7824_v30  ;;  %v4680_v63 = vmul.f32 %v4668_v15, %v7830_v19 }
 0x5ad   :  { %v4675_v39 = vmul.f32 %v4668_v15, %v7800_v45  ;;  %v4676_v50 = vmul.f32 %v4668_v15, %v7806_v2  ;;  %v4689_v41 = vadd.f32 %v7900_v56, %v4670_v9  ;;  %v4690_v10 = vadd.f32 %v7900_v56, %v4671_v54 }
 0x5ae   :  { %v4691_v4 = vadd.f32 %v7900_v56, %v4672_v60  ;;  %v1982_v30 = vadd.f32 %v7878_v36, %v1963_v38  ;;  %v1983_v19 = vadd.f32 %v7878_v36, %v1964_v35  ;;  %v4677_v11 = vmul.f32 %v4668_v15, %v7812_v47 }
 0x5af   :  { %v4692_v49 = vadd.f32 %v7900_v56, %v4673_v20  ;;  %v4678_v17 = vmul.f32 %v4668_v15, %v7818_v16  ;;  %v4693_v45 = vadd.f32 %v7900_v56, %v4674_v23  ;;  %v4698_v2 = vadd.f32 %v7900_v56, %v4679_v18 }
 0x5b0   :  { %v4699_v46 = vadd.f32 %v7900_v56, %v4680_v63  ;;  %v4694_v47 = vadd.f32 %v7900_v56, %v4675_v39  ;;  %v4695_v29 = vadd.f32 %v7900_v56, %v4676_v50  ;;  %v4705_v52 = vadd.f32 %v4689_v41, %v1977_v51  ;;  %v8063_v51 = vld [vmem:[#allocation10_spill] sm:$0xff] }
 0x5b1   :  { %v4706_v16 = vadd.f32 %v4690_v10, %v1978_v59  ;;  %v4707_v26 = vadd.f32 %v4691_v4, %v1979_v13  ;;  %v4681_v12 = vmul.f32 %v4668_v15, %v7835_v33  ;;  %v4682_v37 = vmul.f32 %v4668_v15, %v7841_v21 }
 0x5b2   :  { %v4696_v1 = vadd.f32 %v7900_v56, %v4677_v11  ;;  %v4708_v40 = vadd.f32 %v4692_v49, %v1980_v7  ;;  %v4697_v62 = vadd.f32 %v7900_v56, %v4678_v17  ;;  %v4709_v34 = vadd.f32 %v4693_v45, %v1981_v25  ;;  %v8065_v7 = vld [vmem:[#allocation12_spill] sm:$0xff] }
 0x5b3   :  { %v4714_v58 = vadd.f32 %v4698_v2, %v1986_v24  ;;  %v4715_v8 = vadd.f32 %v4699_v46, %v1987_v22  ;;  %v4683_v31 = vmul.f32 %v4668_v15, %v7847_v5  ;;  %v4684_v42 = vmul.f32 %v4668_v15, %v7852_v6  ;;  %v8062_v5 = vld [vmem:[#allocation7_spill] sm:$0xff] }
 0x5b4   :  { %v4710_v61 = vadd.f32 %v4694_v47, %v1982_v30  ;;  %v4711_v28 = vadd.f32 %v4695_v29, %v1983_v19  ;;  %v4721_v38 = vmax.f32 %v4705_v52, 0.0  ;;  %v4722_v33 = vmax.f32 %v4706_v16, 0.0 }
 0x5b5   :  { %v4723_v35 = vmax.f32 %v4707_v26, 0.0  ;;  %v4685_v21 = vmul.f32 %v4668_v15, %v7857_v48  ;;  %v4700_v3 = vadd.f32 %v7900_v56, %v4681_v12  ;;  %v4712_v9 = vadd.f32 %v4696_v1, %v1984_v27 }
 0x5b6   :  { %v4724_v54 = vmax.f32 %v4708_v40, 0.0  ;;  %v4701_v60 = vadd.f32 %v7900_v56, %v4682_v37  ;;  %v4713_v44 = vadd.f32 %v4697_v62, %v1985_v43  ;;  %v4725_v57 = vmax.f32 %v4709_v34, 0.0  ;;  %4737 = vst.msk [vmem:[%s8032_s10] sm:$0xff] %vm1834_vm13, %v4721_v38 }
 0x5b7   :  { %v1973_v6 = vmul.f32 %v7060_v53, %v8062_v5  ;;  %v4702_v48 = vadd.f32 %v7900_v56, %v4683_v31  ;;  %v4726_v15 = vmax.f32 %v4710_v61, 0.0  ;;  %4738 = vst.msk [vmem:[%s8032_s10 + $0x8] sm:$0xff] %vm1834_vm13, %v4722_v33  ;;  %v1989_v20 = vadd.f32 %v7878_v36, %v8063_v51  ;;  %v8064_v53 = vld [vmem:[#allocation11_spill] sm:$0xff] }
 0x5b8   :  { %v4703_v59 = vadd.f32 %v7900_v56, %v4684_v42  ;;  %v4727_v23 = vmax.f32 %v4711_v28, 0.0  ;;  %4739 = vst.msk [vmem:[%s8032_s10 + $0x10] sm:$0xff] %vm1834_vm13, %v4723_v35  ;;  %v1990_v55 = vadd.f32 %v7878_v36, %v8064_v53  ;;  %v4704_v18 = vadd.f32 %v7900_v56, %v4685_v21 }
 0x5b9   :  { %v4716_v63 = vadd.f32 %v4700_v3, %v1988_v0  ;;  %v4728_v13 = vmax.f32 %v4712_v9, 0.0  ;;  %4740 = vst.msk [vmem:[%s8032_s10 + $0x18] sm:$0xff] %vm1834_vm13, %v4724_v54  ;;  %v1991_v25 = vadd.f32 %v7878_v36, %v8065_v7  ;;  %v4717_v39 = vadd.f32 %v4701_v60, %v1989_v20 }
 0x5ba   :  { %v4729_v50 = vmax.f32 %v4713_v44, 0.0  ;;  %4741 = vst.msk [vmem:[%s8032_s10 + $0x20] sm:$0xff] %vm1834_vm13, %v4725_v57  ;;  %v1992_v41 = vadd.f32 %v7878_v36, %v1973_v6  ;;  %v4718_v56 = vadd.f32 %v4702_v48, %v1990_v55  ;;  %v4730_v10 = vmax.f32 %v4714_v58, 0.0 }
 0x5bb   :  { %4742 = vst.msk [vmem:[%s8032_s10 + $0x28] sm:$0xff] %vm1834_vm13, %v4726_v15  ;;  %v4719_v4 = vadd.f32 %v4703_v59, %v1991_v25  ;;  %v4731_v30 = vmax.f32 %v4715_v8, 0.0  ;;  %v4732_v11 = vmax.f32 %v4716_v63, 0.0  ;;  %v4733_v36 = vmax.f32 %v4717_v39, 0.0 }
 0x5bc   :  { %4743 = vst.msk [vmem:[%s8032_s10 + $0x30] sm:$0xff] %vm1834_vm13, %v4727_v23  ;;  %v4720_v19 = vadd.f32 %v4704_v18, %v1992_v41  ;;  %v4734_v49 = vmax.f32 %v4718_v56, 0.0 }
 0x5bd   :  { %4744 = vst.msk [vmem:[%s8032_s10 + $0x38] sm:$0xff] %vm1834_vm13, %v4728_v13  ;;  %v4735_v17 = vmax.f32 %v4719_v4, 0.0 }
 0x5be   :  { %4745 = vst.msk [vmem:[%s8032_s10 + $0x40] sm:$0xff] %vm1834_vm13, %v4729_v50  ;;  %v4736_v45 = vmax.f32 %v4720_v19, 0.0 }
 0x5bf   :  { %4746 = vst.msk [vmem:[%s8032_s10 + $0x48] sm:$0xff] %vm1834_vm13, %v4730_v10 }
 0x5c0   :  { %4747 = vst.msk [vmem:[%s8032_s10 + $0x50] sm:$0xff] %vm1834_vm13, %v4731_v30 }
 0x5c1   :  { %4748 = vst.msk [vmem:[%s8032_s10 + $0x58] sm:$0xff] %vm1834_vm13, %v4732_v11 }
 0x5c2   :  { %4749 = vst.msk [vmem:[%s8032_s10 + $0x60] sm:$0xff] %vm1834_vm13, %v4733_v36 }
 0x5c3   :  { %4750 = vst.msk [vmem:[%s8032_s10 + $0x68] sm:$0xff] %vm1834_vm13, %v4734_v49 }
 0x5c4   :  { %4751 = vst.msk [vmem:[%s8032_s10 + $0x70] sm:$0xff] %vm1834_vm13, %v4735_v17 }
 0x5c5   :  { %4752 = vst.msk [vmem:[%s8032_s10 + $0x78] sm:$0xff] %vm1834_vm13, %v4736_v45 }

</bundles_post_ra>
